<compile_context>
chip_gen: v5e
topology: v5e:2x2
jax: 0.10.0
libtpu: 0.0.40
codegen_flags: <defaults>
</compile_context>

<pallas_src>
import functools

import jax
import jax.numpy as jnp
from jax.experimental import pallas as pl
from jax.experimental.pallas import tpu as pltpu


COUT_PAD = 128     # lane-dense padded channel width for every block output
HEAD_PAD = 128     # lane-dense padded width of the merged classifier head


def _choose_batch_tile(n):
    """Largest bf16-friendly batch tile that still leaves >= 2 grid steps
    (so the 'parallel' grid axis can shard across v7x's two TensorCores).
    VMEM stays well under 64 MiB even at bt=64 / image_size=16."""
    for bt in (64, 32):
        if n >= 2 * bt:
            return bt
    return 16


# ------------------------------ fused kernel ---------------------------------

def acgan_fused_kernel(x0_ref, w0_ref, w1_ref, w2_ref, w3_ref, tail_ref,
                       hw_ref, hb_ref, out_ref, pad1_ref, pad2_ref, pad3_ref,
                       *, n_classes, ds):
    bt = out_ref.shape[0]

    def tail(acc, b, with_shift):
        """Conv bias + LeakyReLU(0.2) (+ folded-BN shift).  Dropout2d = id."""
        y = acc + tail_ref[b, 0]
        y = jnp.where(y >= 0.0, y, 0.2 * y)
        if with_shift:
            y = y + tail_ref[b, 1]
        return y

    def write_padded(pad_ref, y):
        """Write y (Hin, Win, bt, C) into pad_ref interior [1:,1:]; zero only
        the top row / left column (bottom/right padding of a stride-2 3x3 conv
        with even Hin is never read, so it may stay unwritten)."""
        hin, win, _, c = y.shape
        pad_ref[0:1] = jnp.zeros((1, win + 2, bt, c), pad_ref.dtype)
        pad_ref[1:hin + 1, 0:1] = jnp.zeros((hin, 1, bt, c), pad_ref.dtype)
        pad_ref[1:hin + 1, 1:win + 1] = y.astype(pad_ref.dtype)

    def conv_from_padded(pad_ref, w_ref, b, with_shift):
        """3x3 / stride-2 / pad-1 conv block read from a padded VMEM scratch:
        lane-concatenate the 9 taps into one (M, 9*Cin) operand, single dot."""
        hp, wp, _, cin = pad_ref.shape
        ho, wo = (hp - 2) // 2, (wp - 2) // 2
        xp = pad_ref[...]
        xr = xp.reshape(hp // 2, 2, wp, bt, cin)              # row-parity split
        taps = []
        for dy in range(3):
            rows = xr[dy // 2: dy // 2 + ho, dy % 2]          # (ho, wp, bt, cin)
            rowsr = rows.reshape(ho, wp // 2, 2, bt, cin)     # col-parity split
            for dx in range(3):
                taps.append(rowsr[:, dx // 2: dx // 2 + wo, dx % 2])
        patches = jnp.concatenate(taps, axis=-1)              # (ho, wo, bt, 9*cin)
        patches = patches.reshape(ho * wo * bt, 9 * cin)
        acc = jnp.dot(patches, w_ref[...], preferred_element_type=jnp.float32)
        return tail(acc, b, with_shift).reshape(ho, wo, bt, w_ref.shape[-1])

    # Block 1 (no BN): im2col was hoisted to the wrapper -> single matmul.
    h1, w1, _, k0 = x0_ref.shape
    p0 = x0_ref[...].reshape(h1 * w1 * bt, k0)
    a0 = tail(jnp.dot(p0, w0_ref[...], preferred_element_type=jnp.float32),
              0, False)
    write_padded(pad1_ref, a0.reshape(h1, w1, bt, COUT_PAD))

    # Blocks 2-4.  BN scale of blocks 2-3 is pre-folded into the next conv's
    # weights; block-4 BN is pre-folded into the head weights/bias.
    a1 = conv_from_padded(pad1_ref, w1_ref, 1, True)
    write_padded(pad2_ref, a1)
    a2 = conv_from_padded(pad2_ref, w2_ref, 2, True)
    write_padded(pad3_ref, a2)
    a3 = conv_from_padded(pad3_ref, w3_ref, 3, False)         # (ds, ds, bt, 128)

    # Merged classifier heads: one long-K dot over all ds*ds spatial slices.
    if ds == 1:
        feats = a3.reshape(bt, COUT_PAD)
    else:
        feats = jnp.concatenate(
            [a3[i, j] for i in range(ds) for j in range(ds)], axis=-1)
    logits = jnp.dot(feats.astype(jnp.bfloat16), hw_ref[...],
                     preferred_element_type=jnp.float32) + hb_ref[...]

    # Lane-dense epilogue: softmax over cols [0, n_classes), sigmoid in column
    # n_classes, zeros elsewhere -> single unmasked full-128-lane store.
    lane = jax.lax.broadcasted_iota(jnp.int32, (bt, HEAD_PAD), 1)
    is_cls = lane < n_classes
    cls = jnp.where(is_cls, logits, -1e30)
    cls = cls - jnp.max(cls, axis=-1, keepdims=True)
    e = jnp.where(is_cls, jnp.exp(cls), 0.0)
    probs = e * pl.reciprocal(jnp.sum(e, axis=-1, keepdims=True), approx=True)
    sig = pl.reciprocal(1.0 + jnp.exp(-logits), approx=True)
    out_ref[...] = jnp.where(is_cls, probs,
                             jnp.where(lane == n_classes, sig, 0.0))


# -------------------------------- JAX wrapper ---------------------------------

@functools.partial(jax.jit, static_argnames=("n_classes",))
def acgan_discriminator_forward(img_nchw, kp, n_classes):
    """img_nchw: (N, nc, H, W) -> (validity (N, 1), label (N, n_classes))."""
    N, nc, H, W = img_nchw.shape
    assert H == W and H % 16 == 0, "image_size must be square, divisible by 16"
    assert n_classes + 1 <= HEAD_PAD
    ds = H // 2 ** 4
    h1, w1 = H // 2, W // 2

    bt = _choose_batch_tile(N)
    n_pad = -(-N // bt) * bt

    # Batch pad + spatial zero-pad (padding=1) + block-1 im2col, all in XLA.
    # Resulting layout: (h1, w1, batch, 9*nc), lanes ordered tap-major then cin.
    img = jnp.pad(img_nchw.astype(jnp.float32),
                  ((0, n_pad - N), (0, 0), (1, 1), (1, 1)))
    taps = [img[:, :, dy:dy + H:2, dx:dx + W:2]
            for dy in range(3) for dx in range(3)]           # 9 x (n_pad, nc, h1, w1)
    x0 = jnp.stack(taps, axis=0).transpose(3, 4, 1, 0, 2)    # (h1, w1, n_pad, 9, nc)
    x0 = x0.reshape(h1, w1, n_pad, 9 * nc).astype(jnp.bfloat16)

    kernel = functools.partial(acgan_fused_kernel, n_classes=n_classes, ds=ds)
    out = pl.pallas_call(
        kernel,
        out_shape=jax.ShapeDtypeStruct((n_pad, HEAD_PAD), jnp.float32),
        grid=(n_pad // bt,),
        in_specs=[
            pl.BlockSpec((h1, w1, bt, 9 * nc), lambda i: (0, 0, i, 0)),
            # NOTE: the weight inputs are grid-invariant; pl.Buffered(1) would
            # shave a little VMEM but double-buffering is harmless at this size.
            pl.BlockSpec(kp["w"][0].shape, lambda i: (0, 0)),
            pl.BlockSpec(kp["w"][1].shape, lambda i: (0, 0)),
            pl.BlockSpec(kp["w"][2].shape, lambda i: (0, 0)),
            pl.BlockSpec(kp["w"][3].shape, lambda i: (0, 0)),
            pl.BlockSpec(kp["tail"].shape, lambda i: (0, 0, 0, 0)),
            pl.BlockSpec(kp["head_w"].shape, lambda i: (0, 0)),
            pl.BlockSpec(kp["head_b"].shape, lambda i: (0, 0)),
        ],
        out_specs=pl.BlockSpec((bt, HEAD_PAD), lambda i: (i, 0)),
        scratch_shapes=[
            pltpu.VMEM((h1 + 2, w1 + 2, bt, COUT_PAD), jnp.bfloat16),
            pltpu.VMEM((h1 // 2 + 2, w1 // 2 + 2, bt, COUT_PAD), jnp.bfloat16),
            pltpu.VMEM((h1 // 4 + 2, w1 // 4 + 2, bt, COUT_PAD), jnp.bfloat16),
        ],
        compiler_params=pltpu.CompilerParams(
            dimension_semantics=("parallel",),
            vmem_limit_bytes=64 * 1024 * 1024),
    )(x0, kp["w"][0], kp["w"][1], kp["w"][2], kp["w"][3],
      kp["tail"], kp["head_w"], kp["head_b"])

    return out[:N, n_classes:n_classes + 1], out[:N, :n_classes]


# ------------------------------- parameter prep -------------------------------

def make_params(key, nc, n_classes, image_size):
    """Deterministic synthetic parameters matching the PyTorch module shapes."""
    chans = [nc, 16, 32, 64, 128]
    has_bn = [False, True, True, True]
    blocks = []
    for i in range(4):
        cin, cout = chans[i], chans[i + 1]
        key, kw, kb, kg, kbt, km, kv = jax.random.split(key, 7)
        # HWIO layout (dy, dx, cin, cout).  Real PyTorch OIHW weights would need
        # w_hwio = torch_w.transpose(2, 3, 1, 0) before packing.
        w = jax.random.normal(kw, (3, 3, cin, cout), jnp.float32) * 0.05
        b = jax.random.normal(kb, (cout,), jnp.float32) * 0.05
        if has_bn[i]:
            eps = 0.8                      # BatchNorm2d(cout, 0.8) -> eps=0.8
            gamma = 1.0 + 0.1 * jax.random.normal(kg, (cout,), jnp.float32)
            beta = 0.1 * jax.random.normal(kbt, (cout,), jnp.float32)
            rmean = 0.1 * jax.random.normal(km, (cout,), jnp.float32)
            rvar = jnp.abs(1.0 + 0.1 * jax.random.normal(kv, (cout,), jnp.float32))
            scale = gamma / jnp.sqrt(rvar + eps)
            shift = beta - rmean * scale
        else:
            scale = jnp.ones((cout,), jnp.float32)
            shift = jnp.zeros((cout,), jnp.float32)
        blocks.append({"w": w, "b": b, "scale": scale, "shift": shift})

    ds = image_size // 2 ** 4
    feat = 128 * ds * ds
    key, k1, k2, k3, k4 = jax.random.split(key, 5)
    head = {
        "adv_w": jax.random.normal(k1, (feat, 1), jnp.float32) * 0.05,
        "adv_b": jax.random.normal(k2, (1,), jnp.float32) * 0.05,
        "aux_w": jax.random.normal(k3, (feat, n_classes), jnp.float32) * 0.05,
        "aux_b": jax.random.normal(k4, (n_classes,), jnp.float32) * 0.05,
    }
    return {"blocks": blocks, "head": head}


def pack_params(params, nc, n_classes, image_size):
    """Prep-time repack: tap-folded (9*Cin, 128) bf16 conv weights, folded BN,
    merged + NCHW-permutation-corrected classifier head, 128-lane padding."""
    ds = image_size // 2 ** 4
    blocks = params["blocks"]

    # BN folding (exact; assumes BN gamma != 0):
    #   blocks 2-3: scale -> next conv's weights (over Cin); tail keeps shift/scale.
    #   block 4:    scale & shift -> head weights/bias (no padding after block 4).
    w_eff = [blk["w"] for blk in blocks]
    shift_eff = [None, None, None, None]
    for i in (1, 2):
        s, t = blocks[i]["scale"], blocks[i]["shift"]
        shift_eff[i] = t / s
        w_eff[i + 1] = w_eff[i + 1] * s[None, None, :, None]

    w_list, tails = [], []
    for i in range(4):
        cin, cout = w_eff[i].shape[2], w_eff[i].shape[3]
        if i == 0:
            w = jnp.pad(w_eff[0].reshape(9 * cin, cout),
                        ((0, 0), (0, COUT_PAD - cout)))        # (9*nc, 128)
        else:
            w = jnp.zeros((3, 3, COUT_PAD, COUT_PAD), jnp.float32)
            w = w.at[:, :, :cin, :cout].set(w_eff[i])
            w = w.reshape(9 * COUT_PAD, COUT_PAD)              # (1152, 128)
        w_list.append(w.astype(jnp.bfloat16))

        bias = jnp.zeros((COUT_PAD,), jnp.float32).at[:cout].set(blocks[i]["b"])
        shift = jnp.zeros((COUT_PAD,), jnp.float32)
        if shift_eff[i] is not None:
            shift = shift.at[:cout].set(shift_eff[i])
        tails.append(jnp.stack([bias, shift], axis=0))
    tail = jnp.stack(tails, axis=0).reshape(4, 2, 1, COUT_PAD)

    # Merged heads: cols [0, n_classes) = aux (softmax), col n_classes = adv.
    head = params["head"]
    feat = 128 * ds * ds
    hw = jnp.zeros((feat, HEAD_PAD), jnp.float32)
    hw = hw.at[:, :n_classes].set(head["aux_w"])
    hw = hw.at[:, n_classes:n_classes + 1].set(head["adv_w"])
    hb = jnp.zeros((HEAD_PAD,), jnp.float32)
    hb = hb.at[:n_classes].set(head["aux_b"])
    hb = hb.at[n_classes].set(head["adv_b"][0])
    # Fold block-4 BN: PyTorch flatten feature index f = c*ds^2 + k.
    s3, t3 = blocks[3]["scale"], blocks[3]["shift"]
    s_feat = jnp.repeat(s3, ds * ds)
    t_feat = jnp.repeat(t3, ds * ds)
    hb = hb + t_feat @ hw
    hw = hw * s_feat[:, None]
    # Permute rows from NCHW-flatten order (c*ds^2 + k) to the kernel's
    # lane-concat order (k*128 + c).
    hw = hw.reshape(128, ds * ds, HEAD_PAD).transpose(1, 0, 2)
    hw = hw.reshape(ds * ds * 128, HEAD_PAD).astype(jnp.bfloat16)

    return {"w": w_list, "tail": tail,
            "head_w": hw, "head_b": hb.reshape(1, HEAD_PAD)}


# ------------------------------------ main ------------------------------------

if __name__ == "__main__":
    # args.nc = 4, args.image_size = 16, args.n_classes = 10, batch = 2
    nc, image_size, n_classes, batch = 4, 16, 10, 2

    key = jax.random.PRNGKey(0)
    key, k_img, k_par = jax.random.split(key, 3)
    img = jax.random.normal(k_img, (batch, nc, image_size, image_size), jnp.float32)
    params = make_params(k_par, nc, n_classes, image_size)
    kp = pack_params(params, nc, n_classes, image_size)

    validity, label = acgan_discriminator_forward(img, kp, n_classes)
    jax.block_until_ready((validity, label))

    assert validity.shape == (batch, 1)
    assert label.shape == (batch, n_classes)
    # TODO(synk): training-mode Dropout2d and batch-statistics BatchNorm paths are
    # not implemented; this forward runs in inference mode (folded running stats).
    print("KERNEL_OK")
</pallas_src>

<mosaic_0001>
module attributes {stable_mosaic.version = 11 : i64} {
  func.func @acgan_fused_kernel(%arg0: i32, %arg1: memref<8x8x16x36xbf16, #tpu.memory_space<vmem>>, %arg2: memref<36x128xbf16, #tpu.memory_space<vmem>>, %arg3: memref<1152x128xbf16, #tpu.memory_space<vmem>>, %arg4: memref<1152x128xbf16, #tpu.memory_space<vmem>>, %arg5: memref<1152x128xbf16, #tpu.memory_space<vmem>>, %arg6: memref<4x2x1x128xf32, #tpu.memory_space<vmem>>, %arg7: memref<128x128xbf16, #tpu.memory_space<vmem>>, %arg8: memref<1x128xf32, #tpu.memory_space<vmem>>, %arg9: memref<16x128xf32, #tpu.memory_space<vmem>>, %arg10: memref<10x10x16x128xbf16, #tpu.memory_space<vmem>>, %arg11: memref<6x6x16x128xbf16, #tpu.memory_space<vmem>>, %arg12: memref<4x4x16x128xbf16, #tpu.memory_space<vmem>>) attributes {dimension_semantics = [#tpu.dimension_semantics<parallel>], iteration_bounds = array<i64: 1>, scalar_prefetch = 0 : i64, scratch_operands = 3 : i64, tpu.core_type = #tpu.core_type<tc>, window_params = [{transform_indices = @transform_0, window_bounds = array<i64: 8, 8, 16, 36>}, {pipeline_mode = #tpu.pipeline_mode<synchronous>, transform_indices = @transform_1, window_bounds = array<i64: 36, 128>}, {pipeline_mode = #tpu.pipeline_mode<synchronous>, transform_indices = @transform_2, window_bounds = array<i64: 1152, 128>}, {pipeline_mode = #tpu.pipeline_mode<synchronous>, transform_indices = @transform_3, window_bounds = array<i64: 1152, 128>}, {pipeline_mode = #tpu.pipeline_mode<synchronous>, transform_indices = @transform_4, window_bounds = array<i64: 1152, 128>}, {pipeline_mode = #tpu.pipeline_mode<synchronous>, transform_indices = @transform_5, window_bounds = array<i64: 4, 2, 1, 128>}, {pipeline_mode = #tpu.pipeline_mode<synchronous>, transform_indices = @transform_6, window_bounds = array<i64: 128, 128>}, {pipeline_mode = #tpu.pipeline_mode<synchronous>, transform_indices = @transform_7, window_bounds = array<i64: 1, 128>}, {transform_indices = @transform_8, window_bounds = array<i64: 16, 128>}]} {
    %c0 = arith.constant 0 : index
    %c0_0 = arith.constant 0 : index
    %c0_1 = arith.constant 0 : index
    %c0_2 = arith.constant 0 : index
    %0 = vector.load %arg1[%c0, %c0_0, %c0_1, %c0_2] : memref<8x8x16x36xbf16, #tpu.memory_space<vmem>>, vector<8x8x16x36xbf16>
    %1 = vector.shape_cast %0 : vector<8x8x16x36xbf16> to vector<1024x36xbf16>
    %c0_3 = arith.constant 0 : index
    %c0_4 = arith.constant 0 : index
    %2 = vector.load %arg2[%c0_3, %c0_4] : memref<36x128xbf16, #tpu.memory_space<vmem>>, vector<36x128xbf16>
    %cst = arith.constant dense<0.000000e+00> : vector<1024x128xf32>
    %3 = tpu.matmul %1, %2, %cst {dimension_numbers = #tpu.dot_dimension_numbers<[1], [0], [0], [1], [0, 0, 1, 1], [], []>} : vector<1024x36xbf16>, vector<36x128xbf16>, vector<1024x128xf32> -> vector<1024x128xf32>
    %c0_5 = arith.constant 0 : index
    %c0_6 = arith.constant 0 : index
    %c0_7 = arith.constant 0 : index
    %c0_8 = arith.constant 0 : index
    %4 = vector.load %arg6[%c0_5, %c0_6, %c0_7, %c0_8] : memref<4x2x1x128xf32, #tpu.memory_space<vmem>>, vector<1x1x1x128xf32>
    %5 = vector.shape_cast %4 : vector<1x1x1x128xf32> to vector<1x128xf32>
    %6 = vector.broadcast %5 : vector<1x128xf32> to vector<1024x128xf32>
    %7 = arith.addf %3, %6 : vector<1024x128xf32>
    %cst_9 = arith.constant 0.000000e+00 : f32
    %8 = vector.broadcast %cst_9 : f32 to vector<1024x128xf32>
    %9 = arith.cmpf oge, %7, %8 : vector<1024x128xf32>
    %cst_10 = arith.constant 2.000000e-01 : f32
    %10 = vector.broadcast %cst_10 : f32 to vector<1024x128xf32>
    %11 = arith.mulf %10, %7 : vector<1024x128xf32>
    %12 = arith.select %9, %7, %11 : vector<1024x128xi1>, vector<1024x128xf32>
    %13 = vector.shape_cast %12 : vector<1024x128xf32> to vector<8x8x16x128xf32>
    %cst_11 = arith.constant 0.000000e+00 : bf16
    %14 = vector.broadcast %cst_11 : bf16 to vector<1x10x16x128xbf16>
    %c0_12 = arith.constant 0 : index
    %c0_13 = arith.constant 0 : index
    %c0_14 = arith.constant 0 : index
    %c0_15 = arith.constant 0 : index
    %15 = vector.load %arg10[%c0_12, %c0_13, %c0_14, %c0_15] : memref<10x10x16x128xbf16, #tpu.memory_space<vmem>>, vector<1x10x16x128xbf16>
    tpu.vector_store %arg10[%c0_12, %c0_13, %c0_14, %c0_15], %14 {strides = array<i32>} : memref<10x10x16x128xbf16, #tpu.memory_space<vmem>>, vector<1x10x16x128xbf16>,
    %cst_16 = arith.constant 0.000000e+00 : bf16
    %16 = vector.broadcast %cst_16 : bf16 to vector<8x1x16x128xbf16>
    %c1 = arith.constant 1 : index
    %c0_17 = arith.constant 0 : index
    %c0_18 = arith.constant 0 : index
    %c0_19 = arith.constant 0 : index
    %17 = vector.load %arg10[%c1, %c0_17, %c0_18, %c0_19] : memref<10x10x16x128xbf16, #tpu.memory_space<vmem>>, vector<8x1x16x128xbf16>
    tpu.vector_store %arg10[%c1, %c0_17, %c0_18, %c0_19], %16 {strides = array<i32>} : memref<10x10x16x128xbf16, #tpu.memory_space<vmem>>, vector<8x1x16x128xbf16>,
    %18 = arith.truncf %13 : vector<8x8x16x128xf32> to vector<8x8x16x128xbf16>
    %c1_20 = arith.constant 1 : index
    %c1_21 = arith.constant 1 : index
    %c0_22 = arith.constant 0 : index
    %c0_23 = arith.constant 0 : index
    %19 = vector.load %arg10[%c1_20, %c1_21, %c0_22, %c0_23] : memref<10x10x16x128xbf16, #tpu.memory_space<vmem>>, vector<8x8x16x128xbf16>
    tpu.vector_store %arg10[%c1_20, %c1_21, %c0_22, %c0_23], %18 {strides = array<i32>} : memref<10x10x16x128xbf16, #tpu.memory_space<vmem>>, vector<8x8x16x128xbf16>,
    %c0_24 = arith.constant 0 : index
    %c0_25 = arith.constant 0 : index
    %c0_26 = arith.constant 0 : index
    %c0_27 = arith.constant 0 : index
    %20 = vector.load %arg10[%c0_24, %c0_25, %c0_26, %c0_27] : memref<10x10x16x128xbf16, #tpu.memory_space<vmem>>, vector<10x10x16x128xbf16>
    %21 = vector.shape_cast %20 : vector<10x10x16x128xbf16> to vector<5x2x10x16x128xbf16>
    %22 = vector.extract_strided_slice %21 {offsets = [0, 0, 0, 0, 0], sizes = [4, 1, 10, 16, 128], strides = [1, 1, 1, 1, 1]} : vector<5x2x10x16x128xbf16> to vector<4x1x10x16x128xbf16>
    %23 = vector.shape_cast %22 : vector<4x1x10x16x128xbf16> to vector<4x10x16x128xbf16>
    %24 = vector.shape_cast %23 : vector<4x10x16x128xbf16> to vector<4x5x2x16x128xbf16>
    %25 = vector.extract_strided_slice %24 {offsets = [0, 0, 0, 0, 0], sizes = [4, 4, 1, 16, 128], strides = [1, 1, 1, 1, 1]} : vector<4x5x2x16x128xbf16> to vector<4x4x1x16x128xbf16>
    %26 = vector.shape_cast %25 : vector<4x4x1x16x128xbf16> to vector<4x4x16x128xbf16>
    %27 = vector.extract_strided_slice %24 {offsets = [0, 0, 1, 0, 0], sizes = [4, 4, 1, 16, 128], strides = [1, 1, 1, 1, 1]} : vector<4x5x2x16x128xbf16> to vector<4x4x1x16x128xbf16>
    %28 = vector.shape_cast %27 : vector<4x4x1x16x128xbf16> to vector<4x4x16x128xbf16>
    %29 = vector.extract_strided_slice %24 {offsets = [0, 1, 0, 0, 0], sizes = [4, 4, 1, 16, 128], strides = [1, 1, 1, 1, 1]} : vector<4x5x2x16x128xbf16> to vector<4x4x1x16x128xbf16>
    %30 = vector.shape_cast %29 : vector<4x4x1x16x128xbf16> to vector<4x4x16x128xbf16>
    %31 = vector.extract_strided_slice %21 {offsets = [0, 1, 0, 0, 0], sizes = [4, 1, 10, 16, 128], strides = [1, 1, 1, 1, 1]} : vector<5x2x10x16x128xbf16> to vector<4x1x10x16x128xbf16>
    %32 = vector.shape_cast %31 : vector<4x1x10x16x128xbf16> to vector<4x10x16x128xbf16>
    %33 = vector.shape_cast %32 : vector<4x10x16x128xbf16> to vector<4x5x2x16x128xbf16>
    %34 = vector.extract_strided_slice %33 {offsets = [0, 0, 0, 0, 0], sizes = [4, 4, 1, 16, 128], strides = [1, 1, 1, 1, 1]} : vector<4x5x2x16x128xbf16> to vector<4x4x1x16x128xbf16>
    %35 = vector.shape_cast %34 : vector<4x4x1x16x128xbf16> to vector<4x4x16x128xbf16>
    %36 = vector.extract_strided_slice %33 {offsets = [0, 0, 1, 0, 0], sizes = [4, 4, 1, 16, 128], strides = [1, 1, 1, 1, 1]} : vector<4x5x2x16x128xbf16> to vector<4x4x1x16x128xbf16>
    %37 = vector.shape_cast %36 : vector<4x4x1x16x128xbf16> to vector<4x4x16x128xbf16>
    %38 = vector.extract_strided_slice %33 {offsets = [0, 1, 0, 0, 0], sizes = [4, 4, 1, 16, 128], strides = [1, 1, 1, 1, 1]} : vector<4x5x2x16x128xbf16> to vector<4x4x1x16x128xbf16>
    %39 = vector.shape_cast %38 : vector<4x4x1x16x128xbf16> to vector<4x4x16x128xbf16>
    %40 = vector.extract_strided_slice %21 {offsets = [1, 0, 0, 0, 0], sizes = [4, 1, 10, 16, 128], strides = [1, 1, 1, 1, 1]} : vector<5x2x10x16x128xbf16> to vector<4x1x10x16x128xbf16>
    %41 = vector.shape_cast %40 : vector<4x1x10x16x128xbf16> to vector<4x10x16x128xbf16>
    %42 = vector.shape_cast %41 : vector<4x10x16x128xbf16> to vector<4x5x2x16x128xbf16>
    %43 = vector.extract_strided_slice %42 {offsets = [0, 0, 0, 0, 0], sizes = [4, 4, 1, 16, 128], strides = [1, 1, 1, 1, 1]} : vector<4x5x2x16x128xbf16> to vector<4x4x1x16x128xbf16>
    %44 = vector.shape_cast %43 : vector<4x4x1x16x128xbf16> to vector<4x4x16x128xbf16>
    %45 = vector.extract_strided_slice %42 {offsets = [0, 0, 1, 0, 0], sizes = [4, 4, 1, 16, 128], strides = [1, 1, 1, 1, 1]} : vector<4x5x2x16x128xbf16> to vector<4x4x1x16x128xbf16>
    %46 = vector.shape_cast %45 : vector<4x4x1x16x128xbf16> to vector<4x4x16x128xbf16>
    %47 = vector.extract_strided_slice %42 {offsets = [0, 1, 0, 0, 0], sizes = [4, 4, 1, 16, 128], strides = [1, 1, 1, 1, 1]} : vector<4x5x2x16x128xbf16> to vector<4x4x1x16x128xbf16>
    %48 = vector.shape_cast %47 : vector<4x4x1x16x128xbf16> to vector<4x4x16x128xbf16>
    %49 = tpu.concatenate %26, %28, %30, %35, %37, %39, %44, %46, %48 in 3 : vector<4x4x16x128xbf16>, vector<4x4x16x128xbf16>, vector<4x4x16x128xbf16>, vector<4x4x16x128xbf16>, vector<4x4x16x128xbf16>, vector<4x4x16x128xbf16>, vector<4x4x16x128xbf16>, vector<4x4x16x128xbf16>, vector<4x4x16x128xbf16> -> vector<4x4x16x1152xbf16>
    %50 = vector.shape_cast %49 : vector<4x4x16x1152xbf16> to vector<256x1152xbf16>
    %c0_28 = arith.constant 0 : index
    %c0_29 = arith.constant 0 : index
    %51 = vector.load %arg3[%c0_28, %c0_29] : memref<1152x128xbf16, #tpu.memory_space<vmem>>, vector<1152x128xbf16>
    %cst_30 = arith.constant dense<0.000000e+00> : vector<256x128xf32>
    %52 = tpu.matmul %50, %51, %cst_30 {dimension_numbers = #tpu.dot_dimension_numbers<[1], [0], [0], [1], [0, 0, 1, 1], [], []>} : vector<256x1152xbf16>, vector<1152x128xbf16>, vector<256x128xf32> -> vector<256x128xf32>
    %c1_31 = arith.constant 1 : index
    %c0_32 = arith.constant 0 : index
    %c0_33 = arith.constant 0 : index
    %c0_34 = arith.constant 0 : index
    %53 = vector.load %arg6[%c1_31, %c0_32, %c0_33, %c0_34] : memref<4x2x1x128xf32, #tpu.memory_space<vmem>>, vector<1x1x1x128xf32>
    %54 = vector.shape_cast %53 : vector<1x1x1x128xf32> to vector<1x128xf32>
    %55 = vector.broadcast %54 : vector<1x128xf32> to vector<256x128xf32>
    %56 = arith.addf %52, %55 : vector<256x128xf32>
    %cst_35 = arith.constant 0.000000e+00 : f32
    %57 = vector.broadcast %cst_35 : f32 to vector<256x128xf32>
    %58 = arith.cmpf oge, %56, %57 : vector<256x128xf32>
    %cst_36 = arith.constant 2.000000e-01 : f32
    %59 = vector.broadcast %cst_36 : f32 to vector<256x128xf32>
    %60 = arith.mulf %59, %56 : vector<256x128xf32>
    %61 = arith.select %58, %56, %60 : vector<256x128xi1>, vector<256x128xf32>
    %c1_37 = arith.constant 1 : index
    %c1_38 = arith.constant 1 : index
    %c0_39 = arith.constant 0 : index
    %c0_40 = arith.constant 0 : index
    %62 = vector.load %arg6[%c1_37, %c1_38, %c0_39, %c0_40] : memref<4x2x1x128xf32, #tpu.memory_space<vmem>>, vector<1x1x1x128xf32>
    %63 = vector.shape_cast %62 : vector<1x1x1x128xf32> to vector<1x128xf32>
    %64 = vector.broadcast %63 : vector<1x128xf32> to vector<256x128xf32>
    %65 = arith.addf %61, %64 : vector<256x128xf32>
    %66 = vector.shape_cast %65 : vector<256x128xf32> to vector<4x4x16x128xf32>
    %cst_41 = arith.constant 0.000000e+00 : bf16
    %67 = vector.broadcast %cst_41 : bf16 to vector<1x6x16x128xbf16>
    %c0_42 = arith.constant 0 : index
    %c0_43 = arith.constant 0 : index
    %c0_44 = arith.constant 0 : index
    %c0_45 = arith.constant 0 : index
    %68 = vector.load %arg11[%c0_42, %c0_43, %c0_44, %c0_45] : memref<6x6x16x128xbf16, #tpu.memory_space<vmem>>, vector<1x6x16x128xbf16>
    tpu.vector_store %arg11[%c0_42, %c0_43, %c0_44, %c0_45], %67 {strides = array<i32>} : memref<6x6x16x128xbf16, #tpu.memory_space<vmem>>, vector<1x6x16x128xbf16>,
    %cst_46 = arith.constant 0.000000e+00 : bf16
    %69 = vector.broadcast %cst_46 : bf16 to vector<4x1x16x128xbf16>
    %c1_47 = arith.constant 1 : index
    %c0_48 = arith.constant 0 : index
    %c0_49 = arith.constant 0 : index
    %c0_50 = arith.constant 0 : index
    %70 = vector.load %arg11[%c1_47, %c0_48, %c0_49, %c0_50] : memref<6x6x16x128xbf16, #tpu.memory_space<vmem>>, vector<4x1x16x128xbf16>
    tpu.vector_store %arg11[%c1_47, %c0_48, %c0_49, %c0_50], %69 {strides = array<i32>} : memref<6x6x16x128xbf16, #tpu.memory_space<vmem>>, vector<4x1x16x128xbf16>,
    %71 = arith.truncf %66 : vector<4x4x16x128xf32> to vector<4x4x16x128xbf16>
    %c1_51 = arith.constant 1 : index
    %c1_52 = arith.constant 1 : index
    %c0_53 = arith.constant 0 : index
    %c0_54 = arith.constant 0 : index
    %72 = vector.load %arg11[%c1_51, %c1_52, %c0_53, %c0_54] : memref<6x6x16x128xbf16, #tpu.memory_space<vmem>>, vector<4x4x16x128xbf16>
    tpu.vector_store %arg11[%c1_51, %c1_52, %c0_53, %c0_54], %71 {strides = array<i32>} : memref<6x6x16x128xbf16, #tpu.memory_space<vmem>>, vector<4x4x16x128xbf16>,
    %c0_55 = arith.constant 0 : index
    %c0_56 = arith.constant 0 : index
    %c0_57 = arith.constant 0 : index
    %c0_58 = arith.constant 0 : index
    %73 = vector.load %arg11[%c0_55, %c0_56, %c0_57, %c0_58] : memref<6x6x16x128xbf16, #tpu.memory_space<vmem>>, vector<6x6x16x128xbf16>
    %74 = vector.shape_cast %73 : vector<6x6x16x128xbf16> to vector<3x2x6x16x128xbf16>
    %75 = vector.extract_strided_slice %74 {offsets = [0, 0, 0, 0, 0], sizes = [2, 1, 6, 16, 128], strides = [1, 1, 1, 1, 1]} : vector<3x2x6x16x128xbf16> to vector<2x1x6x16x128xbf16>
    %76 = vector.shape_cast %75 : vector<2x1x6x16x128xbf16> to vector<2x6x16x128xbf16>
    %77 = vector.shape_cast %76 : vector<2x6x16x128xbf16> to vector<2x3x2x16x128xbf16>
    %78 = vector.extract_strided_slice %77 {offsets = [0, 0, 0, 0, 0], sizes = [2, 2, 1, 16, 128], strides = [1, 1, 1, 1, 1]} : vector<2x3x2x16x128xbf16> to vector<2x2x1x16x128xbf16>
    %79 = vector.shape_cast %78 : vector<2x2x1x16x128xbf16> to vector<2x2x16x128xbf16>
    %80 = vector.extract_strided_slice %77 {offsets = [0, 0, 1, 0, 0], sizes = [2, 2, 1, 16, 128], strides = [1, 1, 1, 1, 1]} : vector<2x3x2x16x128xbf16> to vector<2x2x1x16x128xbf16>
    %81 = vector.shape_cast %80 : vector<2x2x1x16x128xbf16> to vector<2x2x16x128xbf16>
    %82 = vector.extract_strided_slice %77 {offsets = [0, 1, 0, 0, 0], sizes = [2, 2, 1, 16, 128], strides = [1, 1, 1, 1, 1]} : vector<2x3x2x16x128xbf16> to vector<2x2x1x16x128xbf16>
    %83 = vector.shape_cast %82 : vector<2x2x1x16x128xbf16> to vector<2x2x16x128xbf16>
    %84 = vector.extract_strided_slice %74 {offsets = [0, 1, 0, 0, 0], sizes = [2, 1, 6, 16, 128], strides = [1, 1, 1, 1, 1]} : vector<3x2x6x16x128xbf16> to vector<2x1x6x16x128xbf16>
    %85 = vector.shape_cast %84 : vector<2x1x6x16x128xbf16> to vector<2x6x16x128xbf16>
    %86 = vector.shape_cast %85 : vector<2x6x16x128xbf16> to vector<2x3x2x16x128xbf16>
    %87 = vector.extract_strided_slice %86 {offsets = [0, 0, 0, 0, 0], sizes = [2, 2, 1, 16, 128], strides = [1, 1, 1, 1, 1]} : vector<2x3x2x16x128xbf16> to vector<2x2x1x16x128xbf16>
    %88 = vector.shape_cast %87 : vector<2x2x1x16x128xbf16> to vector<2x2x16x128xbf16>
    %89 = vector.extract_strided_slice %86 {offsets = [0, 0, 1, 0, 0], sizes = [2, 2, 1, 16, 128], strides = [1, 1, 1, 1, 1]} : vector<2x3x2x16x128xbf16> to vector<2x2x1x16x128xbf16>
    %90 = vector.shape_cast %89 : vector<2x2x1x16x128xbf16> to vector<2x2x16x128xbf16>
    %91 = vector.extract_strided_slice %86 {offsets = [0, 1, 0, 0, 0], sizes = [2, 2, 1, 16, 128], strides = [1, 1, 1, 1, 1]} : vector<2x3x2x16x128xbf16> to vector<2x2x1x16x128xbf16>
    %92 = vector.shape_cast %91 : vector<2x2x1x16x128xbf16> to vector<2x2x16x128xbf16>
    %93 = vector.extract_strided_slice %74 {offsets = [1, 0, 0, 0, 0], sizes = [2, 1, 6, 16, 128], strides = [1, 1, 1, 1, 1]} : vector<3x2x6x16x128xbf16> to vector<2x1x6x16x128xbf16>
    %94 = vector.shape_cast %93 : vector<2x1x6x16x128xbf16> to vector<2x6x16x128xbf16>
    %95 = vector.shape_cast %94 : vector<2x6x16x128xbf16> to vector<2x3x2x16x128xbf16>
    %96 = vector.extract_strided_slice %95 {offsets = [0, 0, 0, 0, 0], sizes = [2, 2, 1, 16, 128], strides = [1, 1, 1, 1, 1]} : vector<2x3x2x16x128xbf16> to vector<2x2x1x16x128xbf16>
    %97 = vector.shape_cast %96 : vector<2x2x1x16x128xbf16> to vector<2x2x16x128xbf16>
    %98 = vector.extract_strided_slice %95 {offsets = [0, 0, 1, 0, 0], sizes = [2, 2, 1, 16, 128], strides = [1, 1, 1, 1, 1]} : vector<2x3x2x16x128xbf16> to vector<2x2x1x16x128xbf16>
    %99 = vector.shape_cast %98 : vector<2x2x1x16x128xbf16> to vector<2x2x16x128xbf16>
    %100 = vector.extract_strided_slice %95 {offsets = [0, 1, 0, 0, 0], sizes = [2, 2, 1, 16, 128], strides = [1, 1, 1, 1, 1]} : vector<2x3x2x16x128xbf16> to vector<2x2x1x16x128xbf16>
    %101 = vector.shape_cast %100 : vector<2x2x1x16x128xbf16> to vector<2x2x16x128xbf16>
    %102 = tpu.concatenate %79, %81, %83, %88, %90, %92, %97, %99, %101 in 3 : vector<2x2x16x128xbf16>, vector<2x2x16x128xbf16>, vector<2x2x16x128xbf16>, vector<2x2x16x128xbf16>, vector<2x2x16x128xbf16>, vector<2x2x16x128xbf16>, vector<2x2x16x128xbf16>, vector<2x2x16x128xbf16>, vector<2x2x16x128xbf16> -> vector<2x2x16x1152xbf16>
    %103 = vector.shape_cast %102 : vector<2x2x16x1152xbf16> to vector<64x1152xbf16>
    %c0_59 = arith.constant 0 : index
    %c0_60 = arith.constant 0 : index
    %104 = vector.load %arg4[%c0_59, %c0_60] : memref<1152x128xbf16, #tpu.memory_space<vmem>>, vector<1152x128xbf16>
    %cst_61 = arith.constant dense<0.000000e+00> : vector<64x128xf32>
    %105 = tpu.matmul %103, %104, %cst_61 {dimension_numbers = #tpu.dot_dimension_numbers<[1], [0], [0], [1], [0, 0, 1, 1], [], []>} : vector<64x1152xbf16>, vector<1152x128xbf16>, vector<64x128xf32> -> vector<64x128xf32>
    %c2 = arith.constant 2 : index
    %c0_62 = arith.constant 0 : index
    %c0_63 = arith.constant 0 : index
    %c0_64 = arith.constant 0 : index
    %106 = vector.load %arg6[%c2, %c0_62, %c0_63, %c0_64] : memref<4x2x1x128xf32, #tpu.memory_space<vmem>>, vector<1x1x1x128xf32>
    %107 = vector.shape_cast %106 : vector<1x1x1x128xf32> to vector<1x128xf32>
    %108 = vector.broadcast %107 : vector<1x128xf32> to vector<64x128xf32>
    %109 = arith.addf %105, %108 : vector<64x128xf32>
    %cst_65 = arith.constant 0.000000e+00 : f32
    %110 = vector.broadcast %cst_65 : f32 to vector<64x128xf32>
    %111 = arith.cmpf oge, %109, %110 : vector<64x128xf32>
    %cst_66 = arith.constant 2.000000e-01 : f32
    %112 = vector.broadcast %cst_66 : f32 to vector<64x128xf32>
    %113 = arith.mulf %112, %109 : vector<64x128xf32>
    %114 = arith.select %111, %109, %113 : vector<64x128xi1>, vector<64x128xf32>
    %c2_67 = arith.constant 2 : index
    %c1_68 = arith.constant 1 : index
    %c0_69 = arith.constant 0 : index
    %c0_70 = arith.constant 0 : index
    %115 = vector.load %arg6[%c2_67, %c1_68, %c0_69, %c0_70] : memref<4x2x1x128xf32, #tpu.memory_space<vmem>>, vector<1x1x1x128xf32>
    %116 = vector.shape_cast %115 : vector<1x1x1x128xf32> to vector<1x128xf32>
    %117 = vector.broadcast %116 : vector<1x128xf32> to vector<64x128xf32>
    %118 = arith.addf %114, %117 : vector<64x128xf32>
    %119 = vector.shape_cast %118 : vector<64x128xf32> to vector<2x2x16x128xf32>
    %cst_71 = arith.constant 0.000000e+00 : bf16
    %120 = vector.broadcast %cst_71 : bf16 to vector<1x4x16x128xbf16>
    %c0_72 = arith.constant 0 : index
    %c0_73 = arith.constant 0 : index
    %c0_74 = arith.constant 0 : index
    %c0_75 = arith.constant 0 : index
    %121 = vector.load %arg12[%c0_72, %c0_73, %c0_74, %c0_75] : memref<4x4x16x128xbf16, #tpu.memory_space<vmem>>, vector<1x4x16x128xbf16>
    tpu.vector_store %arg12[%c0_72, %c0_73, %c0_74, %c0_75], %120 {strides = array<i32>} : memref<4x4x16x128xbf16, #tpu.memory_space<vmem>>, vector<1x4x16x128xbf16>,
    %cst_76 = arith.constant 0.000000e+00 : bf16
    %122 = vector.broadcast %cst_76 : bf16 to vector<2x1x16x128xbf16>
    %c1_77 = arith.constant 1 : index
    %c0_78 = arith.constant 0 : index
    %c0_79 = arith.constant 0 : index
    %c0_80 = arith.constant 0 : index
    %123 = vector.load %arg12[%c1_77, %c0_78, %c0_79, %c0_80] : memref<4x4x16x128xbf16, #tpu.memory_space<vmem>>, vector<2x1x16x128xbf16>
    tpu.vector_store %arg12[%c1_77, %c0_78, %c0_79, %c0_80], %122 {strides = array<i32>} : memref<4x4x16x128xbf16, #tpu.memory_space<vmem>>, vector<2x1x16x128xbf16>,
    %124 = arith.truncf %119 : vector<2x2x16x128xf32> to vector<2x2x16x128xbf16>
    %c1_81 = arith.constant 1 : index
    %c1_82 = arith.constant 1 : index
    %c0_83 = arith.constant 0 : index
    %c0_84 = arith.constant 0 : index
    %125 = vector.load %arg12[%c1_81, %c1_82, %c0_83, %c0_84] : memref<4x4x16x128xbf16, #tpu.memory_space<vmem>>, vector<2x2x16x128xbf16>
    tpu.vector_store %arg12[%c1_81, %c1_82, %c0_83, %c0_84], %124 {strides = array<i32>} : memref<4x4x16x128xbf16, #tpu.memory_space<vmem>>, vector<2x2x16x128xbf16>,
    %c0_85 = arith.constant 0 : index
    %c0_86 = arith.constant 0 : index
    %c0_87 = arith.constant 0 : index
    %c0_88 = arith.constant 0 : index
    %126 = vector.load %arg12[%c0_85, %c0_86, %c0_87, %c0_88] : memref<4x4x16x128xbf16, #tpu.memory_space<vmem>>, vector<4x4x16x128xbf16>
    %127 = vector.shape_cast %126 : vector<4x4x16x128xbf16> to vector<2x2x4x16x128xbf16>
    %128 = vector.extract_strided_slice %127 {offsets = [0, 0, 0, 0, 0], sizes = [1, 1, 4, 16, 128], strides = [1, 1, 1, 1, 1]} : vector<2x2x4x16x128xbf16> to vector<1x1x4x16x128xbf16>
    %129 = vector.shape_cast %128 : vector<1x1x4x16x128xbf16> to vector<1x4x16x128xbf16>
    %130 = vector.shape_cast %129 : vector<1x4x16x128xbf16> to vector<1x2x2x16x128xbf16>
    %131 = vector.extract_strided_slice %130 {offsets = [0, 0, 0, 0, 0], sizes = [1, 1, 1, 16, 128], strides = [1, 1, 1, 1, 1]} : vector<1x2x2x16x128xbf16> to vector<1x1x1x16x128xbf16>
    %132 = vector.shape_cast %131 : vector<1x1x1x16x128xbf16> to vector<1x1x16x128xbf16>
    %133 = vector.extract_strided_slice %130 {offsets = [0, 0, 1, 0, 0], sizes = [1, 1, 1, 16, 128], strides = [1, 1, 1, 1, 1]} : vector<1x2x2x16x128xbf16> to vector<1x1x1x16x128xbf16>
    %134 = vector.shape_cast %133 : vector<1x1x1x16x128xbf16> to vector<1x1x16x128xbf16>
    %135 = vector.extract_strided_slice %130 {offsets = [0, 1, 0, 0, 0], sizes = [1, 1, 1, 16, 128], strides = [1, 1, 1, 1, 1]} : vector<1x2x2x16x128xbf16> to vector<1x1x1x16x128xbf16>
    %136 = vector.shape_cast %135 : vector<1x1x1x16x128xbf16> to vector<1x1x16x128xbf16>
    %137 = vector.extract_strided_slice %127 {offsets = [0, 1, 0, 0, 0], sizes = [1, 1, 4, 16, 128], strides = [1, 1, 1, 1, 1]} : vector<2x2x4x16x128xbf16> to vector<1x1x4x16x128xbf16>
    %138 = vector.shape_cast %137 : vector<1x1x4x16x128xbf16> to vector<1x4x16x128xbf16>
    %139 = vector.shape_cast %138 : vector<1x4x16x128xbf16> to vector<1x2x2x16x128xbf16>
    %140 = vector.extract_strided_slice %139 {offsets = [0, 0, 0, 0, 0], sizes = [1, 1, 1, 16, 128], strides = [1, 1, 1, 1, 1]} : vector<1x2x2x16x128xbf16> to vector<1x1x1x16x128xbf16>
    %141 = vector.shape_cast %140 : vector<1x1x1x16x128xbf16> to vector<1x1x16x128xbf16>
    %142 = vector.extract_strided_slice %139 {offsets = [0, 0, 1, 0, 0], sizes = [1, 1, 1, 16, 128], strides = [1, 1, 1, 1, 1]} : vector<1x2x2x16x128xbf16> to vector<1x1x1x16x128xbf16>
    %143 = vector.shape_cast %142 : vector<1x1x1x16x128xbf16> to vector<1x1x16x128xbf16>
    %144 = vector.extract_strided_slice %139 {offsets = [0, 1, 0, 0, 0], sizes = [1, 1, 1, 16, 128], strides = [1, 1, 1, 1, 1]} : vector<1x2x2x16x128xbf16> to vector<1x1x1x16x128xbf16>
    %145 = vector.shape_cast %144 : vector<1x1x1x16x128xbf16> to vector<1x1x16x128xbf16>
    %146 = vector.extract_strided_slice %127 {offsets = [1, 0, 0, 0, 0], sizes = [1, 1, 4, 16, 128], strides = [1, 1, 1, 1, 1]} : vector<2x2x4x16x128xbf16> to vector<1x1x4x16x128xbf16>
    %147 = vector.shape_cast %146 : vector<1x1x4x16x128xbf16> to vector<1x4x16x128xbf16>
    %148 = vector.shape_cast %147 : vector<1x4x16x128xbf16> to vector<1x2x2x16x128xbf16>
    %149 = vector.extract_strided_slice %148 {offsets = [0, 0, 0, 0, 0], sizes = [1, 1, 1, 16, 128], strides = [1, 1, 1, 1, 1]} : vector<1x2x2x16x128xbf16> to vector<1x1x1x16x128xbf16>
    %150 = vector.shape_cast %149 : vector<1x1x1x16x128xbf16> to vector<1x1x16x128xbf16>
    %151 = vector.extract_strided_slice %148 {offsets = [0, 0, 1, 0, 0], sizes = [1, 1, 1, 16, 128], strides = [1, 1, 1, 1, 1]} : vector<1x2x2x16x128xbf16> to vector<1x1x1x16x128xbf16>
    %152 = vector.shape_cast %151 : vector<1x1x1x16x128xbf16> to vector<1x1x16x128xbf16>
    %153 = vector.extract_strided_slice %148 {offsets = [0, 1, 0, 0, 0], sizes = [1, 1, 1, 16, 128], strides = [1, 1, 1, 1, 1]} : vector<1x2x2x16x128xbf16> to vector<1x1x1x16x128xbf16>
    %154 = vector.shape_cast %153 : vector<1x1x1x16x128xbf16> to vector<1x1x16x128xbf16>
    %155 = tpu.concatenate %132, %134, %136, %141, %143, %145, %150, %152, %154 in 3 : vector<1x1x16x128xbf16>, vector<1x1x16x128xbf16>, vector<1x1x16x128xbf16>, vector<1x1x16x128xbf16>, vector<1x1x16x128xbf16>, vector<1x1x16x128xbf16>, vector<1x1x16x128xbf16>, vector<1x1x16x128xbf16>, vector<1x1x16x128xbf16> -> vector<1x1x16x1152xbf16>
    %156 = vector.shape_cast %155 : vector<1x1x16x1152xbf16> to vector<16x1152xbf16>
    %c0_89 = arith.constant 0 : index
    %c0_90 = arith.constant 0 : index
    %157 = vector.load %arg5[%c0_89, %c0_90] : memref<1152x128xbf16, #tpu.memory_space<vmem>>, vector<1152x128xbf16>
    %cst_91 = arith.constant dense<0.000000e+00> : vector<16x128xf32>
    %158 = tpu.matmul %156, %157, %cst_91 {dimension_numbers = #tpu.dot_dimension_numbers<[1], [0], [0], [1], [0, 0, 1, 1], [], []>} : vector<16x1152xbf16>, vector<1152x128xbf16>, vector<16x128xf32> -> vector<16x128xf32>
    %c3 = arith.constant 3 : index
    %c0_92 = arith.constant 0 : index
    %c0_93 = arith.constant 0 : index
    %c0_94 = arith.constant 0 : index
    %159 = vector.load %arg6[%c3, %c0_92, %c0_93, %c0_94] : memref<4x2x1x128xf32, #tpu.memory_space<vmem>>, vector<1x1x1x128xf32>
    %160 = vector.shape_cast %159 : vector<1x1x1x128xf32> to vector<1x128xf32>
    %161 = vector.broadcast %160 : vector<1x128xf32> to vector<16x128xf32>
    %162 = arith.addf %158, %161 : vector<16x128xf32>
    %cst_95 = arith.constant 0.000000e+00 : f32
    %163 = vector.broadcast %cst_95 : f32 to vector<16x128xf32>
    %164 = arith.cmpf oge, %162, %163 : vector<16x128xf32>
    %cst_96 = arith.constant 2.000000e-01 : f32
    %165 = vector.broadcast %cst_96 : f32 to vector<16x128xf32>
    %166 = arith.mulf %165, %162 : vector<16x128xf32>
    %167 = arith.select %164, %162, %166 : vector<16x128xi1>, vector<16x128xf32>
    %168 = vector.shape_cast %167 : vector<16x128xf32> to vector<1x1x16x128xf32>
    %169 = vector.shape_cast %168 : vector<1x1x16x128xf32> to vector<16x128xf32>
    %170 = arith.truncf %169 : vector<16x128xf32> to vector<16x128xbf16>
    %c0_97 = arith.constant 0 : index
    %c0_98 = arith.constant 0 : index
    %171 = vector.load %arg7[%c0_97, %c0_98] : memref<128x128xbf16, #tpu.memory_space<vmem>>, vector<128x128xbf16>
    %cst_99 = arith.constant dense<0.000000e+00> : vector<16x128xf32>
    %172 = tpu.matmul %170, %171, %cst_99 {dimension_numbers = #tpu.dot_dimension_numbers<[1], [0], [0], [1], [0, 0, 1, 1], [], []>} : vector<16x128xbf16>, vector<128x128xbf16>, vector<16x128xf32> -> vector<16x128xf32>
    %c0_100 = arith.constant 0 : index
    %c0_101 = arith.constant 0 : index
    %173 = vector.load %arg8[%c0_100, %c0_101] : memref<1x128xf32, #tpu.memory_space<vmem>>, vector<1x128xf32>
    %174 = vector.broadcast %173 : vector<1x128xf32> to vector<16x128xf32>
    %175 = arith.addf %172, %174 : vector<16x128xf32>
    %176 = tpu.iota {dimensions = array<i32: 1>} : vector<16x128xi32>
    %c10_i32 = arith.constant 10 : i32
    %177 = vector.broadcast %c10_i32 : i32 to vector<16x128xi32>
    %178 = arith.cmpi slt, %176, %177 : vector<16x128xi32>
    %cst_102 = arith.constant -1.000000e+30 : f32
    %179 = vector.broadcast %cst_102 : f32 to vector<16x128xf32>
    %180 = arith.select %178, %175, %179 : vector<16x128xi1>, vector<16x128xf32>
    %cst_103 = arith.constant dense<0xFF800000> : vector<16xf32>
    %181 = vector.multi_reduction <maximumf>, %180, %cst_103 [1] : vector<16x128xf32> to vector<16xf32>
    %182 = vector.shape_cast %181 : vector<16xf32> to vector<16x1xf32>
    %183 = vector.broadcast %182 : vector<16x1xf32> to vector<16x128xf32>
    %184 = arith.subf %180, %183 : vector<16x128xf32>
    %185 = math.exp %184 : vector<16x128xf32>
    %cst_104 = arith.constant 0.000000e+00 : f32
    %186 = vector.broadcast %cst_104 : f32 to vector<16x128xf32>
    %187 = arith.select %178, %185, %186 : vector<16x128xi1>, vector<16x128xf32>
    %cst_105 = arith.constant dense<0.000000e+00> : vector<16xf32>
    %188 = vector.multi_reduction <add>, %187, %cst_105 [1] : vector<16x128xf32> to vector<16xf32>
    %189 = vector.shape_cast %188 : vector<16xf32> to vector<16x1xf32>
    %190 = tpu.reciprocal %189 {approx = true} : vector<16x1xf32> -> vector<16x1xf32>
    %191 = vector.broadcast %190 : vector<16x1xf32> to vector<16x128xf32>
    %192 = arith.mulf %187, %191 : vector<16x128xf32>
    %cst_106 = arith.constant 0.000000e+00 : f32
    %193 = vector.broadcast %cst_106 : f32 to vector<16x128xf32>
    %194 = arith.subf %193, %175 : vector<16x128xf32>
    %195 = math.exp %194 : vector<16x128xf32>
    %cst_107 = arith.constant 1.000000e+00 : f32
    %196 = vector.broadcast %cst_107 : f32 to vector<16x128xf32>
    %197 = arith.addf %196, %195 : vector<16x128xf32>
    %198 = tpu.reciprocal %197 {approx = true} : vector<16x128xf32> -> vector<16x128xf32>
    %c10_i32_108 = arith.constant 10 : i32
    %199 = vector.broadcast %c10_i32_108 : i32 to vector<16x128xi32>
    %200 = arith.cmpi eq, %176, %199 : vector<16x128xi32>
    %cst_109 = arith.constant 0.000000e+00 : f32
    %201 = vector.broadcast %cst_109 : f32 to vector<16x128xf32>
    %202 = arith.select %200, %198, %201 : vector<16x128xi1>, vector<16x128xf32>
    %203 = arith.select %178, %192, %202 : vector<16x128xi1>, vector<16x128xf32>
    %c0_110 = arith.constant 0 : index
    %c0_111 = arith.constant 0 : index
    %204 = vector.load %arg9[%c0_110, %c0_111] : memref<16x128xf32, #tpu.memory_space<vmem>>, vector<16x128xf32>
    tpu.vector_store %arg9[%c0_110, %c0_111], %203 {strides = array<i32>} : memref<16x128xf32, #tpu.memory_space<vmem>>, vector<16x128xf32>,
    return
  }
  func.func @transform_0(%arg0: i32) -> (i32, i32, i32, i32) {
    %c0_i32 = arith.constant 0 : i32
    %c0_i32_0 = arith.constant 0 : i32
    %c0_i32_1 = arith.constant 0 : i32
    %c0_i32_2 = arith.constant 0 : i32
    return %c0_i32, %c0_i32_0, %arg0, %c0_i32_1 : i32, i32, i32, i32
  }
  func.func @transform_1(%arg0: i32) -> (i32, i32) {
    %c0_i32 = arith.constant 0 : i32
    %c0_i32_0 = arith.constant 0 : i32
    %c0_i32_1 = arith.constant 0 : i32
    return %c0_i32, %c0_i32_0 : i32, i32
  }
  func.func @transform_2(%arg0: i32) -> (i32, i32) {
    %c0_i32 = arith.constant 0 : i32
    %c0_i32_0 = arith.constant 0 : i32
    %c0_i32_1 = arith.constant 0 : i32
    return %c0_i32, %c0_i32_0 : i32, i32
  }
  func.func @transform_3(%arg0: i32) -> (i32, i32) {
    %c0_i32 = arith.constant 0 : i32
    %c0_i32_0 = arith.constant 0 : i32
    %c0_i32_1 = arith.constant 0 : i32
    return %c0_i32, %c0_i32_0 : i32, i32
  }
  func.func @transform_4(%arg0: i32) -> (i32, i32) {
    %c0_i32 = arith.constant 0 : i32
    %c0_i32_0 = arith.constant 0 : i32
    %c0_i32_1 = arith.constant 0 : i32
    return %c0_i32, %c0_i32_0 : i32, i32
  }
  func.func @transform_5(%arg0: i32) -> (i32, i32, i32, i32) {
    %c0_i32 = arith.constant 0 : i32
    %c0_i32_0 = arith.constant 0 : i32
    %c0_i32_1 = arith.constant 0 : i32
    %c0_i32_2 = arith.constant 0 : i32
    %c0_i32_3 = arith.constant 0 : i32
    return %c0_i32, %c0_i32_0, %c0_i32_1, %c0_i32_2 : i32, i32, i32, i32
  }
  func.func @transform_6(%arg0: i32) -> (i32, i32) {
    %c0_i32 = arith.constant 0 : i32
    %c0_i32_0 = arith.constant 0 : i32
    %c0_i32_1 = arith.constant 0 : i32
    return %c0_i32, %c0_i32_0 : i32, i32
  }
  func.func @transform_7(%arg0: i32) -> (i32, i32) {
    %c0_i32 = arith.constant 0 : i32
    %c0_i32_0 = arith.constant 0 : i32
    %c0_i32_1 = arith.constant 0 : i32
    return %c0_i32, %c0_i32_0 : i32, i32
  }
  func.func @transform_8(%arg0: i32) -> (i32, i32) {
    %c0_i32 = arith.constant 0 : i32
    %c0_i32_0 = arith.constant 0 : i32
    return %arg0, %c0_i32 : i32, i32
  }
}

</mosaic_0001>

<bundles_post_ra>
// kernel: acgan_discriminator_forward.1
= control target key start
LH: loop header
LB: loop body
LE: loop exit
PB: predicated region body
PF: predicated region fallthrough
CT: control target
= control target key end

     0   :  { %vm695_vm0 = vcmask 1041408   ;;  %vm502_vm1 = vcmask 293888   ;;  %s10423_s1 = inlined_call_operand.vmem [shape: bf16[36,128], index: 1, kind: input, shape index: {}]   ;;  %s10424_s5 = inlined_call_operand.vmem [shape: f32[4,2,1,128], index: 5, kind: input, shape index: {}]   ;;  %s10425_s0 = inlined_call_operand.vmem [shape: bf16[8,8,16,36], index: 0, kind: input, shape index: {}]   ;;  %s10426_s2 = inlined_call_operand.vmem [shape: bf16[1152,128], index: 2, kind: input, shape index: {}]   ;;  %s10427_s4 = inlined_call_operand.vmem [shape: bf16[1152,128], index: 4, kind: input, shape index: {}]   ;;  %s10428_s3 = inlined_call_operand.vmem [shape: bf16[1152,128], index: 3, kind: input, shape index: {}]   ;;  %s10429_s7 = inlined_call_operand.vmem [shape: f32[1,128], index: 7, kind: input, shape index: {}]   ;;  %s10430_s6 = inlined_call_operand.vmem [shape: bf16[128,128], index: 6, kind: input, shape index: {}]   ;;  %s10431_s8 = inlined_call_operand.vmem [shape: f32[16,128], index: 8, kind: output, shape index: {}]  }
   0x1   :  { %v162_v0 = vld [vmem:[%s10423_s1 + $0x10] sm:$0x3]  ;;  %v7732_v4 = vld [vmem:[%s10423_s1 + $0x8] sm:$0xff]  ;;  %v7731_v5 = vld [vmem:[%s10423_s1] sm:$0xff] }
   0x2   :  { %v496_v1 = vunpack.c.l.b16 %v162_v0  ;;  %v7667_v6 = vld [vmem:[%s10425_s0] sm:$0xff]  ;;  %v7668_v7 = vld [vmem:[%s10425_s0 + $0x8] sm:$0xff]  ;;  %v7669_v8 = vld [vmem:[%s10425_s0 + $0x10] sm:$0xff]  ;;  %v8630_v0 = vmov 0  }
   0x3   :  { %v7670_v9 = vld [vmem:[%s10425_s0 + $0x18] sm:$0xff]  ;;  %v7671_v10 = vld [vmem:[%s10425_s0 + $0x20] sm:$0xff]  ;;  %v7672_v11 = vld [vmem:[%s10425_s0 + $0x28] sm:$0xff]  ;;  %1412 = vst [vmem:[#allocation2] sm:$0xf] %v8630_v0 }
   0x4   :  { %v499_v2 = vpack.c.b16 %v496_v1, %v496_v1  ;;  %v7673_v12 = vld [vmem:[%s10425_s0 + $0x30] sm:$0xff]  ;;  %v7674_v13 = vld [vmem:[%s10425_s0 + $0x38] sm:$0xff]  ;;  %v7675_v14 = vld [vmem:[%s10425_s0 + $0x40] sm:$0xff]  ;;  %1413 = vst [vmem:[#allocation2 + $0x4] sm:$0xf] %v8630_v0 }
   0x5   :  { %v8723_v16 = vld [vmem:[%s10424_s5] ss:$0 sm:$0xff]  ;;  %v7676_v25 = vld [vmem:[%s10425_s0 + $0x48] sm:$0xff]  ;;  %v7821_v29 = vld [vmem:[%s10426_s2 + $0x38] sm:$0xff]  ;;  %1414 = vst [vmem:[#allocation2 + $0x8] sm:$0xf] %v8630_v0 }
   0x6   :  { %v697_v3 = vsel %vm695_vm0, %v499_v2, 0  ;;  %v7829_v30 = vld [vmem:[%s10426_s2 + $0x78] sm:$0xff]  ;;  %2935 = vmatpush.bf16.msra.mxu1 %v7821_v29  ;;  %v7820_v34 = vld [vmem:[%s10426_s2 + $0x30] sm:$0xff]  ;;  %v7819_v41 = vld [vmem:[%s10426_s2 + $0x28] sm:$0xff]  ;;  %1415 = vst [vmem:[#allocation2 + $0xc] sm:$0xf] %v8630_v0 }
   0x7   :  { %704 = vmatpush.bf16.msra.mxu0 %v697_v3  ;;  %3024 = vmatpush.bf16.msra.mxu2 %v7829_v30  ;;  %v7828_v35 = vld [vmem:[%s10426_s2 + $0x70] sm:$0xff]  ;;  %v7827_v42 = vld [vmem:[%s10426_s2 + $0x68] sm:$0xff]  ;;  %v7818_v43 = vld [vmem:[%s10426_s2 + $0x20] sm:$0xff]  ;;  %1416 = vst [vmem:[#allocation2 + $0x10] sm:$0xf] %v8630_v0 }
   0x8   :  { %v7677_v39 = vld [vmem:[%s10425_s0 + $0x50] sm:$0xff]  ;;  %v7826_v44 = vld [vmem:[%s10426_s2 + $0x60] sm:$0xff]  ;;  %v7817_v47 = vld [vmem:[%s10426_s2 + $0x18] sm:$0xff]  ;;  %1417 = vst [vmem:[#allocation2 + $0x14] sm:$0xf] %v8630_v0 }
   0x9   :  { %v7825_v48 = vld [vmem:[%s10426_s2 + $0x58] sm:$0xff]  ;;  %v7816_v53 = vld [vmem:[%s10426_s2 + $0x10] sm:$0xff]  ;;  %v7815_v61 = vld [vmem:[%s10426_s2 + $0x8] sm:$0xff]  ;;  %1418 = vst [vmem:[#allocation2 + $0x18] sm:$0xf] %v8630_v0 }
   0xa   :  { %2936 = vmatpush.bf16.msra.mxu1 %v7820_v34  ;;  %v7837_v49 = vld [vmem:[%s10426_s2 + $0xb8] sm:$0xff]  ;;  %v7824_v54 = vld [vmem:[%s10426_s2 + $0x50] sm:$0xff]  ;;  %v7823_v62 = vld [vmem:[%s10426_s2 + $0x48] sm:$0xff]  ;;  %1419 = vst [vmem:[#allocation2 + $0x1c] sm:$0xf] %v8630_v0 }
   0xb   :  { %705 = vmatpush.bf16.msra.mxu0 %v7732_v4  ;;  %3025 = vmatpush.bf16.msra.mxu2 %v7828_v35  ;;  %v7836_v55 = vld [vmem:[%s10426_s2 + $0xb0] sm:$0xff]  ;;  %v7678_v59 = vld [vmem:[%s10425_s0 + $0x58] sm:$0xff]  ;;  %v7835_v63 = vld [vmem:[%s10426_s2 + $0xa8] sm:$0xff]  ;;  %1420 = vst [vmem:[#allocation2 + $0x20] sm:$0xf] %v8630_v0 }
   0xc   :  { %3113 = vmatpush.bf16.msra.mxu3 %v7837_v49  ;;  %v7814_v1 = vld [vmem:[%s10426_s2] sm:$0xff]  ;;  %1421 = vst [vmem:[#allocation2 + $0x24] sm:$0xf] %v8630_v0  ;;  %v7680_v29 = vld [vmem:[%s10425_s0 + $0x68] sm:$0xff]  ;;  %v7682_v49 = vld [vmem:[%s10425_s0 + $0x78] sm:$0xff] }
   0xd   :  { %v7822_v2 = vld [vmem:[%s10426_s2 + $0x40] sm:$0xff]  ;;  %1422 = vst [vmem:[#allocation2 + $0x28] sm:$0xf] %v8630_v0 }
   0xe   :  { %2937 = vmatpush.bf16.msra.mxu1 %v7819_v41  ;;  %v7834_v3 = vld [vmem:[%s10426_s2 + $0xa0] sm:$0xff]  ;;  %1423 = vst [vmem:[#allocation2 + $0x2c] sm:$0xf] %v8630_v0  ;;  %v7681_v41 = vld [vmem:[%s10425_s0 + $0x70] sm:$0xff] }
   0xf   :  { %706 = vmatpush.bf16.msra.mxu0 %v7731_v5  ;;  %3026 = vmatpush.bf16.msra.mxu2 %v7827_v42  ;;  %1424 = vst [vmem:[#allocation2 + $0x30] sm:$0xf] %v8630_v0  ;;  %v7735_v30 = vld [vmem:[#allocation2 + $0x10] sm:$0xff] }
  0x10   :  { %3114 = vmatpush.bf16.msra.mxu3 %v7836_v55  ;;  %1425 = vst [vmem:[#allocation2 + $0x34] sm:$0xf] %v8630_v0 }
  0x11   :  { %1426 = vst [vmem:[#allocation2 + $0x38] sm:$0xf] %v8630_v0 }
  0x12   :  { %6242 = vmatmul.msk.bf16.vlgmr.msra.gmra.mxu0 %vm502_vm1, %v7667_v6  ;;  %2938 = vmatpush.bf16.msra.mxu1 %v7818_v43  ;;  %v7833_v6 = vld [vmem:[%s10426_s2 + $0x98] sm:$0xff]  ;;  %1427 = vst [vmem:[#allocation2 + $0x3c] sm:$0xf] %v8630_v0 }
  0x13   :  { %3027 = vmatpush.bf16.msra.mxu2 %v7826_v44  ;;  %1428 = vst [vmem:[#allocation2 + $0x40] sm:$0xf] %v8630_v0  ;;  %v7737_v42 = vld [vmem:[#allocation2 + $0x20] sm:$0xff] }
  0x14   :  { %3115 = vmatpush.bf16.msra.mxu3 %v7835_v63  ;;  %1429 = vst [vmem:[#allocation2 + $0x44] sm:$0xf] %v8630_v0 }
  0x15   :  { %1433 = vst [vmem:[#allocation2 + $0x50] sm:$0xf] %v8630_v0  ;;  %v7738_v43 = vld [vmem:[#allocation2 + $0x28] sm:$0xff] }
  0x16   :  { %2939 = vmatpush.bf16.msra.mxu1 %v7817_v47  ;;  %1434 = vst [vmem:[#allocation2 + $0x54] sm:$0xf] %v8630_v0 }
  0x17   :  { %3028 = vmatpush.bf16.msra.mxu2 %v7825_v48  ;;  %1435 = vst [vmem:[#allocation2 + $0xa0] sm:$0xf] %v8630_v0 }
  0x18   :  { %3116 = vmatpush.bf16.msra.mxu3 %v7834_v3  ;;  %1436 = vst [vmem:[#allocation2 + $0xa4] sm:$0xf] %v8630_v0 }
  0x19   :  { %1437 = vst [vmem:[#allocation2 + $0xf0] sm:$0xf] %v8630_v0 }
  0x1a   :  { %2940 = vmatpush.bf16.msra.mxu1 %v7816_v53  ;;  %1438 = vst [vmem:[#allocation2 + $0xf4] sm:$0xf] %v8630_v0 }
  0x1b   :  { %3029 = vmatpush.bf16.msra.mxu2 %v7824_v54  ;;  %1439 = vst [vmem:[#allocation2 + $0x140] sm:$0xf] %v8630_v0 }
  0x1c   :  { %3117 = vmatpush.bf16.msra.mxu3 %v7833_v6  ;;  %1440 = vst [vmem:[#allocation2 + $0x144] sm:$0xf] %v8630_v0 }
  0x1d   :  { %1441 = vst [vmem:[#allocation2 + $0x190] sm:$0xf] %v8630_v0 }
  0x1e   :  { %2941 = vmatpush.bf16.msra.mxu1 %v7815_v61  ;;  %1442 = vst [vmem:[#allocation2 + $0x194] sm:$0xf] %v8630_v0 }
  0x1f   :  { %3030 = vmatpush.bf16.msra.mxu2 %v7823_v62  ;;  %1443 = vst [vmem:[#allocation2 + $0x1e0] sm:$0xf] %v8630_v0  ;;  %v7751_v3 = vld [vmem:[#allocation2 + $0xa0] sm:$0xff] }
  0x20   :  { %1444 = vst [vmem:[#allocation2 + $0x1e4] sm:$0xf] %v8630_v0 }
  0x21   :  { %1445 = vst [vmem:[#allocation2 + $0x230] sm:$0xf] %v8630_v0 }
  0x22   :  { %6243 = vmatmul.msk.bf16.gmra.mxu0 %vm502_vm1, %v7668_v7  ;;  %2942 = vmatpush.bf16.msra.mxu1 %v7814_v1  ;;  %1446 = vst [vmem:[#allocation2 + $0x234] sm:$0xf] %v8630_v0 }
  0x23   :  { %3031 = vmatpush.bf16.msra.mxu2 %v7822_v2  ;;  %1447 = vst [vmem:[#allocation2 + $0x280] sm:$0xf] %v8630_v0  ;;  %v7683_v2 = vld [vmem:[%s10425_s0 + $0x80] sm:$0xff] }
  0x24   :  { %1448 = vst [vmem:[#allocation2 + $0x284] sm:$0xf] %v8630_v0 }
  0x25   :  { %3869 = vst [vmem:[#allocation3] sm:$0xf] %v8630_v0 }
  0x26   :  { %3870 = vst [vmem:[#allocation3 + $0x4] sm:$0xf] %v8630_v0 }
  0x27   :  { %3871 = vst [vmem:[#allocation3 + $0x8] sm:$0xf] %v8630_v0 }
  0x28   :  { %3872 = vst [vmem:[#allocation3 + $0xc] sm:$0xf] %v8630_v0 }
  0x29   :  { %3873 = vst [vmem:[#allocation3 + $0x10] sm:$0xf] %v8630_v0 }
  0x2a   :  { %3874 = vst [vmem:[#allocation3 + $0x14] sm:$0xf] %v8630_v0 }
  0x2b   :  { %3875 = vst [vmem:[#allocation3 + $0x18] sm:$0xf] %v8630_v0 }
  0x2c   :  { %3876 = vst [vmem:[#allocation3 + $0x1c] sm:$0xf] %v8630_v0 }
  0x2d   :  { %3877 = vst [vmem:[#allocation3 + $0x20] sm:$0xf] %v8630_v0 }
  0x2e   :  { %3878 = vst [vmem:[#allocation3 + $0x24] sm:$0xf] %v8630_v0 }
  0x2f   :  { %3882 = vst [vmem:[#allocation3 + $0x30] sm:$0xf] %v8630_v0 }
  0x30   :  { %3883 = vst [vmem:[#allocation3 + $0x34] sm:$0xf] %v8630_v0 }
  0x31   :  { %3884 = vst [vmem:[#allocation3 + $0x60] sm:$0xf] %v8630_v0 }
  0x32   :  { %6244 = vmatmul.msk.bf16.gmra.mxu0 %vm502_vm1, %v7669_v8  ;;  %3885 = vst [vmem:[#allocation3 + $0x64] sm:$0xf] %v8630_v0 }
  0x33   :  { %3886 = vst [vmem:[#allocation3 + $0x90] sm:$0xf] %v8630_v0 }
  0x34   :  { %3887 = vst [vmem:[#allocation3 + $0x94] sm:$0xf] %v8630_v0 }
  0x35   :  { %3888 = vst [vmem:[#allocation3 + $0xc0] sm:$0xf] %v8630_v0 }
  0x36   :  { %3889 = vst [vmem:[#allocation3 + $0xc4] sm:$0xf] %v8630_v0 }
  0x37   :  { %5034 = vst [vmem:[#allocation4] sm:$0xf] %v8630_v0 }
  0x38   :  { %5035 = vst [vmem:[#allocation4 + $0x4] sm:$0xf] %v8630_v0 }
  0x39   :  { %5036 = vst [vmem:[#allocation4 + $0x8] sm:$0xf] %v8630_v0 }
  0x3a   :  { %5037 = vst [vmem:[#allocation4 + $0xc] sm:$0xf] %v8630_v0 }
  0x3b   :  { %5038 = vst [vmem:[#allocation4 + $0x10] sm:$0xf] %v8630_v0 }
  0x3c   :  { %5039 = vst [vmem:[#allocation4 + $0x14] sm:$0xf] %v8630_v0 }
  0x3d   :  { %5043 = vst [vmem:[#allocation4 + $0x20] sm:$0xf] %v8630_v0 }
  0x3e   :  { %5044 = vst [vmem:[#allocation4 + $0x24] sm:$0xf] %v8630_v0 }
  0x3f   :  { %5045 = vst [vmem:[#allocation4 + $0x40] sm:$0xf] %v8630_v0 }
  0x40   :  { %5046 = vst [vmem:[#allocation4 + $0x44] sm:$0xf] %v8630_v0 }
  0x42   :  { %6245 = vmatmul.msk.bf16.gmra.mxu0 %vm502_vm1, %v7670_v9  ;;  %v7733_v9 = vld [vmem:[#allocation2] sm:$0xff] }
  0x43   :  { %2943 = vmatmul.bf16.vlgmr.msra.gmra.mxu1 %v7733_v9 }
  0x52   :  { %6246 = vmatmul.msk.bf16.gmra.mxu0 %vm502_vm1, %v7671_v10 }
  0x53   :  { %2948 = vmatmul.bf16.gmra.mxu1 %v7735_v30 }
  0x62   :  { %6247 = vmatmul.msk.bf16.gmra.mxu0 %vm502_vm1, %v7672_v11  ;;  %v7832_v11 = vld [vmem:[%s10426_s2 + $0x90] sm:$0xff] }
  0x63   :  { %3118 = vmatpush.bf16.msra.mxu3 %v7832_v11  ;;  %2953 = vmatmul.bf16.gmra.mxu1 %v7737_v42 }
  0x72   :  { %6248 = vmatmul.msk.bf16.gmra.mxu0 %vm502_vm1, %v7673_v12 }
  0x82   :  { %6249 = vmatmul.msk.bf16.gmra.mxu0 %vm502_vm1, %v7674_v13 }
  0x8f   :  { %v708_v15 = vpop.f32.mrf.mxu0 }
  0x90   :  { %v709_v17 = vadd.f32 %v8723_v16, %v708_v15 }
  0x92   :  { %6250 = vmatmul.msk.bf16.gmra.mxu0 %vm502_vm1, %v7675_v14  ;;  %v1156_v19 = vmul.f32 0.2, %v709_v17  ;;  %vm1028_vm2 = vcmp.ge.f32.partialorder %v709_v17, 0.0  ;;  %v7734_v14 = vld [vmem:[#allocation2 + $0x8] sm:$0xff] }
  0x93   :  { %3032 = vmatmul.bf16.vlgmr.msra.gmra.mxu2 %v7734_v14 }
  0x94   :  { %v1284_v22 = vsel %vm1028_vm2, %v709_v17, %v1156_v19  ;;  %v7679_v17 = vld [vmem:[%s10425_s0 + $0x60] sm:$0xff]  ;;  %v7831_v19 = vld [vmem:[%s10426_s2 + $0x88] sm:$0xff] }
  0x95   :  { %3119 = vmatpush.bf16.msra.mxu3 %v7831_v19 }
  0x97   :  { %v710_v18 = vpop.f32.mrf.mxu0 }
  0x98   :  { %v711_v20 = vadd.f32 %v8723_v16, %v710_v18 }
  0x9a   :  { %vm1029_vm3 = vcmp.ge.f32.partialorder %v711_v20, 0.0  ;;  %v1157_v21 = vmul.f32 0.2, %v711_v20 }
  0x9c   :  { %v1285_v23 = vsel %vm1029_vm3, %v711_v20, %v1157_v21  ;;  %v7830_v20 = vld [vmem:[%s10426_s2 + $0x80] sm:$0xff] }
  0x9d   :  { %v8075_v24 = vpack.c.bf16 %v1285_v23, %v1284_v22  ;;  %3120 = vmatpush.bf16.msra.mxu3 %v7830_v20 }
  0x9f   :  { %8076 = vst [vmem:[#allocation2 + $0x58] sm:$0xff] %v8075_v24   ;;  %v713_v26 = vpop.f32.mrf.mxu0 }
  0xa0   :  { %v714_v27 = vadd.f32 %v8723_v16, %v713_v26  ;;  %3121 = vmatmul.bf16.vlgmr.msra.gmra.mxu3 %v7735_v30 }
  0xa2   :  { %6251 = vmatmul.msk.bf16.gmra.mxu0 %vm502_vm1, %v7676_v25  ;;  %v1158_v31 = vmul.f32 0.2, %v714_v27  ;;  %vm1030_vm4 = vcmp.ge.f32.partialorder %v714_v27, 0.0 }
  0xa4   :  { %v1286_v36 = vsel %vm1030_vm4, %v714_v27, %v1158_v31  ;;  %v7736_v31 = vld [vmem:[#allocation2 + $0x18] sm:$0xff] }
  0xa5   :  { %3037 = vmatmul.bf16.gmra.mxu2 %v7736_v31 }
  0xa7   :  { %v715_v28 = vpop.f32.mrf.mxu0 }
  0xa8   :  { %v716_v32 = vadd.f32 %v8723_v16, %v715_v28 }
  0xaa   :  { %vm1031_vm5 = vcmp.ge.f32.partialorder %v716_v32, 0.0  ;;  %v1159_v33 = vmul.f32 0.2, %v716_v32 }
  0xac   :  { %v1287_v37 = vsel %vm1031_vm5, %v716_v32, %v1159_v33 }
  0xad   :  { %v8080_v38 = vpack.c.bf16 %v1287_v37, %v1286_v36 }
  0xaf   :  { %8492 = vst [vmem:[#allocation2 + $0x60] sm:$0xff] %v8080_v38   ;;  %v718_v40 = vpop.f32.mrf.mxu0 }
  0xb0   :  { %v719_v45 = vadd.f32 %v8723_v16, %v718_v40  ;;  %3126 = vmatmul.bf16.gmra.mxu3 %v7737_v42 }
  0xb2   :  { %6252 = vmatmul.msk.bf16.gmra.mxu0 %vm502_vm1, %v7677_v39  ;;  %v1160_v50 = vmul.f32 0.2, %v719_v45  ;;  %vm1032_vm6 = vcmp.ge.f32.partialorder %v719_v45, 0.0 }
  0xb4   :  { %v1288_v56 = vsel %vm1032_vm6, %v719_v45, %v1160_v50 }
  0xb5   :  { %3042 = vmatmul.bf16.gmra.mxu2 %v7738_v43 }
  0xb7   :  { %v720_v46 = vpop.f32.mrf.mxu0 }
  0xb8   :  { %v721_v51 = vadd.f32 %v8723_v16, %v720_v46 }
  0xba   :  { %vm1033_vm7 = vcmp.ge.f32.partialorder %v721_v51, 0.0  ;;  %v1161_v52 = vmul.f32 0.2, %v721_v51 }
  0xbc   :  { %v1289_v57 = vsel %vm1033_vm7, %v721_v51, %v1161_v52  ;;  %v7739_v51 = vld [vmem:[#allocation2 + $0x30] sm:$0xff]  ;;  %v7740_v52 = vld [vmem:[#allocation2 + $0x38] sm:$0xff] }
  0xbd   :  { %v8085_v58 = vpack.c.bf16 %v1289_v57, %v1288_v56  ;;  %2958 = vmatmul.bf16.gmra.mxu1 %v7739_v51 }
  0xbf   :  { %8493 = vst [vmem:[#allocation2 + $0x68] sm:$0xff] %v8085_v58   ;;  %v723_v60 = vpop.f32.mrf.mxu0 }
  0xc0   :  { %v724_v4 = vadd.f32 %v8723_v16, %v723_v60  ;;  %3131 = vmatmul.bf16.gmra.mxu3 %v7739_v51  ;;  %v2944_v43 = vpop.f32.mrf.mxu1 }
  0xc2   :  { %6253 = vmatmul.msk.bf16.gmra.mxu0 %vm502_vm1, %v7678_v59  ;;  %v1162_v7 = vmul.f32 0.2, %v724_v4  ;;  %vm1034_vm8 = vcmp.ge.f32.partialorder %v724_v4, 0.0 }
  0xc4   :  { %v1290_v12 = vsel %vm1034_vm8, %v724_v4, %v1162_v7  ;;  %v7741_v4 = vld [vmem:[#allocation2 + $0x40] sm:$0xff] }
  0xc5   :  { %3047 = vmatmul.bf16.gmra.mxu2 %v7740_v52 }
  0xc7   :  { %v725_v5 = vpop.f32.mrf.mxu0 }
  0xc8   :  { %v726_v8 = vadd.f32 %v8723_v16, %v725_v5 }
  0xca   :  { %vm1035_vm9 = vcmp.ge.f32.partialorder %v726_v8, 0.0  ;;  %v1163_v10 = vmul.f32 0.2, %v726_v8 }
  0xcc   :  { %v1291_v13 = vsel %vm1035_vm9, %v726_v8, %v1163_v10 }
  0xcd   :  { %v8090_v15 = vpack.c.bf16 %v1291_v13, %v1290_v12  ;;  %2963 = vmatmul.bf16.gmra.mxu1 %v7751_v3  ;;  %v7684_v13 = vld [vmem:[%s10425_s0 + $0x88] sm:$0xff] }
  0xce   :  { %v7688_v3 = vld [vmem:[%s10425_s0 + $0xa8] sm:$0xff] }
  0xcf   :  { %8494 = vst [vmem:[#allocation2 + $0x70] sm:$0xff] %v8090_v15   ;;  %v728_v18 = vpop.f32.mrf.mxu0 }
  0xd0   :  { %v729_v21 = vadd.f32 %v8723_v16, %v728_v18  ;;  %3136 = vmatmul.bf16.gmra.mxu3 %v7741_v4 }
  0xd2   :  { %6254 = vmatmul.msk.bf16.gmra.mxu0 %vm502_vm1, %v7679_v17  ;;  %v1164_v23 = vmul.f32 0.2, %v729_v21  ;;  %vm1036_vm10 = vcmp.ge.f32.partialorder %v729_v21, 0.0 }
  0xd4   :  { %v1292_v26 = vsel %vm1036_vm10, %v729_v21, %v1164_v23 }
  0xd7   :  { %v730_v22 = vpop.f32.mrf.mxu0 }
  0xd8   :  { %v731_v24 = vadd.f32 %v8723_v16, %v730_v22 }
  0xda   :  { %vm1037_vm11 = vcmp.ge.f32.partialorder %v731_v24, 0.0  ;;  %v1165_v25 = vmul.f32 0.2, %v731_v24 }
  0xdc   :  { %v1293_v27 = vsel %vm1037_vm11, %v731_v24, %v1165_v25  ;;  %v7685_v25 = vld [vmem:[%s10425_s0 + $0x90] sm:$0xff] }
  0xdd   :  { %v8095_v28 = vpack.c.bf16 %v1293_v27, %v1292_v26 }
  0xdf   :  { %8495 = vst [vmem:[#allocation2 + $0x78] sm:$0xff] %v8095_v28   ;;  %v733_v32 = vpop.f32.mrf.mxu0 }
  0xe0   :  { %v734_v33 = vadd.f32 %v8723_v16, %v733_v32 }
  0xe2   :  { %6255 = vmatmul.msk.bf16.gmra.mxu0 %vm502_vm1, %v7680_v29  ;;  %v1166_v35 = vmul.f32 0.2, %v734_v33  ;;  %vm1038_vm12 = vcmp.ge.f32.partialorder %v734_v33, 0.0 }
  0xe4   :  { %v1294_v38 = vsel %vm1038_vm12, %v734_v33, %v1166_v35 }
  0xe7   :  { %v735_v34 = vpop.f32.mrf.mxu0 }
  0xe8   :  { %v736_v36 = vadd.f32 %v8723_v16, %v735_v34 }
  0xea   :  { %vm1039_vm13 = vcmp.ge.f32.partialorder %v736_v36, 0.0  ;;  %v1167_v37 = vmul.f32 0.2, %v736_v36 }
  0xec   :  { %v1295_v39 = vsel %vm1039_vm13, %v736_v36, %v1167_v37  ;;  %v7686_v36 = vld [vmem:[%s10425_s0 + $0x98] sm:$0xff] }
  0xed   :  { %v8100_v40 = vpack.c.bf16 %v1295_v39, %v1294_v38 }
  0xef   :  { %8496 = vst [vmem:[#allocation2 + $0x80] sm:$0xff] %v8100_v40   ;;  %v738_v44 = vpop.f32.mrf.mxu0 }
  0xf0   :  { %v739_v47 = vadd.f32 %v8723_v16, %v738_v44 }
  0xf2   :  { %6256 = vmatmul.msk.bf16.gmra.mxu0 %vm502_vm1, %v7681_v41  ;;  %v1168_v50 = vmul.f32 0.2, %v739_v47  ;;  %vm1040_vm15 = vcmp.ge.f32.partialorder %v739_v47, 0.0 }
  0xf4   :  { %v1296_v55 = vsel %vm1040_vm15, %v739_v47, %v1168_v50  ;;  %v8931_v47 = vld [vmem:[%s10424_s5 + $0x2] ss:$0 sm:$0xff] }
  0xf5   :  { %v2945_v50 = vadd.f32 %v8931_v47, %v2944_v43 }
  0xf7   :  { %v740_v45 = vpop.f32.mrf.mxu0 }
  0xf8   :  { %v741_v46 = vadd.f32 %v8723_v16, %v740_v45 }
  0xfa   :  { %v1169_v48 = vmul.f32 0.2, %v741_v46  ;;  %vm1041_vm14 = vcmp.ge.f32.partialorder %v741_v46, 0.0 }
  0xfc   :  { %v1297_v54 = vsel %vm1041_vm14, %v741_v46, %v1169_v48 }
  0xfd   :  { %v8105_v56 = vpack.c.bf16 %v1297_v54, %v1296_v55  ;;  %v8938_v54 = vpop.f32.mrf.mxu1 }
  0xff   :  { %v743_v53 = vpop.f32.mrf.mxu0  ;;  %8497 = vst [vmem:[#allocation2 + $0x88] sm:$0xff] %v8105_v56  }
 0x100   :  { %v744_v57 = vadd.f32 %v8723_v16, %v743_v53 }
 0x102   :  { %6257 = vmatmul.msk.bf16.gmra.mxu0 %vm502_vm1, %v7682_v49  ;;  %v1170_v59 = vmul.f32 0.2, %v744_v57  ;;  %vm1042_vm0 = vcmp.ge.f32.partialorder %v744_v57, 0.0  ;;  %v7687_v49 = vld [vmem:[%s10425_s0 + $0xa0] sm:$0xff] }
 0x104   :  { %v1298_v62 = vsel %vm1042_vm0, %v744_v57, %v1170_v59 }
 0x107   :  { %v745_v58 = vpop.f32.mrf.mxu0 }
 0x108   :  { %v746_v60 = vadd.f32 %v8723_v16, %v745_v58 }
 0x10a   :  { %vm1043_vm2 = vcmp.ge.f32.partialorder %v746_v60, 0.0  ;;  %v1171_v61 = vmul.f32 0.2, %v746_v60 }
 0x10c   :  { %v1299_v63 = vsel %vm1043_vm2, %v746_v60, %v1171_v61 }
 0x10d   :  { %v8110_v1 = vpack.c.bf16 %v1299_v63, %v1298_v62 }
 0x10f   :  { %8498 = vst [vmem:[#allocation2 + $0x90] sm:$0xff] %v8110_v1   ;;  %v748_v5 = vpop.f32.mrf.mxu0 }
 0x110   :  { %v749_v0 = vadd.f32 %v8723_v16, %v748_v5 }
 0x112   :  { %6258 = vmatmul.msk.bf16.gmra.mxu0 %vm502_vm1, %v7683_v2  ;;  %v1172_v7 = vmul.f32 0.2, %v749_v0  ;;  %vm1044_vm3 = vcmp.ge.f32.partialorder %v749_v0, 0.0  ;;  %v2949_v2 = vpop.f32.mrf.mxu1 }
 0x113   :  { %v2950_v5 = vadd.f32 %v8931_v47, %v2949_v2 }
 0x114   :  { %v1300_v10 = vsel %vm1044_vm3, %v749_v0, %v1172_v7 }
 0x116   :  { %v3033_v52 = vpop.f32.mrf.mxu2 }
 0x117   :  { %v750_v6 = vpop.f32.mrf.mxu0  ;;  %v3034_v53 = vadd.f32 %v3033_v52, %v2945_v50 }
 0x118   :  { %v751_v8 = vadd.f32 %v8723_v16, %v750_v6 }
 0x11a   :  { %vm1045_vm4 = vcmp.ge.f32.partialorder %v751_v8, 0.0  ;;  %v1173_v9 = vmul.f32 0.2, %v751_v8 }
 0x11c   :  { %v1301_v11 = vsel %vm1045_vm4, %v751_v8, %v1173_v9 }
 0x11d   :  { %v8115_v12 = vpack.c.bf16 %v1301_v11, %v1300_v10  ;;  %v8952_v10 = vpop.f32.mrf.mxu1 }
 0x11e   :  { %v8942_v60 = vpop.f32.mrf.mxu2 }
 0x11f   :  { %8499 = vst [vmem:[#allocation2 + $0xa8] sm:$0xff] %v8115_v12   ;;  %v753_v14 = vpop.f32.mrf.mxu0 }
 0x120   :  { %v754_v15 = vadd.f32 %v8723_v16, %v753_v14 }
 0x122   :  { %6259 = vmatmul.msk.bf16.gmra.mxu0 %vm502_vm1, %v7684_v13  ;;  %v1174_v19 = vmul.f32 0.2, %v754_v15  ;;  %vm1046_vm5 = vcmp.ge.f32.partialorder %v754_v15, 0.0 }
 0x123   :  { %v3122_v8 = vpop.f32.mrf.mxu3 }
 0x124   :  { %v1302_v22 = vsel %vm1046_vm5, %v754_v15, %v1174_v19  ;;  %v8950_v9 = vadd.f32 %v3122_v8, %v3034_v53 }
 0x126   :  { %v7752_v17 = vld [vmem:[#allocation2 + $0xa8] sm:$0xff] }
 0x127   :  { %v755_v18 = vpop.f32.mrf.mxu0  ;;  %3052 = vmatmul.bf16.gmra.mxu2 %v7752_v17 }
 0x128   :  { %v756_v20 = vadd.f32 %v8723_v16, %v755_v18  ;;  %v3038_v0 = vpop.f32.mrf.mxu2 }
 0x129   :  { %v3039_v7 = vadd.f32 %v3038_v0, %v2950_v5 }
 0x12a   :  { %vm1047_vm6 = vcmp.ge.f32.partialorder %v756_v20, 0.0  ;;  %v1175_v21 = vmul.f32 0.2, %v756_v20 }
 0x12c   :  { %v1303_v23 = vsel %vm1047_vm6, %v756_v20, %v1175_v21  ;;  %v8957_v20 = vpop.f32.mrf.mxu3 }
 0x12d   :  { %v8120_v24 = vpack.c.bf16 %v1303_v23, %v1302_v22  ;;  %v2954_v22 = vpop.f32.mrf.mxu1  ;;  %v7689_v23 = vld [vmem:[%s10425_s0 + $0xb0] sm:$0xff] }
 0x12f   :  { %8500 = vst [vmem:[#allocation2 + $0xb0] sm:$0xff] %v8120_v24   ;;  %v758_v26 = vpop.f32.mrf.mxu0 }
 0x130   :  { %v759_v27 = vadd.f32 %v8723_v16, %v758_v26  ;;  %v8955_v17 = vpop.f32.mrf.mxu2 }
 0x132   :  { %6260 = vmatmul.msk.bf16.gmra.mxu0 %vm502_vm1, %v7685_v25  ;;  %v1176_v30 = vmul.f32 0.2, %v759_v27  ;;  %vm1048_vm7 = vcmp.ge.f32.partialorder %v759_v27, 0.0  ;;  %v2955_v25 = vadd.f32 %v8931_v47, %v2954_v22 }
 0x134   :  { %v1304_v33 = vsel %vm1048_vm7, %v759_v27, %v1176_v30 }
 0x136   :  { %v7753_v28 = vld [vmem:[#allocation2 + $0xb0] sm:$0xff] }
 0x137   :  { %v760_v29 = vpop.f32.mrf.mxu0  ;;  %2968 = vmatmul.bf16.gmra.mxu1 %v7753_v28  ;;  %3141 = vmatmul.bf16.gmra.mxu3 %v7753_v28 }
 0x138   :  { %v761_v31 = vadd.f32 %v8723_v16, %v760_v29  ;;  %v3043_v26 = vpop.f32.mrf.mxu2  ;;  %v3127_v29 = vpop.f32.mrf.mxu3 }
 0x139   :  { %v3044_v28 = vadd.f32 %v3043_v26, %v2955_v25  ;;  %v8965_v30 = vadd.f32 %v3127_v29, %v3039_v7 }
 0x13a   :  { %vm1049_vm8 = vcmp.ge.f32.partialorder %v761_v31, 0.0  ;;  %v1177_v32 = vmul.f32 0.2, %v761_v31 }
 0x13c   :  { %v1305_v34 = vsel %vm1049_vm8, %v761_v31, %v1177_v32  ;;  %v8967_v31 = vpop.f32.mrf.mxu1 }
 0x13d   :  { %v8125_v35 = vpack.c.bf16 %v1305_v34, %v1304_v33 }
 0x13f   :  { %8501 = vst [vmem:[#allocation2 + $0xb8] sm:$0xff] %v8125_v35   ;;  %v763_v37 = vpop.f32.mrf.mxu0 }
 0x140   :  { %v764_v38 = vadd.f32 %v8723_v16, %v763_v37  ;;  %v8970_v37 = vpop.f32.mrf.mxu2 }
 0x142   :  { %6261 = vmatmul.msk.bf16.gmra.mxu0 %vm502_vm1, %v7686_v36  ;;  %v1178_v41 = vmul.f32 0.2, %v764_v38  ;;  %vm1050_vm9 = vcmp.ge.f32.partialorder %v764_v38, 0.0 }
 0x144   :  { %v1306_v45 = vsel %vm1050_vm9, %v764_v38, %v1178_v41 }
 0x146   :  { %v7754_v39 = vld [vmem:[#allocation2 + $0xb8] sm:$0xff] }
 0x147   :  { %v765_v40 = vpop.f32.mrf.mxu0  ;;  %3057 = vmatmul.bf16.gmra.mxu2 %v7754_v39 }
 0x148   :  { %v766_v42 = vadd.f32 %v8723_v16, %v765_v40  ;;  %v8972_v40 = vpop.f32.mrf.mxu3 }
 0x14a   :  { %vm1051_vm10 = vcmp.ge.f32.partialorder %v766_v42, 0.0  ;;  %v1179_v44 = vmul.f32 0.2, %v766_v42 }
 0x14c   :  { %v1307_v46 = vsel %vm1051_vm10, %v766_v42, %v1179_v44  ;;  %v7690_v42 = vld [vmem:[%s10425_s0 + $0xb8] sm:$0xff]  ;;  %v2959_v44 = vpop.f32.mrf.mxu1 }
 0x14d   :  { %v8130_v48 = vpack.c.bf16 %v1307_v46, %v1306_v45  ;;  %v2960_v45 = vadd.f32 %v8931_v47, %v2959_v44  ;;  %v3048_v46 = vpop.f32.mrf.mxu2 }
 0x14f   :  { %8502 = vst [vmem:[#allocation2 + $0xc0] sm:$0xff] %v8130_v48   ;;  %v768_v51 = vpop.f32.mrf.mxu0 }
 0x150   :  { %v769_v55 = vadd.f32 %v8723_v16, %v768_v51  ;;  %v3132_v50 = vpop.f32.mrf.mxu3 }
 0x151   :  { %v8980_v51 = vadd.f32 %v3132_v50, %v3044_v28 }
 0x152   :  { %6262 = vmatmul.msk.bf16.gmra.mxu0 %vm502_vm1, %v7687_v49  ;;  %v1180_v58 = vmul.f32 0.2, %v769_v55  ;;  %vm1052_vm11 = vcmp.ge.f32.partialorder %v769_v55, 0.0  ;;  %v3049_v49 = vadd.f32 %v3048_v46, %v2960_v45 }
 0x154   :  { %v1308_v62 = vsel %vm1052_vm11, %v769_v55, %v1180_v58 }
 0x156   :  { %v7755_v56 = vld [vmem:[#allocation2 + $0xc0] sm:$0xff] }
 0x157   :  { %v770_v57 = vpop.f32.mrf.mxu0  ;;  %2973 = vmatmul.bf16.gmra.mxu1 %v7755_v56  ;;  %3146 = vmatmul.bf16.gmra.mxu3 %v7755_v56 }
 0x158   :  { %v771_v59 = vadd.f32 %v8723_v16, %v770_v57 }
 0x15a   :  { %vm1053_vm12 = vcmp.ge.f32.partialorder %v771_v59, 0.0  ;;  %v1181_v61 = vmul.f32 0.2, %v771_v59 }
 0x15c   :  { %v1309_v63 = vsel %vm1053_vm12, %v771_v59, %v1181_v61  ;;  %v8983_v61 = vpop.f32.mrf.mxu3 }
 0x15d   :  { %v8135_v1 = vpack.c.bf16 %v1309_v63, %v1308_v62  ;;  %v7691_v63 = vld [vmem:[%s10425_s0 + $0xc0] sm:$0xff] }
 0x15f   :  { %8503 = vst [vmem:[#allocation2 + $0xc8] sm:$0xff] %v8135_v1   ;;  %v773_v4 = vpop.f32.mrf.mxu0 }
 0x160   :  { %v774_v6 = vadd.f32 %v8723_v16, %v773_v4 }
 0x162   :  { %6263 = vmatmul.msk.bf16.gmra.mxu0 %vm502_vm1, %v7688_v3  ;;  %v1182_v13 = vmul.f32 0.2, %v774_v6  ;;  %vm1054_vm13 = vcmp.ge.f32.partialorder %v774_v6, 0.0 }
 0x164   :  { %v1310_v18 = vsel %vm1054_vm13, %v774_v6, %v1182_v13  ;;  %v3137_v3 = vpop.f32.mrf.mxu3 }
 0x165   :  { %v8990_v4 = vadd.f32 %v3137_v3, %v3049_v49 }
 0x166   :  { %v7756_v11 = vld [vmem:[#allocation2 + $0xc8] sm:$0xff] }
 0x167   :  { %v775_v12 = vpop.f32.mrf.mxu0  ;;  %3062 = vmatmul.bf16.gmra.mxu2 %v7756_v11 }
 0x168   :  { %v776_v14 = vadd.f32 %v8723_v16, %v775_v12 }
 0x16a   :  { %vm1055_vm14 = vcmp.ge.f32.partialorder %v776_v14, 0.0  ;;  %v1183_v15 = vmul.f32 0.2, %v776_v14 }
 0x16c   :  { %v1311_v19 = vsel %vm1055_vm14, %v776_v14, %v1183_v15  ;;  %v8993_v14 = vpop.f32.mrf.mxu1  ;;  %v7692_v15 = vld [vmem:[%s10425_s0 + $0xc8] sm:$0xff] }
 0x16d   :  { %v8140_v21 = vpack.c.bf16 %v1311_v19, %v1310_v18  ;;  %v8998_v19 = vpop.f32.mrf.mxu2 }
 0x16f   :  { %8504 = vst [vmem:[#allocation2 + $0xd0] sm:$0xff] %v8140_v21   ;;  %v778_v24 = vpop.f32.mrf.mxu0 }
 0x170   :  { %v779_v27 = vadd.f32 %v8723_v16, %v778_v24 }
 0x172   :  { %6264 = vmatmul.msk.bf16.gmra.mxu0 %vm502_vm1, %v7689_v23  ;;  %v1184_v34 = vmul.f32 0.2, %v779_v27  ;;  %vm1056_vm15 = vcmp.ge.f32.partialorder %v779_v27, 0.0 }
 0x174   :  { %v1312_v38 = vsel %vm1056_vm15, %v779_v27, %v1184_v34  ;;  %v2964_v22 = vpop.f32.mrf.mxu1 }
 0x175   :  { %v2965_v25 = vadd.f32 %v8931_v47, %v2964_v22 }
 0x176   :  { %v7757_v32 = vld [vmem:[#allocation2 + $0xd0] sm:$0xff] }
 0x177   :  { %v780_v33 = vpop.f32.mrf.mxu0  ;;  %2978 = vmatmul.bf16.gmra.mxu1 %v7757_v32  ;;  %3151 = vmatmul.bf16.gmra.mxu3 %v7757_v32 }
 0x178   :  { %v781_v35 = vadd.f32 %v8723_v16, %v780_v33 }
 0x17a   :  { %vm1057_vm0 = vcmp.ge.f32.partialorder %v781_v35, 0.0  ;;  %v1185_v36 = vmul.f32 0.2, %v781_v35 }
 0x17c   :  { %v1313_v39 = vsel %vm1057_vm0, %v781_v35, %v1185_v36  ;;  %v7693_v35 = vld [vmem:[%s10425_s0 + $0xd0] sm:$0xff]  ;;  %v9014_v50 = vpop.f32.mrf.mxu1 }
 0x17d   :  { %v8145_v41 = vpack.c.bf16 %v1313_v39, %v1312_v38  ;;  %v9007_v38 = vpop.f32.mrf.mxu3 }
 0x17f   :  { %8505 = vst [vmem:[#allocation2 + $0xd8] sm:$0xff] %v8145_v41   ;;  %v783_v43 = vpop.f32.mrf.mxu0 }
 0x180   :  { %v784_v48 = vadd.f32 %v8723_v16, %v783_v43 }
 0x182   :  { %6265 = vmatmul.msk.bf16.gmra.mxu0 %vm502_vm1, %v7690_v42  ;;  %v1186_v55 = vmul.f32 0.2, %v784_v48  ;;  %vm1058_vm2 = vcmp.ge.f32.partialorder %v784_v48, 0.0 }
 0x184   :  { %v1314_v58 = vsel %vm1058_vm2, %v784_v48, %v1186_v55 }
 0x186   :  { %v7758_v52 = vld [vmem:[#allocation2 + $0xd8] sm:$0xff] }
 0x187   :  { %v785_v53 = vpop.f32.mrf.mxu0  ;;  %3067 = vmatmul.bf16.gmra.mxu2 %v7758_v52 }
 0x188   :  { %v786_v56 = vadd.f32 %v8723_v16, %v785_v53  ;;  %v7694_v53 = vld [vmem:[%s10425_s0 + $0xd8] sm:$0xff] }
 0x18a   :  { %vm1059_vm3 = vcmp.ge.f32.partialorder %v786_v56, 0.0  ;;  %v1187_v57 = vmul.f32 0.2, %v786_v56 }
 0x18c   :  { %v1315_v59 = vsel %vm1059_vm3, %v786_v56, %v1187_v57 }
 0x18d   :  { %v8150_v62 = vpack.c.bf16 %v1315_v59, %v1314_v58 }
 0x18f   :  { %8506 = vst [vmem:[#allocation2 + $0xe0] sm:$0xff] %v8150_v62   ;;  %v788_v1 = vpop.f32.mrf.mxu0 }
 0x190   :  { %v789_v2 = vadd.f32 %v8723_v16, %v788_v1 }
 0x192   :  { %6266 = vmatmul.msk.bf16.gmra.mxu0 %vm502_vm1, %v7691_v63  ;;  %v1188_v6 = vmul.f32 0.2, %v789_v2  ;;  %vm1060_vm4 = vcmp.ge.f32.partialorder %v789_v2, 0.0 }
 0x194   :  { %v1316_v11 = vsel %vm1060_vm4, %v789_v2, %v1188_v6 }
 0x196   :  { %v7759_v5 = vld [vmem:[#allocation2 + $0xe0] sm:$0xff] }
 0x197   :  { %v790_v0 = vpop.f32.mrf.mxu0  ;;  %3156 = vmatmul.bf16.gmra.mxu3 %v7759_v5 }
 0x198   :  { %v791_v7 = vadd.f32 %v8723_v16, %v790_v0 }
 0x19a   :  { %vm1061_vm5 = vcmp.ge.f32.partialorder %v791_v7, 0.0  ;;  %v1189_v8 = vmul.f32 0.2, %v791_v7 }
 0x19c   :  { %v1317_v12 = vsel %vm1061_vm5, %v791_v7, %v1189_v8  ;;  %v7695_v8 = vld [vmem:[%s10425_s0 + $0xe0] sm:$0xff] }
 0x19d   :  { %v8155_v13 = vpack.c.bf16 %v1317_v12, %v1316_v11 }
 0x19f   :  { %8507 = vst [vmem:[#allocation2 + $0xf8] sm:$0xff] %v8155_v13   ;;  %v793_v18 = vpop.f32.mrf.mxu0 }
 0x1a0   :  { %v794_v21 = vadd.f32 %v8723_v16, %v793_v18 }
 0x1a2   :  { %6267 = vmatmul.msk.bf16.gmra.mxu0 %vm502_vm1, %v7692_v15  ;;  %v1190_v24 = vmul.f32 0.2, %v794_v21  ;;  %vm1062_vm6 = vcmp.ge.f32.partialorder %v794_v21, 0.0 }
 0x1a4   :  { %v1318_v29 = vsel %vm1062_vm6, %v794_v21, %v1190_v24 }
 0x1a7   :  { %v795_v23 = vpop.f32.mrf.mxu0 }
 0x1a8   :  { %v796_v26 = vadd.f32 %v8723_v16, %v795_v23 }
 0x1aa   :  { %vm1063_vm7 = vcmp.ge.f32.partialorder %v796_v26, 0.0  ;;  %v1191_v27 = vmul.f32 0.2, %v796_v26  ;;  %v3053_v28 = vpop.f32.mrf.mxu2 }
 0x1ab   :  { %v3054_v33 = vadd.f32 %v3053_v28, %v2965_v25  ;;  %v7696_v28 = vld [vmem:[%s10425_s0 + $0xe8] sm:$0xff] }
 0x1ac   :  { %v1319_v32 = vsel %vm1063_vm7, %v796_v26, %v1191_v27 }
 0x1ad   :  { %v8160_v34 = vpack.c.bf16 %v1319_v32, %v1318_v29 }
 0x1af   :  { %8508 = vst [vmem:[#allocation2 + $0x100] sm:$0xff] %v8160_v34   ;;  %v798_v36 = vpop.f32.mrf.mxu0 }
 0x1b0   :  { %v799_v39 = vadd.f32 %v8723_v16, %v798_v36 }
 0x1b2   :  { %6268 = vmatmul.msk.bf16.gmra.mxu0 %vm502_vm1, %v7693_v35  ;;  %v1192_v42 = vmul.f32 0.2, %v799_v39  ;;  %vm1064_vm8 = vcmp.ge.f32.partialorder %v799_v39, 0.0  ;;  %v9020_v56 = vpop.f32.mrf.mxu2 }
 0x1b4   :  { %v1320_v46 = vsel %vm1064_vm8, %v799_v39, %v1192_v42  ;;  %v2969_v58 = vpop.f32.mrf.mxu1 }
 0x1b5   :  { %v2970_v1 = vadd.f32 %v8931_v47, %v2969_v58 }
 0x1b7   :  { %v800_v41 = vpop.f32.mrf.mxu0 }
 0x1b8   :  { %v801_v43 = vadd.f32 %v8723_v16, %v800_v41  ;;  %v9047_v41 = vld [vmem:[%s10424_s5] ss:$0 sm:$0xff] }
 0x1ba   :  { %vm1065_vm9 = vcmp.ge.f32.partialorder %v801_v43, 0.0  ;;  %v1193_v44 = vmul.f32 0.2, %v801_v43  ;;  %v3142_v45 = vpop.f32.mrf.mxu3 }
 0x1bb   :  { %v9012_v49 = vadd.f32 %v3142_v45, %v3054_v33 }
 0x1bc   :  { %v1321_v48 = vsel %vm1065_vm9, %v801_v43, %v1193_v44  ;;  %v9038_v29 = vpop.f32.mrf.mxu1 }
 0x1bd   :  { %v8165_v52 = vpack.c.bf16 %v1321_v48, %v1320_v46 }
 0x1bf   :  { %8509 = vst [vmem:[#allocation2 + $0x108] sm:$0xff] %v8165_v52   ;;  %v803_v55 = vpop.f32.mrf.mxu0 }
 0x1c0   :  { %v804_v57 = vadd.f32 %v8723_v16, %v803_v55 }
 0x1c2   :  { %6269 = vmatmul.msk.bf16.gmra.mxu0 %vm502_vm1, %v7694_v53  ;;  %v1194_v62 = vmul.f32 0.2, %v804_v57  ;;  %vm1066_vm10 = vcmp.ge.f32.partialorder %v804_v57, 0.0  ;;  %v9029_v12 = vpop.f32.mrf.mxu3  ;;  %v7697_v53 = vld [vmem:[%s10425_s0 + $0xf0] sm:$0xff] }
 0x1c4   :  { %v1322_v5 = vsel %vm1066_vm10, %v804_v57, %v1194_v62 }
 0x1c7   :  { %v805_v59 = vpop.f32.mrf.mxu0 }
 0x1c8   :  { %v806_v63 = vadd.f32 %v8723_v16, %v805_v59 }
 0x1ca   :  { %vm1067_vm11 = vcmp.ge.f32.partialorder %v806_v63, 0.0  ;;  %v1195_v2 = vmul.f32 0.2, %v806_v63  ;;  %v3058_v3 = vpop.f32.mrf.mxu2 }
 0x1cb   :  { %v3059_v6 = vadd.f32 %v3058_v3, %v2970_v1 }
 0x1cc   :  { %v1323_v0 = vsel %vm1067_vm11, %v806_v63, %v1195_v2 }
 0x1cd   :  { %v8170_v7 = vpack.c.bf16 %v1323_v0, %v1322_v5 }
 0x1cf   :  { %8510 = vst [vmem:[#allocation2 + $0x110] sm:$0xff] %v8170_v7   ;;  %v808_v11 = vpop.f32.mrf.mxu0  ;;  %v7698_v7 = vld [vmem:[%s10425_s0 + $0xf8] sm:$0xff] }
 0x1d0   :  { %v809_v13 = vadd.f32 %v8723_v16, %v808_v11 }
 0x1d2   :  { %6270 = vmatmul.msk.bf16.gmra.mxu0 %vm502_vm1, %v7695_v8  ;;  %v1196_v18 = vmul.f32 0.2, %v809_v13  ;;  %vm1068_vm12 = vcmp.ge.f32.partialorder %v809_v13, 0.0  ;;  %v9041_v33 = vpop.f32.mrf.mxu2 }
 0x1d4   :  { %v1324_v24 = vsel %vm1068_vm12, %v809_v13, %v1196_v18  ;;  %v2974_v35 = vpop.f32.mrf.mxu1 }
 0x1d5   :  { %v2975_v43 = vadd.f32 %v8931_v47, %v2974_v35 }
 0x1d7   :  { %v810_v15 = vpop.f32.mrf.mxu0 }
 0x1d8   :  { %v811_v21 = vadd.f32 %v8723_v16, %v810_v15 }
 0x1da   :  { %vm1069_vm13 = vcmp.ge.f32.partialorder %v811_v21, 0.0  ;;  %v1197_v22 = vmul.f32 0.2, %v811_v21  ;;  %v3147_v23 = vpop.f32.mrf.mxu3 }
 0x1db   :  { %v9033_v26 = vadd.f32 %v3147_v23, %v3059_v6 }
 0x1dc   :  { %v1325_v25 = vsel %vm1069_vm13, %v811_v21, %v1197_v22  ;;  %v9064_v8 = vpop.f32.mrf.mxu1 }
 0x1dd   :  { %v8175_v27 = vpack.c.bf16 %v1325_v25, %v1324_v24 }
 0x1df   :  { %8511 = vst [vmem:[#allocation2 + $0x118] sm:$0xff] %v8175_v27   ;;  %v813_v32 = vpop.f32.mrf.mxu0 }
 0x1e0   :  { %v814_v34 = vadd.f32 %v8723_v16, %v813_v32 }
 0x1e2   :  { %6271 = vmatmul.msk.bf16.gmra.mxu0 %vm502_vm1, %v7696_v28  ;;  %v1198_v39 = vmul.f32 0.2, %v814_v34  ;;  %vm1070_vm14 = vcmp.ge.f32.partialorder %v814_v34, 0.0  ;;  %v9055_v57 = vpop.f32.mrf.mxu3 }
 0x1e4   :  { %v1326_v46 = vsel %vm1070_vm14, %v814_v34, %v1198_v39  ;;  %v7769_v39 = vld [vmem:[#allocation2 + $0x140] sm:$0xff] }
 0x1e5   :  { %2983 = vmatmul.bf16.gmra.mxu1 %v7769_v39  ;;  %v7702_v39 = vld [vmem:[%s10425_s0 + $0x118] sm:$0xff] }
 0x1e7   :  { %v815_v36 = vpop.f32.mrf.mxu0 }
 0x1e8   :  { %v816_v42 = vadd.f32 %v9047_v41, %v815_v36  ;;  %v7699_v36 = vld [vmem:[%s10425_s0 + $0x100] sm:$0xff] }
 0x1ea   :  { %vm1071_vm15 = vcmp.ge.f32.partialorder %v816_v42, 0.0  ;;  %v1199_v44 = vmul.f32 0.2, %v816_v42  ;;  %v3063_v45 = vpop.f32.mrf.mxu2 }
 0x1eb   :  { %v3064_v52 = vadd.f32 %v3063_v45, %v2975_v43 }
 0x1ec   :  { %v1327_v48 = vsel %vm1071_vm15, %v816_v42, %v1199_v44 }
 0x1ed   :  { %v8180_v16 = vpack.c.bf16 %v1327_v48, %v1326_v46 }
 0x1ef   :  { %8512 = vst [vmem:[#allocation2 + $0x120] sm:$0xff] %v8180_v16   ;;  %v818_v55 = vpop.f32.mrf.mxu0 }
 0x1f0   :  { %v819_v58 = vadd.f32 %v9047_v41, %v818_v55 }
 0x1f2   :  { %6272 = vmatmul.msk.bf16.gmra.mxu0 %vm502_vm1, %v7697_v53  ;;  %v1200_v62 = vmul.f32 0.2, %v819_v58  ;;  %vm1072_vm0 = vcmp.ge.f32.partialorder %v819_v58, 0.0  ;;  %v9067_v13 = vpop.f32.mrf.mxu2 }
 0x1f4   :  { %v1328_v3 = vsel %vm1072_vm0, %v819_v58, %v1200_v62  ;;  %v2979_v18 = vpop.f32.mrf.mxu1  ;;  %v7700_v62 = vld [vmem:[%s10425_s0 + $0x108] sm:$0xff] }
 0x1f5   :  { %v2980_v24 = vadd.f32 %v8931_v47, %v2979_v18 }
 0x1f7   :  { %v820_v59 = vpop.f32.mrf.mxu0 }
 0x1f8   :  { %v821_v63 = vadd.f32 %v9047_v41, %v820_v59 }
 0x1fa   :  { %vm1073_vm2 = vcmp.ge.f32.partialorder %v821_v63, 0.0  ;;  %v1201_v1 = vmul.f32 0.2, %v821_v63  ;;  %v3152_v2 = vpop.f32.mrf.mxu3 }
 0x1fb   :  { %v9059_v0 = vadd.f32 %v3152_v2, %v3064_v52 }
 0x1fc   :  { %v1329_v5 = vsel %vm1073_vm2, %v821_v63, %v1201_v1 }
 0x1fd   :  { %v8185_v6 = vpack.c.bf16 %v1329_v5, %v1328_v3 }
 0x1ff   :  { %8513 = vst [vmem:[#allocation2 + $0x128] sm:$0xff] %v8185_v6   ;;  %v823_v11 = vpop.f32.mrf.mxu0 }
 0x200   :  { %v824_v15 = vadd.f32 %v9047_v41, %v823_v11 }
 0x202   :  { %6273 = vmatmul.msk.bf16.gmra.mxu0 %vm502_vm1, %v7698_v7  ;;  %v1202_v22 = vmul.f32 0.2, %v824_v15  ;;  %vm1074_vm3 = vcmp.ge.f32.partialorder %v824_v15, 0.0  ;;  %v9076_v43 = vpop.f32.mrf.mxu3 }
 0x204   :  { %v1330_v28 = vsel %vm1074_vm3, %v824_v15, %v1202_v22 }
 0x207   :  { %v825_v21 = vpop.f32.mrf.mxu0 }
 0x208   :  { %v826_v23 = vadd.f32 %v9047_v41, %v825_v21  ;;  %v7701_v21 = vld [vmem:[%s10425_s0 + $0x110] sm:$0xff] }
 0x20a   :  { %vm1075_vm4 = vcmp.ge.f32.partialorder %v826_v23, 0.0  ;;  %v1203_v25 = vmul.f32 0.2, %v826_v23  ;;  %v3068_v27 = vpop.f32.mrf.mxu2 }
 0x20b   :  { %v3069_v34 = vadd.f32 %v3068_v27, %v2980_v24 }
 0x20c   :  { %v1331_v32 = vsel %vm1075_vm4, %v826_v23, %v1203_v25 }
 0x20d   :  { %v8190_v35 = vpack.c.bf16 %v1331_v32, %v1330_v28 }
 0x20f   :  { %8514 = vst [vmem:[#allocation2 + $0x130] sm:$0xff] %v8190_v35   ;;  %v828_v42 = vpop.f32.mrf.mxu0 }
 0x210   :  { %v829_v44 = vadd.f32 %v9047_v41, %v828_v42 }
 0x212   :  { %6274 = vmatmul.msk.bf16.gmra.mxu0 %vm502_vm1, %v7699_v36  ;;  %v1204_v46 = vmul.f32 0.2, %v829_v44  ;;  %vm1076_vm5 = vcmp.ge.f32.partialorder %v829_v44, 0.0 }
 0x214   :  { %v1332_v53 = vsel %vm1076_vm5, %v829_v44, %v1204_v46 }
 0x217   :  { %v830_v45 = vpop.f32.mrf.mxu0 }
 0x218   :  { %v831_v48 = vadd.f32 %v9047_v41, %v830_v45 }
 0x21a   :  { %vm1077_vm6 = vcmp.ge.f32.partialorder %v831_v48, 0.0  ;;  %v1205_v52 = vmul.f32 0.2, %v831_v48  ;;  %v3157_v16 = vpop.f32.mrf.mxu3 }
 0x21b   :  { %v9080_v58 = vadd.f32 %v3157_v16, %v3069_v34 }
 0x21c   :  { %v1333_v55 = vsel %vm1077_vm6, %v831_v48, %v1205_v52 }
 0x21d   :  { %v8195_v59 = vpack.c.bf16 %v1333_v55, %v1332_v53 }
 0x21f   :  { %8515 = vst [vmem:[#allocation2 + $0x148] sm:$0xff] %v8195_v59   ;;  %v833_v63 = vpop.f32.mrf.mxu0 }
 0x220   :  { %v834_v1 = vadd.f32 %v9047_v41, %v833_v63 }
 0x222   :  { %6275 = vmatmul.msk.bf16.gmra.mxu0 %vm502_vm1, %v7700_v62  ;;  %v1206_v5 = vmul.f32 0.2, %v834_v1  ;;  %vm1078_vm7 = vcmp.ge.f32.partialorder %v834_v1, 0.0  ;;  %v7703_v62 = vld [vmem:[%s10425_s0 + $0x120] sm:$0xff] }
 0x224   :  { %v1334_v11 = vsel %vm1078_vm7, %v834_v1, %v1206_v5 }
 0x226   :  { %v7770_v2 = vld [vmem:[#allocation2 + $0x148] sm:$0xff] }
 0x227   :  { %v835_v3 = vpop.f32.mrf.mxu0  ;;  %3072 = vmatmul.bf16.gmra.mxu2 %v7770_v2 }
 0x228   :  { %v836_v6 = vadd.f32 %v9047_v41, %v835_v3 }
 0x22a   :  { %vm1079_vm8 = vcmp.ge.f32.partialorder %v836_v6, 0.0  ;;  %v1207_v7 = vmul.f32 0.2, %v836_v6 }
 0x22c   :  { %v1335_v15 = vsel %vm1079_vm8, %v836_v6, %v1207_v7 }
 0x22d   :  { %v8200_v18 = vpack.c.bf16 %v1335_v15, %v1334_v11 }
 0x22f   :  { %8516 = vst [vmem:[#allocation2 + $0x150] sm:$0xff] %v8200_v18   ;;  %v838_v22 = vpop.f32.mrf.mxu0 }
 0x230   :  { %v839_v23 = vadd.f32 %v9047_v41, %v838_v22 }
 0x232   :  { %6276 = vmatmul.msk.bf16.gmra.mxu0 %vm502_vm1, %v7701_v21  ;;  %v1208_v27 = vmul.f32 0.2, %v839_v23  ;;  %vm1080_vm9 = vcmp.ge.f32.partialorder %v839_v23, 0.0  ;;  %v7704_v21 = vld [vmem:[%s10425_s0 + $0x128] sm:$0xff] }
 0x234   :  { %v1336_v34 = vsel %vm1080_vm9, %v839_v23, %v1208_v27 }
 0x236   :  { %v7771_v24 = vld [vmem:[#allocation2 + $0x150] sm:$0xff] }
 0x237   :  { %v840_v25 = vpop.f32.mrf.mxu0  ;;  %2988 = vmatmul.bf16.gmra.mxu1 %v7771_v24  ;;  %3161 = vmatmul.bf16.gmra.mxu3 %v7771_v24 }
 0x238   :  { %v841_v28 = vadd.f32 %v9047_v41, %v840_v25 }
 0x23a   :  { %vm1081_vm10 = vcmp.ge.f32.partialorder %v841_v28, 0.0  ;;  %v1209_v32 = vmul.f32 0.2, %v841_v28 }
 0x23c   :  { %v1337_v35 = vsel %vm1081_vm10, %v841_v28, %v1209_v32 }
 0x23d   :  { %v8205_v36 = vpack.c.bf16 %v1337_v35, %v1336_v34 }
 0x23f   :  { %8517 = vst [vmem:[#allocation2 + $0x158] sm:$0xff] %v8205_v36   ;;  %v843_v42 = vpop.f32.mrf.mxu0 }
 0x240   :  { %v844_v44 = vadd.f32 %v9047_v41, %v843_v42 }
 0x242   :  { %6277 = vmatmul.msk.bf16.gmra.mxu0 %vm502_vm1, %v7702_v39  ;;  %v1210_v48 = vmul.f32 0.2, %v844_v44  ;;  %vm1082_vm11 = vcmp.ge.f32.partialorder %v844_v44, 0.0  ;;  %v7705_v39 = vld [vmem:[%s10425_s0 + $0x130] sm:$0xff] }
 0x244   :  { %v1338_v53 = vsel %vm1082_vm11, %v844_v44, %v1210_v48 }
 0x246   :  { %v7772_v45 = vld [vmem:[#allocation2 + $0x158] sm:$0xff] }
 0x247   :  { %v845_v46 = vpop.f32.mrf.mxu0  ;;  %3077 = vmatmul.bf16.gmra.mxu2 %v7772_v45 }
 0x248   :  { %v846_v52 = vadd.f32 %v9047_v41, %v845_v46 }
 0x24a   :  { %vm1083_vm12 = vcmp.ge.f32.partialorder %v846_v52, 0.0  ;;  %v1211_v16 = vmul.f32 0.2, %v846_v52 }
 0x24c   :  { %v1339_v55 = vsel %vm1083_vm12, %v846_v52, %v1211_v16 }
 0x24d   :  { %v8210_v59 = vpack.c.bf16 %v1339_v55, %v1338_v53 }
 0x24f   :  { %8518 = vst [vmem:[#allocation2 + $0x160] sm:$0xff] %v8210_v59   ;;  %v848_v63 = vpop.f32.mrf.mxu0 }
 0x250   :  { %v849_v1 = vadd.f32 %v9047_v41, %v848_v63 }
 0x252   :  { %6278 = vmatmul.msk.bf16.gmra.mxu0 %vm502_vm1, %v7703_v62  ;;  %v1212_v5 = vmul.f32 0.2, %v849_v1  ;;  %vm1084_vm13 = vcmp.ge.f32.partialorder %v849_v1, 0.0  ;;  %v7706_v62 = vld [vmem:[%s10425_s0 + $0x138] sm:$0xff] }
 0x254   :  { %v1340_v11 = vsel %vm1084_vm13, %v849_v1, %v1212_v5 }
 0x256   :  { %v7773_v2 = vld [vmem:[#allocation2 + $0x160] sm:$0xff] }
 0x257   :  { %v850_v3 = vpop.f32.mrf.mxu0  ;;  %2993 = vmatmul.bf16.gmra.mxu1 %v7773_v2  ;;  %3166 = vmatmul.bf16.gmra.mxu3 %v7773_v2 }
 0x258   :  { %v851_v6 = vadd.f32 %v9047_v41, %v850_v3 }
 0x25a   :  { %vm1085_vm14 = vcmp.ge.f32.partialorder %v851_v6, 0.0  ;;  %v1213_v7 = vmul.f32 0.2, %v851_v6 }
 0x25c   :  { %v1341_v15 = vsel %vm1085_vm14, %v851_v6, %v1213_v7 }
 0x25d   :  { %v8215_v18 = vpack.c.bf16 %v1341_v15, %v1340_v11 }
 0x25f   :  { %8519 = vst [vmem:[#allocation2 + $0x168] sm:$0xff] %v8215_v18   ;;  %v853_v22 = vpop.f32.mrf.mxu0 }
 0x260   :  { %v854_v23 = vadd.f32 %v9047_v41, %v853_v22 }
 0x262   :  { %6279 = vmatmul.msk.bf16.gmra.mxu0 %vm502_vm1, %v7704_v21  ;;  %v1214_v27 = vmul.f32 0.2, %v854_v23  ;;  %vm1086_vm15 = vcmp.ge.f32.partialorder %v854_v23, 0.0  ;;  %v7707_v21 = vld [vmem:[%s10425_s0 + $0x140] sm:$0xff] }
 0x264   :  { %v1342_v34 = vsel %vm1086_vm15, %v854_v23, %v1214_v27  ;;  %v7853_v23 = vld [vmem:[%s10426_s2 + $0x138] sm:$0xff] }
 0x265   :  { %3291 = vmatpush.bf16.msrb.mxu2 %v7853_v23  ;;  %v9163_v23 = vpop.f32.mrf.mxu3 }
 0x266   :  { %v7774_v24 = vld [vmem:[#allocation2 + $0x168] sm:$0xff] }
 0x267   :  { %v855_v25 = vpop.f32.mrf.mxu0  ;;  %3082 = vmatmul.bf16.gmra.mxu2 %v7774_v24  ;;  %v7861_v24 = vld [vmem:[%s10426_s2 + $0x178] sm:$0xff] }
 0x268   :  { %v856_v28 = vadd.f32 %v9047_v41, %v855_v25  ;;  %v7845_v25 = vld [vmem:[%s10426_s2 + $0xf8] sm:$0xff]  ;;  %3380 = vmatpush.bf16.msrb.mxu3 %v7861_v24 }
 0x269   :  { %3202 = vmatpush.bf16.msrb.mxu1 %v7845_v25 }
 0x26a   :  { %vm1087_vm0 = vcmp.ge.f32.partialorder %v856_v28, 0.0  ;;  %v1215_v32 = vmul.f32 0.2, %v856_v28 }
 0x26c   :  { %v1343_v35 = vsel %vm1087_vm0, %v856_v28, %v1215_v32 }
 0x26d   :  { %v8220_v36 = vpack.c.bf16 %v1343_v35, %v1342_v34 }
 0x26f   :  { %8520 = vst [vmem:[#allocation2 + $0x170] sm:$0xff] %v8220_v36   ;;  %v858_v42 = vpop.f32.mrf.mxu0 }
 0x270   :  { %v859_v44 = vadd.f32 %v9047_v41, %v858_v42 }
 0x272   :  { %6280 = vmatmul.msk.bf16.gmra.mxu0 %vm502_vm1, %v7705_v39  ;;  %v1216_v48 = vmul.f32 0.2, %v859_v44  ;;  %vm1088_vm2 = vcmp.ge.f32.partialorder %v859_v44, 0.0 }
 0x274   :  { %v1344_v53 = vsel %vm1088_vm2, %v859_v44, %v1216_v48 }
 0x276   :  { %v7775_v45 = vld [vmem:[#allocation2 + $0x170] sm:$0xff] }
 0x277   :  { %v860_v46 = vpop.f32.mrf.mxu0  ;;  %2998 = vmatmul.bf16.gmra.mxu1 %v7775_v45  ;;  %3171 = vmatmul.bf16.gmra.mxu3 %v7775_v45  ;;  %v7708_v45 = vld [vmem:[%s10425_s0 + $0x148] sm:$0xff] }
 0x278   :  { %v861_v52 = vadd.f32 %v9047_v41, %v860_v46  ;;  %v9142_v46 = vpop.f32.mrf.mxu1 }
 0x27a   :  { %vm1089_vm3 = vcmp.ge.f32.partialorder %v861_v52, 0.0  ;;  %v1217_v16 = vmul.f32 0.2, %v861_v52 }
 0x27c   :  { %v1345_v55 = vsel %vm1089_vm3, %v861_v52, %v1217_v16  ;;  %v9145_v52 = vpop.f32.mrf.mxu2 }
 0x27d   :  { %v8225_v59 = vpack.c.bf16 %v1345_v55, %v1344_v53 }
 0x27f   :  { %8521 = vst [vmem:[#allocation2 + $0x178] sm:$0xff] %v8225_v59   ;;  %v863_v63 = vpop.f32.mrf.mxu0 }
 0x280   :  { %v864_v1 = vadd.f32 %v9047_v41, %v863_v63  ;;  %v2984_v53 = vpop.f32.mrf.mxu1 }
 0x282   :  { %6281 = vmatmul.msk.bf16.gmra.mxu0 %vm502_vm1, %v7706_v62  ;;  %v1218_v5 = vmul.f32 0.2, %v864_v1  ;;  %vm1090_vm4 = vcmp.ge.f32.partialorder %v864_v1, 0.0  ;;  %v2985_v62 = vadd.f32 %v8931_v47, %v2984_v53 }
 0x284   :  { %v1346_v11 = vsel %vm1090_vm4, %v864_v1, %v1218_v5 }
 0x286   :  { %v7776_v2 = vld [vmem:[#allocation2 + $0x178] sm:$0xff] }
 0x287   :  { %v865_v3 = vpop.f32.mrf.mxu0  ;;  %3087 = vmatmul.bf16.gmra.mxu2 %v7776_v2 }
 0x288   :  { %v866_v6 = vadd.f32 %v9047_v41, %v865_v3 }
 0x28a   :  { %vm1091_vm5 = vcmp.ge.f32.partialorder %v866_v6, 0.0  ;;  %v1219_v7 = vmul.f32 0.2, %v866_v6 }
 0x28c   :  { %v1347_v15 = vsel %vm1091_vm5, %v866_v6, %v1219_v7 }
 0x28d   :  { %v8230_v18 = vpack.c.bf16 %v1347_v15, %v1346_v11  ;;  %v7709_v11 = vld [vmem:[%s10425_s0 + $0x150] sm:$0xff] }
 0x28f   :  { %8522 = vst [vmem:[#allocation2 + $0x180] sm:$0xff] %v8230_v18   ;;  %v868_v22 = vpop.f32.mrf.mxu0  ;;  %v7852_v18 = vld [vmem:[%s10426_s2 + $0x130] sm:$0xff] }
 0x290   :  { %v869_v27 = vadd.f32 %v9047_v41, %v868_v22  ;;  %v7844_v22 = vld [vmem:[%s10426_s2 + $0xf0] sm:$0xff]  ;;  %3292 = vmatpush.bf16.msrb.mxu2 %v7852_v18 }
 0x291   :  { %3203 = vmatpush.bf16.msrb.mxu1 %v7844_v22  ;;  %v7859_v22 = vld [vmem:[%s10426_s2 + $0x168] sm:$0xff] }
 0x292   :  { %6282 = vmatmul.msk.bf16.gmra.mxu0 %vm502_vm1, %v7707_v21  ;;  %v1220_v34 = vmul.f32 0.2, %v869_v27  ;;  %vm1092_vm6 = vcmp.ge.f32.partialorder %v869_v27, 0.0  ;;  %v7860_v21 = vld [vmem:[%s10426_s2 + $0x170] sm:$0xff] }
 0x293   :  { %3381 = vmatpush.bf16.msrb.mxu3 %v7860_v21  ;;  %v7851_v21 = vld [vmem:[%s10426_s2 + $0x128] sm:$0xff] }
 0x294   :  { %v1348_v39 = vsel %vm1092_vm6, %v869_v27, %v1220_v34  ;;  %3293 = vmatpush.bf16.msrb.mxu2 %v7851_v21 }
 0x296   :  { %v7777_v28 = vld [vmem:[#allocation2 + $0x180] sm:$0xff] }
 0x297   :  { %v870_v32 = vpop.f32.mrf.mxu0  ;;  %3176 = vmatmul.bf16.gmra.mxu3 %v7777_v28 }
 0x298   :  { %v871_v35 = vadd.f32 %v9047_v41, %v870_v32  ;;  %3382 = vmatpush.bf16.msrb.mxu3 %v7859_v22 }
 0x29a   :  { %vm1093_vm7 = vcmp.ge.f32.partialorder %v871_v35, 0.0  ;;  %v1221_v36 = vmul.f32 0.2, %v871_v35 }
 0x29c   :  { %v1349_v42 = vsel %vm1093_vm7, %v871_v35, %v1221_v36 }
 0x29d   :  { %v8235_v44 = vpack.c.bf16 %v1349_v42, %v1348_v39  ;;  %v9169_v42 = vpop.f32.mrf.mxu1 }
 0x29f   :  { %8523 = vst [vmem:[#allocation2 + $0x198] sm:$0xff] %v8235_v44   ;;  %v873_v48 = vpop.f32.mrf.mxu0 }
 0x2a0   :  { %v874_v16 = vadd.f32 %v9047_v41, %v873_v48 }
 0x2a2   :  { %6283 = vmatmul.msk.bf16.gmra.mxu0 %vm502_vm1, %v7708_v45  ;;  %v1222_v59 = vmul.f32 0.2, %v874_v16  ;;  %vm1094_vm8 = vcmp.ge.f32.partialorder %v874_v16, 0.0  ;;  %v7710_v45 = vld [vmem:[%s10425_s0 + $0x158] sm:$0xff] }
 0x2a4   :  { %v1350_v3 = vsel %vm1094_vm8, %v874_v16, %v1222_v59 }
 0x2a7   :  { %v875_v55 = vpop.f32.mrf.mxu0 }
 0x2a8   :  { %v876_v63 = vadd.f32 %v9047_v41, %v875_v55 }
 0x2aa   :  { %vm1095_vm9 = vcmp.ge.f32.partialorder %v876_v63, 0.0  ;;  %v1223_v1 = vmul.f32 0.2, %v876_v63  ;;  %v3073_v2 = vpop.f32.mrf.mxu2 }
 0x2ab   :  { %v3074_v6 = vadd.f32 %v3073_v2, %v2985_v62 }
 0x2ac   :  { %v1351_v5 = vsel %vm1095_vm9, %v876_v63, %v1223_v1 }
 0x2ad   :  { %v8240_v7 = vpack.c.bf16 %v1351_v5, %v1350_v3 }
 0x2af   :  { %8524 = vst [vmem:[#allocation2 + $0x1a0] sm:$0xff] %v8240_v7   ;;  %v878_v15 = vpop.f32.mrf.mxu0 }
 0x2b0   :  { %v879_v24 = vadd.f32 %v9047_v41, %v878_v15  ;;  %v7711_v15 = vld [vmem:[%s10425_s0 + $0x160] sm:$0xff] }
 0x2b2   :  { %6284 = vmatmul.msk.bf16.gmra.mxu0 %vm502_vm1, %v7709_v11  ;;  %v1224_v27 = vmul.f32 0.2, %v879_v24  ;;  %vm1096_vm10 = vcmp.ge.f32.partialorder %v879_v24, 0.0  ;;  %v9175_v16 = vpop.f32.mrf.mxu2 }
 0x2b4   :  { %v1352_v35 = vsel %vm1096_vm10, %v879_v24, %v1224_v27  ;;  %v2989_v55 = vpop.f32.mrf.mxu1  ;;  %v7843_v24 = vld [vmem:[%s10426_s2 + $0xe8] sm:$0xff] }
 0x2b5   :  { %v2990_v1 = vadd.f32 %v8931_v47, %v2989_v55  ;;  %3204 = vmatpush.bf16.msrb.mxu1 %v7843_v24  ;;  %v7712_v55 = vld [vmem:[%s10425_s0 + $0x168] sm:$0xff] }
 0x2b7   :  { %v880_v25 = vpop.f32.mrf.mxu0 }
 0x2b8   :  { %v881_v28 = vadd.f32 %v9047_v41, %v880_v25 }
 0x2ba   :  { %vm1097_vm11 = vcmp.ge.f32.partialorder %v881_v28, 0.0  ;;  %v1225_v32 = vmul.f32 0.2, %v881_v28  ;;  %v3162_v34 = vpop.f32.mrf.mxu3 }
 0x2bb   :  { %v9167_v39 = vadd.f32 %v3162_v34, %v3074_v6 }
 0x2bc   :  { %v1353_v36 = vsel %vm1097_vm11, %v881_v28, %v1225_v32 }
 0x2bd   :  { %v8245_v44 = vpack.c.bf16 %v1353_v36, %v1352_v35 }
 0x2bf   :  { %8525 = vst [vmem:[#allocation2 + $0x1a8] sm:$0xff] %v8245_v44   ;;  %v883_v48 = vpop.f32.mrf.mxu0 }
 0x2c0   :  { %v884_v53 = vadd.f32 %v9047_v41, %v883_v48 }
 0x2c2   :  { %6285 = vmatmul.msk.bf16.gmra.mxu0 %vm502_vm1, %v7710_v45  ;;  %v1226_v62 = vmul.f32 0.2, %v884_v53  ;;  %vm1098_vm12 = vcmp.ge.f32.partialorder %v884_v53, 0.0  ;;  %v9193_v25 = vpop.f32.mrf.mxu3 }
 0x2c4   :  { %v1354_v5 = vsel %vm1098_vm12, %v884_v53, %v1226_v62 }
 0x2c7   :  { %v885_v59 = vpop.f32.mrf.mxu0 }
 0x2c8   :  { %v886_v63 = vadd.f32 %v9047_v41, %v885_v59  ;;  %v9202_v59 = vpop.f32.mrf.mxu1 }
 0x2ca   :  { %vm1099_vm13 = vcmp.ge.f32.partialorder %v886_v63, 0.0  ;;  %v1227_v2 = vmul.f32 0.2, %v886_v63  ;;  %v3078_v3 = vpop.f32.mrf.mxu2 }
 0x2cb   :  { %v3079_v7 = vadd.f32 %v3078_v3, %v2990_v1 }
 0x2cc   :  { %v1355_v6 = vsel %vm1099_vm13, %v886_v63, %v1227_v2  ;;  %v8047_v63 = vld [vmem:[%s10427_s4 + $0x1b8] sm:$0xff] }
 0x2cd   :  { %v8250_v11 = vpack.c.bf16 %v1355_v6, %v1354_v5  ;;  %5801 = vmatpush.bf16.msrb.mxu0 %v8047_v63 }
 0x2cf   :  { %8526 = vst [vmem:[#allocation2 + $0x1b0] sm:$0xff] %v8250_v11   ;;  %v888_v18 = vpop.f32.mrf.mxu0 }
 0x2d0   :  { %v889_v27 = vadd.f32 %v9047_v41, %v888_v18 }
 0x2d2   :  { %6286 = vmatmul.msk.bf16.gmra.mxu0 %vm502_vm1, %v7711_v15  ;;  %v1228_v32 = vmul.f32 0.2, %v889_v27  ;;  %vm1100_vm14 = vcmp.ge.f32.partialorder %v889_v27, 0.0  ;;  %v9208_v1 = vpop.f32.mrf.mxu2 }
 0x2d4   :  { %v1356_v44 = vsel %vm1100_vm14, %v889_v27, %v1228_v32  ;;  %v2994_v3 = vpop.f32.mrf.mxu1 }
 0x2d5   :  { %v2995_v11 = vadd.f32 %v8931_v47, %v2994_v3  ;;  %v7858_v47 = vld [vmem:[%s10426_s2 + $0x160] sm:$0xff] }
 0x2d6   :  { %3383 = vmatpush.bf16.msrb.mxu3 %v7858_v47 }
 0x2d7   :  { %v890_v28 = vpop.f32.mrf.mxu0 }
 0x2d8   :  { %v891_v34 = vadd.f32 %v9047_v41, %v890_v28  ;;  %v7713_v28 = vld [vmem:[%s10425_s0 + $0x170] sm:$0xff] }
 0x2da   :  { %vm1101_vm15 = vcmp.ge.f32.partialorder %v891_v34, 0.0  ;;  %v1229_v35 = vmul.f32 0.2, %v891_v34  ;;  %v3167_v36 = vpop.f32.mrf.mxu3 }
 0x2db   :  { %v9197_v48 = vadd.f32 %v3167_v36, %v3079_v7 }
 0x2dc   :  { %v1357_v45 = vsel %vm1101_vm15, %v891_v34, %v1229_v35  ;;  %v7850_v34 = vld [vmem:[%s10426_s2 + $0x120] sm:$0xff] }
 0x2dd   :  { %v8255_v53 = vpack.c.bf16 %v1357_v45, %v1356_v44  ;;  %v7842_v35 = vld [vmem:[%s10426_s2 + $0xe0] sm:$0xff]  ;;  %3294 = vmatpush.bf16.msrb.mxu2 %v7850_v34 }
 0x2de   :  { %3205 = vmatpush.bf16.msrb.mxu1 %v7842_v35 }
 0x2df   :  { %8527 = vst [vmem:[#allocation2 + $0x1b8] sm:$0xff] %v8255_v53   ;;  %v893_v62 = vpop.f32.mrf.mxu0 }
 0x2e0   :  { %v894_v2 = vadd.f32 %v9047_v41, %v893_v62 }
 0x2e2   :  { %6287 = vmatmul.msk.bf16.gmra.mxu0 %vm502_vm1, %v7712_v55  ;;  %v1230_v6 = vmul.f32 0.2, %v894_v2  ;;  %vm1102_vm0 = vcmp.ge.f32.partialorder %v894_v2, 0.0  ;;  %v9226_v36 = vpop.f32.mrf.mxu3 }
 0x2e3   :  { %10432 = vst [vmem:[#allocation5_spill] sm:$0xff] %v9226_v36 }
 0x2e4   :  { %v1358_v21 = vsel %vm1102_vm0, %v894_v2, %v1230_v6 }
 0x2e7   :  { %v895_v5 = vpop.f32.mrf.mxu0 }
 0x2e8   :  { %v896_v7 = vadd.f32 %v9047_v41, %v895_v5 }
 0x2ea   :  { %vm1103_vm2 = vcmp.ge.f32.partialorder %v896_v7, 0.0  ;;  %v1231_v15 = vmul.f32 0.2, %v896_v7  ;;  %v3083_v18 = vpop.f32.mrf.mxu2 }
 0x2eb   :  { %v3084_v24 = vadd.f32 %v3083_v18, %v2995_v11  ;;  %v9235_v11 = vpop.f32.mrf.mxu1 }
 0x2ec   :  { %v1359_v22 = vsel %vm1103_vm2, %v896_v7, %v1231_v15  ;;  %v7714_v7 = vld [vmem:[%s10425_s0 + $0x178] sm:$0xff]  ;;  %10433 = vst [vmem:[#allocation6_spill] sm:$0xff] %v9235_v11 }
 0x2ed   :  { %v8260_v27 = vpack.c.bf16 %v1359_v22, %v1358_v21 }
 0x2ef   :  { %8528 = vst [vmem:[#allocation2 + $0x1c0] sm:$0xff] %v8260_v27   ;;  %v898_v32 = vpop.f32.mrf.mxu0 }
 0x2f0   :  { %v899_v44 = vadd.f32 %v9047_v41, %v898_v32  ;;  %v9245_v32 = vld [vmem:[%s10424_s5 + $0x2] ss:$0 sm:$0xff] }
 0x2f2   :  { %6288 = vmatmul.msk.bf16.gmra.mxu0 %vm502_vm1, %v7713_v28  ;;  %v1232_v53 = vmul.f32 0.2, %v899_v44  ;;  %vm1104_vm3 = vcmp.ge.f32.partialorder %v899_v44, 0.0  ;;  %v9238_v18 = vpop.f32.mrf.mxu2 }
 0x2f3   :  { %10434 = vst [vmem:[#allocation7_spill] sm:$0xff] %v9238_v18 }
 0x2f4   :  { %v1360_v2 = vsel %vm1104_vm3, %v899_v44, %v1232_v53  ;;  %v2999_v22 = vpop.f32.mrf.mxu1 }
 0x2f5   :  { %v3000_v34 = vadd.f32 %v9245_v32, %v2999_v22 }
 0x2f7   :  { %v900_v45 = vpop.f32.mrf.mxu0 }
 0x2f8   :  { %v901_v55 = vadd.f32 %v9047_v41, %v900_v45 }
 0x2fa   :  { %vm1105_vm4 = vcmp.ge.f32.partialorder %v901_v55, 0.0  ;;  %v1233_v62 = vmul.f32 0.2, %v901_v55  ;;  %v3172_v63 = vpop.f32.mrf.mxu3 }
 0x2fb   :  { %v9230_v5 = vadd.f32 %v3172_v63, %v3084_v24 }
 0x2fc   :  { %v1361_v3 = vsel %vm1105_vm4, %v901_v55, %v1233_v62  ;;  %v7787_v62 = vld [vmem:[#allocation2 + $0x1e0] sm:$0xff] }
 0x2fd   :  { %v8265_v6 = vpack.c.bf16 %v1361_v3, %v1360_v2  ;;  %v7849_v2 = vld [vmem:[%s10426_s2 + $0x118] sm:$0xff]  ;;  %3003 = vmatmul.bf16.gmra.mxu1 %v7787_v62 }
 0x2fe   :  { %v7857_v3 = vld [vmem:[%s10426_s2 + $0x158] sm:$0xff]  ;;  %3295 = vmatpush.bf16.msrb.mxu2 %v7849_v2 }
 0x2ff   :  { %8529 = vst [vmem:[#allocation2 + $0x1c8] sm:$0xff] %v8265_v6   ;;  %v903_v15 = vpop.f32.mrf.mxu0  ;;  %v7841_v6 = vld [vmem:[%s10426_s2 + $0xd8] sm:$0xff]  ;;  %3384 = vmatpush.bf16.msrb.mxu3 %v7857_v3 }
 0x300   :  { %v904_v21 = vadd.f32 %v9047_v41, %v903_v15  ;;  %3206 = vmatpush.bf16.msrb.mxu1 %v7841_v6 }
 0x302   :  { %6289 = vmatmul.msk.bf16.gmra.mxu0 %vm502_vm1, %v7714_v7  ;;  %v1234_v28 = vmul.f32 0.2, %v904_v21  ;;  %vm1106_vm5 = vcmp.ge.f32.partialorder %v904_v21, 0.0  ;;  %v9257_v7 = vpop.f32.mrf.mxu3 }
 0x303   :  { %10435 = vst [vmem:[#allocation8_spill] sm:$0xff] %v9257_v7 }
 0x304   :  { %v1362_v44 = vsel %vm1106_vm5, %v904_v21, %v1234_v28 }
 0x307   :  { %v905_v27 = vpop.f32.mrf.mxu0 }
 0x308   :  { %v906_v24 = vadd.f32 %v9047_v41, %v905_v27 }
 0x30a   :  { %vm1107_vm6 = vcmp.ge.f32.partialorder %v906_v24, 0.0  ;;  %v1235_v47 = vmul.f32 0.2, %v906_v24  ;;  %v3088_v35 = vpop.f32.mrf.mxu2 }
 0x30b   :  { %v3089_v53 = vadd.f32 %v3088_v35, %v3000_v34 }
 0x30c   :  { %v1363_v45 = vsel %vm1107_vm6, %v906_v24, %v1235_v47 }
 0x30d   :  { %v8270_v55 = vpack.c.bf16 %v1363_v45, %v1362_v44 }
 0x30f   :  { %8530 = vst [vmem:[#allocation2 + $0x1d0] sm:$0xff] %v8270_v55   ;;  %v908_v63 = vpop.f32.mrf.mxu0 }
 0x310   :  { %v909_v15 = vadd.f32 %v9047_v41, %v908_v63 }
 0x312   :  { %v1236_v22 = vmul.f32 0.2, %v909_v15  ;;  %vm1108_vm7 = vcmp.ge.f32.partialorder %v909_v15, 0.0 }
 0x314   :  { %v1364_v34 = vsel %vm1108_vm7, %v909_v15, %v1236_v22  ;;  %v7848_v22 = vld [vmem:[%s10426_s2 + $0x110] sm:$0xff] }
 0x315   :  { %3296 = vmatpush.bf16.msrb.mxu2 %v7848_v22 }
 0x317   :  { %v910_v21 = vpop.f32.mrf.mxu0 }
 0x318   :  { %v911_v27 = vadd.f32 %v9047_v41, %v910_v21 }
 0x31a   :  { %vm1109_vm8 = vcmp.ge.f32.partialorder %v911_v27, 0.0  ;;  %v1237_v28 = vmul.f32 0.2, %v911_v27  ;;  %v3177_v24 = vpop.f32.mrf.mxu3 }
 0x31b   :  { %v9261_v35 = vadd.f32 %v3177_v24, %v3089_v53 }
 0x31c   :  { %v1365_v47 = vsel %vm1109_vm8, %v911_v27, %v1237_v28  ;;  %v7856_v27 = vld [vmem:[%s10426_s2 + $0x150] sm:$0xff] }
 0x31d   :  { %10436 = vst [vmem:[#allocation9_spill] sm:$0xff] %v9261_v35  ;;  %v8275_v44 = vpack.c.bf16 %v1365_v47, %v1364_v34  ;;  %v7840_v28 = vld [vmem:[%s10426_s2 + $0xd0] sm:$0xff]  ;;  %3385 = vmatpush.bf16.msrb.mxu3 %v7856_v27 }
 0x31e   :  { %3207 = vmatpush.bf16.msrb.mxu1 %v7840_v28 }
 0x31f   :  { %8531 = vst [vmem:[#allocation2 + $0x1e8] sm:$0xff] %v8275_v44   ;;  %v913_v45 = vpop.f32.mrf.mxu0 }
 0x320   :  { %v914_v55 = vadd.f32 %v9047_v41, %v913_v45 }
 0x322   :  { %v1238_v63 = vmul.f32 0.2, %v914_v55  ;;  %vm1110_vm9 = vcmp.ge.f32.partialorder %v914_v55, 0.0 }
 0x324   :  { %v1366_v21 = vsel %vm1110_vm9, %v914_v55, %v1238_v63 }
 0x326   :  { %v7788_v62 = vld [vmem:[#allocation2 + $0x1e8] sm:$0xff] }
 0x327   :  { %v915_v2 = vpop.f32.mrf.mxu0  ;;  %3092 = vmatmul.bf16.gmra.mxu2 %v7788_v62 }
 0x328   :  { %v916_v3 = vadd.f32 %v9047_v41, %v915_v2 }
 0x32a   :  { %vm1111_vm10 = vcmp.ge.f32.partialorder %v916_v3, 0.0  ;;  %v1239_v6 = vmul.f32 0.2, %v916_v3 }
 0x32c   :  { %v1367_v7 = vsel %vm1111_vm10, %v916_v3, %v1239_v6 }
 0x32d   :  { %v8280_v15 = vpack.c.bf16 %v1367_v7, %v1366_v21 }
 0x32f   :  { %8532 = vst [vmem:[#allocation2 + $0x1f0] sm:$0xff] %v8280_v15   ;;  %v918_v53 = vpop.f32.mrf.mxu0 }
 0x330   :  { %v919_v24 = vadd.f32 %v9047_v41, %v918_v53 }
 0x332   :  { %v1240_v47 = vmul.f32 0.2, %v919_v24  ;;  %vm1112_vm11 = vcmp.ge.f32.partialorder %v919_v24, 0.0 }
 0x334   :  { %v1368_v55 = vsel %vm1112_vm11, %v919_v24, %v1240_v47  ;;  %v7855_v47 = vld [vmem:[%s10426_s2 + $0x148] sm:$0xff] }
 0x335   :  { %3386 = vmatpush.bf16.msrb.mxu3 %v7855_v47 }
 0x336   :  { %v7789_v7 = vld [vmem:[#allocation2 + $0x1f0] sm:$0xff] }
 0x337   :  { %v920_v34 = vpop.f32.mrf.mxu0  ;;  %3008 = vmatmul.bf16.gmra.mxu1 %v7789_v7  ;;  %3181 = vmatmul.bf16.gmra.mxu3 %v7789_v7 }
 0x338   :  { %v921_v44 = vadd.f32 %v9047_v41, %v920_v34  ;;  %v7847_v34 = vld [vmem:[%s10426_s2 + $0x108] sm:$0xff] }
 0x339   :  { %3297 = vmatpush.bf16.msrb.mxu2 %v7847_v34 }
 0x33a   :  { %vm1113_vm12 = vcmp.ge.f32.partialorder %v921_v44, 0.0  ;;  %v1241_v45 = vmul.f32 0.2, %v921_v44 }
 0x33c   :  { %v1369_v62 = vsel %vm1113_vm12, %v921_v44, %v1241_v45  ;;  %v7839_v44 = vld [vmem:[%s10426_s2 + $0xc8] sm:$0xff] }
 0x33d   :  { %v8285_v2 = vpack.c.bf16 %v1369_v62, %v1368_v55  ;;  %3208 = vmatpush.bf16.msrb.mxu1 %v7839_v44 }
 0x33f   :  { %8533 = vst [vmem:[#allocation2 + $0x1f8] sm:$0xff] %v8285_v2   ;;  %v923_v63 = vpop.f32.mrf.mxu0 }
 0x340   :  { %v924_v3 = vadd.f32 %v9047_v41, %v923_v63 }
 0x342   :  { %v1242_v15 = vmul.f32 0.2, %v924_v3  ;;  %vm1114_vm13 = vcmp.ge.f32.partialorder %v924_v3, 0.0 }
 0x344   :  { %v1370_v27 = vsel %vm1114_vm13, %v924_v3, %v1242_v15 }
 0x346   :  { %v7790_v6 = vld [vmem:[#allocation2 + $0x1f8] sm:$0xff] }
 0x347   :  { %v925_v21 = vpop.f32.mrf.mxu0  ;;  %3097 = vmatmul.bf16.gmra.mxu2 %v7790_v6 }
 0x348   :  { %v926_v53 = vadd.f32 %v9047_v41, %v925_v21 }
 0x34a   :  { %vm1115_vm14 = vcmp.ge.f32.partialorder %v926_v53, 0.0  ;;  %v1243_v22 = vmul.f32 0.2, %v926_v53 }
 0x34c   :  { %v1371_v28 = vsel %vm1115_vm14, %v926_v53, %v1243_v22  ;;  %v8046_v22 = vld [vmem:[%s10427_s4 + $0x1b0] sm:$0xff] }
 0x34d   :  { %v8290_v7 = vpack.c.bf16 %v1371_v28, %v1370_v27  ;;  %5802 = vmatpush.bf16.msrb.mxu0 %v8046_v22  ;;  %v7838_v28 = vld [vmem:[%s10426_s2 + $0xc0] sm:$0xff] }
 0x34e   :  { %3209 = vmatpush.bf16.msrb.mxu1 %v7838_v28  ;;  %v7877_v28 = vld [vmem:[%s10426_s2 + $0x1f8] sm:$0xff] }
 0x34f   :  { %8534 = vst [vmem:[#allocation2 + $0x200] sm:$0xff] %v8290_v7   ;;  %v928_v24 = vpop.f32.mrf.mxu0 }
 0x350   :  { %v929_v45 = vadd.f32 %v9047_v41, %v928_v24 }
 0x352   :  { %v1244_v2 = vmul.f32 0.2, %v929_v45  ;;  %vm1116_vm15 = vcmp.ge.f32.partialorder %v929_v45, 0.0 }
 0x354   :  { %v1372_v6 = vsel %vm1116_vm15, %v929_v45, %v1244_v2  ;;  %v7715_v2 = vld [vmem:[%s10425_s0 + $0x180] sm:$0xff] }
 0x355   :  { %6290 = vmatmul.msk.bf16.gmra.mxu0 %vm502_vm1, %v7715_v2 }
 0x356   :  { %v7791_v55 = vld [vmem:[#allocation2 + $0x200] sm:$0xff] }
 0x357   :  { %v930_v62 = vpop.f32.mrf.mxu0  ;;  %3013 = vmatmul.bf16.gmra.mxu1 %v7791_v55  ;;  %3186 = vmatmul.bf16.gmra.mxu3 %v7791_v55 }
 0x358   :  { %v931_v63 = vadd.f32 %v9047_v41, %v930_v62 }
 0x35a   :  { %vm1117_vm0 = vcmp.ge.f32.partialorder %v931_v63, 0.0  ;;  %v1245_v3 = vmul.f32 0.2, %v931_v63 }
 0x35c   :  { %v1373_v21 = vsel %vm1117_vm0, %v931_v63, %v1245_v3  ;;  %v7846_v3 = vld [vmem:[%s10426_s2 + $0x100] sm:$0xff] }
 0x35d   :  { %v8295_v15 = vpack.c.bf16 %v1373_v21, %v1372_v6  ;;  %v7854_v6 = vld [vmem:[%s10426_s2 + $0x140] sm:$0xff]  ;;  %3298 = vmatpush.bf16.msrb.mxu2 %v7846_v3 }
 0x35e   :  { %3387 = vmatpush.bf16.msrb.mxu3 %v7854_v6 }
 0x35f   :  { %8535 = vst [vmem:[#allocation2 + $0x208] sm:$0xff] %v8295_v15   ;;  %v933_v53 = vpop.f32.mrf.mxu0 }
 0x360   :  { %v934_v27 = vadd.f32 %v9047_v41, %v933_v53 }
 0x361   :  { %3558 = vmatpush.bf16.msra.mxu2 %v7877_v28 }
 0x362   :  { %v1246_v34 = vmul.f32 0.2, %v934_v27  ;;  %vm1118_vm2 = vcmp.ge.f32.partialorder %v934_v27, 0.0 }
 0x364   :  { %v1374_v45 = vsel %vm1118_vm2, %v934_v27, %v1246_v34 }
 0x366   :  { %v7792_v7 = vld [vmem:[#allocation2 + $0x208] sm:$0xff] }
 0x367   :  { %v935_v24 = vpop.f32.mrf.mxu0  ;;  %3102 = vmatmul.bf16.gmra.mxu2 %v7792_v7 }
 0x368   :  { %v936_v47 = vadd.f32 %v9047_v41, %v935_v24 }
 0x36a   :  { %vm1119_vm3 = vcmp.ge.f32.partialorder %v936_v47, 0.0  ;;  %v1247_v44 = vmul.f32 0.2, %v936_v47 }
 0x36c   :  { %v1375_v55 = vsel %vm1119_vm3, %v936_v47, %v1247_v44  ;;  %v7716_v47 = vld [vmem:[%s10425_s0 + $0x188] sm:$0xff] }
 0x36d   :  { %v8300_v62 = vpack.c.bf16 %v1375_v55, %v1374_v45  ;;  %6291 = vmatmul.msk.bf16.gmra.mxu0 %vm502_vm1, %v7716_v47  ;;  %v7718_v47 = vld [vmem:[%s10425_s0 + $0x198] sm:$0xff] }
 0x36f   :  { %8536 = vst [vmem:[#allocation2 + $0x210] sm:$0xff] %v8300_v62   ;;  %v938_v63 = vpop.f32.mrf.mxu0  ;;  %v7742_v62 = vld [vmem:[#allocation2 + $0x50] sm:$0xff] }
 0x370   :  { %v939_v21 = vadd.f32 %v9047_v41, %v938_v63 }
 0x372   :  { %v1248_v22 = vmul.f32 0.2, %v939_v21  ;;  %vm1120_vm4 = vcmp.ge.f32.partialorder %v939_v21, 0.0 }
 0x374   :  { %v1376_v24 = vsel %vm1120_vm4, %v939_v21, %v1248_v22  ;;  %v7885_v21 = vld [vmem:[%s10426_s2 + $0x238] sm:$0xff] }
 0x375   :  { %3647 = vmatpush.bf16.msra.mxu3 %v7885_v21  ;;  %v7868_v21 = vld [vmem:[%s10426_s2 + $0x1b0] sm:$0xff] }
 0x376   :  { %v7793_v15 = vld [vmem:[#allocation2 + $0x210] sm:$0xff] }
 0x377   :  { %v940_v53 = vpop.f32.mrf.mxu0  ;;  %3018 = vmatmul.bf16.gmra.mxu1 %v7793_v15  ;;  %3191 = vmatmul.bf16.gmra.mxu3 %v7793_v15  ;;  %v7869_v15 = vld [vmem:[%s10426_s2 + $0x1b8] sm:$0xff] }
 0x378   :  { %v941_v27 = vadd.f32 %v9047_v41, %v940_v53  ;;  %3469 = vmatpush.bf16.msra.mxu1 %v7869_v15 }
 0x37a   :  { %vm1121_vm5 = vcmp.ge.f32.partialorder %v941_v27, 0.0  ;;  %v1249_v7 = vmul.f32 0.2, %v941_v27 }
 0x37c   :  { %v1377_v34 = vsel %vm1121_vm5, %v941_v27, %v1249_v7  ;;  %3470 = vmatpush.bf16.msra.mxu1 %v7868_v21  ;;  %v7867_v21 = vld [vmem:[%s10426_s2 + $0x1a8] sm:$0xff] }
 0x37d   :  { %v8305_v44 = vpack.c.bf16 %v1377_v34, %v1376_v24  ;;  %v7744_v24 = vld [vmem:[#allocation2 + $0x60] sm:$0xff]  ;;  %v7743_v34 = vld [vmem:[#allocation2 + $0x58] sm:$0xff] }
 0x37f   :  { %8537 = vst [vmem:[#allocation2 + $0x218] sm:$0xff] %v8305_v44   ;;  %v943_v45 = vpop.f32.mrf.mxu0  ;;  %v9331_v44 = vpop.f32.mrf.mxu1 }
 0x380   :  { %v944_v55 = vadd.f32 %v9047_v41, %v943_v45  ;;  %10437 = vst [vmem:[#allocation10_spill] sm:$0xff] %v9331_v44  ;;  %v9334_v45 = vpop.f32.mrf.mxu2  ;;  %3471 = vmatpush.bf16.msra.mxu1 %v7867_v21  ;;  %v7722_v21 = vld [vmem:[%s10425_s0 + $0x1b8] sm:$0xff] }
 0x381   :  { %10438 = vst [vmem:[#allocation11_spill] sm:$0xff] %v9334_v45 }
 0x382   :  { %v1250_v3 = vmul.f32 0.2, %v944_v55  ;;  %vm1122_vm6 = vcmp.ge.f32.partialorder %v944_v55, 0.0 }
 0x384   :  { %v1378_v22 = vsel %vm1122_vm6, %v944_v55, %v1250_v3  ;;  %v7876_v55 = vld [vmem:[%s10426_s2 + $0x1f0] sm:$0xff] }
 0x385   :  { %3559 = vmatpush.bf16.msra.mxu2 %v7876_v55 }
 0x386   :  { %v7794_v2 = vld [vmem:[#allocation2 + $0x218] sm:$0xff] }
 0x387   :  { %v945_v63 = vpop.f32.mrf.mxu0  ;;  %3107 = vmatmul.bf16.gmra.mxu2 %v7794_v2  ;;  %3210 = vmatmul.bf16.vlgmr.msrb.gmra.mxu1 %v7742_v62  ;;  %v7746_v62 = vld [vmem:[#allocation2 + $0x70] sm:$0xff]  ;;  %v3004_v2 = vpop.f32.mrf.mxu1 }
 0x388   :  { %v946_v6 = vadd.f32 %v9047_v41, %v945_v63  ;;  %v7717_v41 = vld [vmem:[%s10425_s0 + $0x190] sm:$0xff]  ;;  %v7745_v63 = vld [vmem:[#allocation2 + $0x68] sm:$0xff]  ;;  %v3005_v3 = vadd.f32 %v9245_v32, %v3004_v2 }
 0x389   :  { %6292 = vmatmul.msk.bf16.gmra.mxu0 %vm502_vm1, %v7717_v41  ;;  %v7748_v41 = vld [vmem:[#allocation2 + $0x80] sm:$0xff]  ;;  %v7760_v2 = vld [vmem:[#allocation2 + $0xf0] sm:$0xff] }
 0x38a   :  { %vm1123_vm7 = vcmp.ge.f32.partialorder %v946_v6, 0.0  ;;  %v1251_v53 = vmul.f32 0.2, %v946_v6 }
 0x38c   :  { %v1379_v27 = vsel %vm1123_vm7, %v946_v6, %v1251_v53  ;;  %v7884_v6 = vld [vmem:[%s10426_s2 + $0x230] sm:$0xff] }
 0x38d   :  { %v8310_v28 = vpack.c.bf16 %v1379_v27, %v1378_v22  ;;  %3648 = vmatpush.bf16.msra.mxu3 %v7884_v6  ;;  %v7719_v22 = vld [vmem:[%s10425_s0 + $0x1a0] sm:$0xff]  ;;  %v9350_v27 = vpop.f32.mrf.mxu3  ;;  %v7883_v6 = vld [vmem:[%s10426_s2 + $0x228] sm:$0xff] }
 0x38e   :  { %10439 = vst [vmem:[#allocation12_spill] sm:$0xff] %v9350_v27 }
 0x38f   :  { %8538 = vst [vmem:[#allocation2 + $0x220] sm:$0xff] %v8310_v28   ;;  %v7747_v28 = vld [vmem:[#allocation2 + $0x78] sm:$0xff] }
 0x391   :  { %3649 = vmatpush.bf16.msra.mxu3 %v7883_v6 }
 0x396   :  { %v7795_v7 = vld [vmem:[#allocation2 + $0x220] sm:$0xff] }
 0x397   :  { %3196 = vmatmul.bf16.gmra.mxu3 %v7795_v7  ;;  %3215 = vmatmul.bf16.gmra.mxu1 %v7744_v24 }
 0x398   :  { %3299 = vmatmul.bf16.vlgmr.msrb.gmra.mxu2 %v7743_v34  ;;  %v7720_v34 = vld [vmem:[%s10425_s0 + $0x1a8] sm:$0xff] }
 0x399   :  { %6293 = vmatmul.msk.bf16.gmra.mxu0 %vm502_vm1, %v7718_v47  ;;  %v9357_v47 = vpop.f32.mrf.mxu1 }
 0x39a   :  { %10441 = vst [vmem:[#allocation14_spill] sm:$0xff] %v9357_v47 }
 0x3a7   :  { %3220 = vmatmul.bf16.gmra.mxu1 %v7746_v62  ;;  %3388 = vmatmul.bf16.vlgmr.msrb.gmra.mxu3 %v7744_v24 }
 0x3a8   :  { %3304 = vmatmul.bf16.gmra.mxu2 %v7745_v63  ;;  %v7875_v63 = vld [vmem:[%s10426_s2 + $0x1e8] sm:$0xff] }
 0x3a9   :  { %6294 = vmatmul.msk.bf16.gmra.mxu0 %vm502_vm1, %v7719_v22  ;;  %3560 = vmatpush.bf16.msra.mxu2 %v7875_v63  ;;  %v8045_v63 = vld [vmem:[%s10427_s4 + $0x1a8] sm:$0xff] }
 0x3aa   :  { %v3093_v15 = vpop.f32.mrf.mxu2  ;;  %5803 = vmatpush.bf16.msrb.mxu0 %v8045_v63  ;;  %v7866_v63 = vld [vmem:[%s10426_s2 + $0x1a0] sm:$0xff] }
 0x3ab   :  { %v3094_v53 = vadd.f32 %v3093_v15, %v3005_v3  ;;  %v7749_v3 = vld [vmem:[#allocation2 + $0x88] sm:$0xff]  ;;  %3472 = vmatpush.bf16.msra.mxu1 %v7866_v63  ;;  %v7765_v63 = vld [vmem:[#allocation2 + $0x118] sm:$0xff] }
 0x3b2   :  { %v9360_v55 = vpop.f32.mrf.mxu2 }
 0x3b3   :  { %10442 = vst [vmem:[#allocation15_spill] sm:$0xff] %v9360_v55 }
 0x3b7   :  { %3225 = vmatmul.bf16.gmra.mxu1 %v7748_v41  ;;  %3393 = vmatmul.bf16.gmra.mxu3 %v7746_v62  ;;  %v3009_v62 = vpop.f32.mrf.mxu1 }
 0x3b8   :  { %3309 = vmatmul.bf16.gmra.mxu2 %v7747_v28  ;;  %v3010_v15 = vadd.f32 %v9245_v32, %v3009_v62  ;;  %v7721_v28 = vld [vmem:[%s10425_s0 + $0x1b0] sm:$0xff] }
 0x3b9   :  { %6295 = vmatmul.msk.bf16.gmra.mxu0 %vm502_vm1, %v7720_v34  ;;  %v7750_v34 = vld [vmem:[#allocation2 + $0x90] sm:$0xff] }
 0x3ba   :  { %v3182_v7 = vpop.f32.mrf.mxu3 }
 0x3bb   :  { %v9352_v24 = vadd.f32 %v3182_v7, %v3094_v53  ;;  %v7762_v7 = vld [vmem:[#allocation2 + $0x100] sm:$0xff] }
 0x3bd   :  { %10440 = vst [vmem:[#allocation13_spill] sm:$0xff] %v9352_v24 }
 0x3bf   :  { %v9381_v62 = vpop.f32.mrf.mxu1 }
 0x3c0   :  { %10444 = vst [vmem:[#allocation17_spill] sm:$0xff] %v9381_v62 }
 0x3c7   :  { %3230 = vmatmul.bf16.gmra.mxu1 %v7760_v2  ;;  %3398 = vmatmul.bf16.gmra.mxu3 %v7748_v41  ;;  %v9376_v41 = vpop.f32.mrf.mxu3  ;;  %v7761_v2 = vld [vmem:[#allocation2 + $0xf8] sm:$0xff] }
 0x3c8   :  { %3314 = vmatmul.bf16.gmra.mxu2 %v7749_v3  ;;  %10443 = vst [vmem:[#allocation16_spill] sm:$0xff] %v9376_v41 }
 0x3c9   :  { %6296 = vmatmul.msk.bf16.gmra.mxu0 %vm502_vm1, %v7721_v28  ;;  %v7764_v28 = vld [vmem:[#allocation2 + $0x110] sm:$0xff] }
 0x3ca   :  { %v3098_v53 = vpop.f32.mrf.mxu2 }
 0x3cb   :  { %v3099_v22 = vadd.f32 %v3098_v53, %v3010_v15 }
 0x3d2   :  { %v9389_v15 = vpop.f32.mrf.mxu2  ;;  %v948_v41 = vpop.f32.mrf.mxu0 }
 0x3d3   :  { %10446 = vst [vmem:[#allocation19_spill] sm:$0xff] %v9389_v15 }
 0x3d4   :  { %v3014_v53 = vpop.f32.mrf.mxu1 }
 0x3d7   :  { %3235 = vmatmul.bf16.gmra.mxu1 %v7762_v7  ;;  %3403 = vmatmul.bf16.gmra.mxu3 %v7750_v34  ;;  %v7874_v34 = vld [vmem:[%s10426_s2 + $0x1e0] sm:$0xff] }
 0x3d8   :  { %3319 = vmatmul.bf16.gmra.mxu2 %v7761_v2  ;;  %v7763_v2 = vld [vmem:[#allocation2 + $0x108] sm:$0xff] }
 0x3d9   :  { %6297 = vmatmul.msk.bf16.gmra.mxu0 %vm502_vm1, %v7722_v21  ;;  %3561 = vmatpush.bf16.msra.mxu2 %v7874_v34  ;;  %v7766_v34 = vld [vmem:[#allocation2 + $0x120] sm:$0xff] }
 0x3da   :  { %v3187_v3 = vpop.f32.mrf.mxu3 }
 0x3db   :  { %v9383_v6 = vadd.f32 %v3187_v3, %v3099_v22  ;;  %v7882_v22 = vld [vmem:[%s10426_s2 + $0x220] sm:$0xff]  ;;  %v3015_v3 = vadd.f32 %v9245_v32, %v3014_v53  ;;  %v950_v53 = vpop.f32.mrf.mxu0 }
 0x3dc   :  { %3650 = vmatpush.bf16.msra.mxu3 %v7882_v22  ;;  %v9401_v62 = vpop.f32.mrf.mxu1 }
 0x3dd   :  { %10445 = vst [vmem:[#allocation18_spill] sm:$0xff] %v9383_v6 }
 0x3de   :  { %10447 = vst [vmem:[#allocation20_spill] sm:$0xff] %v9401_v62 }
 0x3e2   :  { %v9409_v55 = vpop.f32.mrf.mxu3 }
 0x3e3   :  { %10448 = vst [vmem:[#allocation21_spill] sm:$0xff] %v9409_v55 }
 0x3e7   :  { %3240 = vmatmul.bf16.gmra.mxu1 %v7764_v28  ;;  %3408 = vmatmul.bf16.gmra.mxu3 %v7762_v7  ;;  %v9406_v7 = vld [vmem:[%s10424_s5] ss:$0 sm:$0xff] }
 0x3e8   :  { %3324 = vmatmul.bf16.gmra.mxu2 %v7763_v2  ;;  %v949_v2 = vadd.f32 %v9406_v7, %v948_v41  ;;  %v951_v22 = vadd.f32 %v9406_v7, %v950_v53  ;;  %v7778_v53 = vld [vmem:[#allocation2 + $0x190] sm:$0xff] }
 0x3ea   :  { %v3103_v21 = vpop.f32.mrf.mxu2  ;;  %v1252_v47 = vmul.f32 0.2, %v949_v2  ;;  %vm1124_vm8 = vcmp.ge.f32.partialorder %v949_v2, 0.0  ;;  %vm1125_vm9 = vcmp.ge.f32.partialorder %v951_v22, 0.0  ;;  %v953_v44 = vpop.f32.mrf.mxu0 }
 0x3eb   :  { %v3104_v15 = vadd.f32 %v3103_v21, %v3015_v3  ;;  %v1253_v21 = vmul.f32 0.2, %v951_v22  ;;  %v954_v24 = vadd.f32 %v9406_v7, %v953_v44 }
 0x3ec   :  { %v1380_v3 = vsel %vm1124_vm8, %v949_v2, %v1252_v47 }
 0x3ed   :  { %v1381_v62 = vsel %vm1125_vm9, %v951_v22, %v1253_v21  ;;  %v1254_v11 = vmul.f32 0.2, %v954_v24  ;;  %vm1126_vm10 = vcmp.ge.f32.partialorder %v954_v24, 0.0 }
 0x3ee   :  { %v8315_v45 = vpack.c.bf16 %v1381_v62, %v1380_v3  ;;  %v7767_v62 = vld [vmem:[#allocation2 + $0x128] sm:$0xff] }
 0x3f0   :  { %8539 = vst [vmem:[#allocation2 + $0x238] sm:$0xff] %v8315_v45   ;;  %v1382_v45 = vsel %vm1126_vm10, %v954_v24, %v1254_v11 }
 0x3f2   :  { %v9415_v18 = vpop.f32.mrf.mxu2  ;;  %v955_v47 = vpop.f32.mrf.mxu0 }
 0x3f3   :  { %10450 = vst [vmem:[#allocation23_spill] sm:$0xff] %v9415_v18  ;;  %v956_v2 = vadd.f32 %v9406_v7, %v955_v47 }
 0x3f4   :  { %v3019_v6 = vpop.f32.mrf.mxu1 }
 0x3f5   :  { %vm1127_vm11 = vcmp.ge.f32.partialorder %v956_v2, 0.0  ;;  %v1255_v44 = vmul.f32 0.2, %v956_v2 }
 0x3f7   :  { %3245 = vmatmul.bf16.gmra.mxu1 %v7766_v34  ;;  %3413 = vmatmul.bf16.gmra.mxu3 %v7764_v28  ;;  %v1383_v22 = vsel %vm1127_vm11, %v956_v2, %v1255_v44  ;;  %v7768_v44 = vld [vmem:[#allocation2 + $0x130] sm:$0xff] }
 0x3f8   :  { %3329 = vmatmul.bf16.gmra.mxu2 %v7765_v63  ;;  %v8320_v3 = vpack.c.bf16 %v1383_v22, %v1382_v45  ;;  %v7780_v45 = vld [vmem:[#allocation2 + $0x1a0] sm:$0xff]  ;;  %v2947_v22 = vadd.f32 %v9245_v32, %v8938_v54 }
 0x3fa   :  { %v3192_v27 = vpop.f32.mrf.mxu3  ;;  %8540 = vst [vmem:[#allocation2 + $0x240] sm:$0xff] %v8320_v3  }
 0x3fb   :  { %v9412_v41 = vadd.f32 %v3192_v27, %v3104_v15  ;;  %v7873_v27 = vld [vmem:[%s10426_s2 + $0x1d8] sm:$0xff] }
 0x3fc   :  { %v3021_v55 = vpop.f32.mrf.mxu1  ;;  %v7881_v15 = vld [vmem:[%s10426_s2 + $0x218] sm:$0xff]  ;;  %3562 = vmatpush.bf16.msra.mxu2 %v7873_v27 }
 0x3fd   :  { %10449 = vst [vmem:[#allocation22_spill] sm:$0xff] %v9412_v41  ;;  %3651 = vmatpush.bf16.msra.mxu3 %v7881_v15 }
 0x402   :  { %v9431_v47 = vpop.f32.mrf.mxu3 }
 0x403   :  { %10451 = vst [vmem:[#allocation24_spill] sm:$0xff] %v9431_v47 }
 0x404   :  { %v3211_v35 = vpop.f32.mrf.mxu1 }
 0x405   :  { %v3212_v28 = vadd.f32 %v3211_v35, %v8950_v9  ;;  %v7865_v9 = vld [vmem:[%s10426_s2 + $0x198] sm:$0xff]  ;;  %v3020_v35 = vadd.f32 %v9245_v32, %v3019_v6 }
 0x406   :  { %3473 = vmatpush.bf16.msra.mxu1 %v7865_v9  ;;  %v7779_v9 = vld [vmem:[#allocation2 + $0x198] sm:$0xff] }
 0x407   :  { %3250 = vmatmul.bf16.gmra.mxu1 %v7778_v53  ;;  %3418 = vmatmul.bf16.gmra.mxu3 %v7766_v34  ;;  %v958_v34 = vpop.f32.mrf.mxu0  ;;  %v3022_v53 = vadd.f32 %v9245_v32, %v3021_v55 }
 0x408   :  { %3334 = vmatmul.bf16.gmra.mxu2 %v7767_v62  ;;  %v959_v21 = vadd.f32 %v9406_v7, %v958_v34 }
 0x40a   :  { %v3108_v63 = vpop.f32.mrf.mxu2  ;;  %v1256_v41 = vmul.f32 0.2, %v959_v21  ;;  %vm1128_vm12 = vcmp.ge.f32.partialorder %v959_v21, 0.0 }
 0x40b   :  { %v3109_v11 = vadd.f32 %v3108_v63, %v3020_v35 }
 0x40c   :  { %v3213_v24 = vpop.f32.mrf.mxu1  ;;  %v1384_v35 = vsel %vm1128_vm12, %v959_v21, %v1256_v41 }
 0x40f   :  { %v960_v2 = vpop.f32.mrf.mxu0 }
 0x410   :  { %v961_v15 = vadd.f32 %v9406_v7, %v960_v2 }
 0x412   :  { %v3110_v62 = vpop.f32.mrf.mxu2  ;;  %vm1129_vm13 = vcmp.ge.f32.partialorder %v961_v15, 0.0  ;;  %v1257_v55 = vmul.f32 0.2, %v961_v15 }
 0x413   :  { %v3111_v18 = vadd.f32 %v3110_v62, %v3022_v53  ;;  %v3036_v62 = vadd.f32 %v8942_v60, %v2947_v22 }
 0x414   :  { %v3216_v6 = vpop.f32.mrf.mxu1  ;;  %v1385_v63 = vsel %vm1129_vm13, %v961_v15, %v1257_v55 }
 0x415   :  { %v3217_v27 = vadd.f32 %v3216_v6, %v8965_v30  ;;  %v8325_v34 = vpack.c.bf16 %v1385_v63, %v1384_v35  ;;  %v3125_v21 = vadd.f32 %v8957_v20, %v3036_v62  ;;  %v7781_v20 = vld [vmem:[#allocation2 + $0x1a8] sm:$0xff]  ;;  %v7864_v63 = vld [vmem:[%s10426_s2 + $0x190] sm:$0xff] }
 0x416   :  { %3474 = vmatpush.bf16.msra.mxu1 %v7864_v63 }
 0x417   :  { %3255 = vmatmul.bf16.gmra.mxu1 %v7780_v45  ;;  %3423 = vmatmul.bf16.gmra.mxu3 %v7768_v44  ;;  %8541 = vst [vmem:[#allocation2 + $0x248] sm:$0xff] %v8325_v34   ;;  %v963_v47 = vpop.f32.mrf.mxu0  ;;  %v3214_v44 = vadd.f32 %v3213_v24, %v3125_v21  ;;  %v2952_v24 = vadd.f32 %v9245_v32, %v8952_v10 }
 0x418   :  { %3339 = vmatmul.bf16.gmra.mxu2 %v7779_v9  ;;  %v964_v41 = vadd.f32 %v9406_v7, %v963_v47  ;;  %v7872_v47 = vld [vmem:[%s10426_s2 + $0x1d0] sm:$0xff] }
 0x419   :  { %3563 = vmatpush.bf16.msra.mxu2 %v7872_v47  ;;  %v3041_v10 = vadd.f32 %v8955_v17, %v2952_v24 }
 0x41a   :  { %v3197_v3 = vpop.f32.mrf.mxu3  ;;  %v1258_v9 = vmul.f32 0.2, %v964_v41  ;;  %vm1130_vm14 = vcmp.ge.f32.partialorder %v964_v41, 0.0 }
 0x41b   :  { %v9437_v53 = vadd.f32 %v3197_v3, %v3109_v11  ;;  %v3300_v30 = vpop.f32.mrf.mxu2 }
 0x41c   :  { %v3301_v6 = vadd.f32 %v3300_v30, %v3212_v28  ;;  %v3218_v2 = vpop.f32.mrf.mxu1  ;;  %v7782_v28 = vld [vmem:[#allocation2 + $0x1b0] sm:$0xff] }
 0x41f   :  { %v965_v55 = vpop.f32.mrf.mxu0 }
 0x420   :  { %v966_v22 = vadd.f32 %v9406_v7, %v965_v55 }
 0x422   :  { %v3199_v36 = vpop.f32.mrf.mxu3  ;;  %vm1131_vm15 = vcmp.ge.f32.partialorder %v966_v22, 0.0 }
 0x423   :  { %v9442_v54 = vadd.f32 %v3199_v36, %v3111_v18  ;;  %v3302_v15 = vpop.f32.mrf.mxu2  ;;  %v1386_v36 = vsel %vm1130_vm14, %v964_v41, %v1258_v9  ;;  %v1259_v18 = vmul.f32 0.2, %v966_v22  ;;  %v3130_v9 = vadd.f32 %v8972_v40, %v3041_v10 }
 0x424   :  { %v3303_v35 = vadd.f32 %v3302_v15, %v3214_v44  ;;  %v3221_v11 = vpop.f32.mrf.mxu1 }
 0x425   :  { %v3222_v60 = vadd.f32 %v3221_v11, %v8980_v51  ;;  %v7880_v51 = vld [vmem:[%s10426_s2 + $0x210] sm:$0xff]  ;;  %v1387_v3 = vsel %vm1131_vm15, %v966_v22, %v1259_v18  ;;  %v3219_v11 = vadd.f32 %v3218_v2, %v3130_v9  ;;  %v2957_v2 = vadd.f32 %v9245_v32, %v8967_v31 }
 0x426   :  { %v8330_v30 = vpack.c.bf16 %v1387_v3, %v1386_v36  ;;  %3652 = vmatpush.bf16.msra.mxu3 %v7880_v51  ;;  %v7783_v51 = vld [vmem:[#allocation2 + $0x1b8] sm:$0xff] }
 0x427   :  { %3260 = vmatmul.bf16.gmra.mxu1 %v7782_v28  ;;  %3428 = vmatmul.bf16.gmra.mxu3 %v7780_v45  ;;  %v968_v44 = vpop.f32.mrf.mxu0 }
 0x428   :  { %3344 = vmatmul.bf16.gmra.mxu2 %v7781_v20  ;;  %8542 = vst [vmem:[#allocation2 + $0x250] sm:$0xff] %v8330_v30   ;;  %v969_v15 = vadd.f32 %v9406_v7, %v968_v44 }
 0x42a   :  { %v3389_v34 = vpop.f32.mrf.mxu3  ;;  %v1260_v20 = vmul.f32 0.2, %v969_v15  ;;  %vm1132_vm0 = vcmp.ge.f32.partialorder %v969_v15, 0.0 }
 0x42b   :  { %v3305_v45 = vpop.f32.mrf.mxu2  ;;  %v9457_v62 = vadd.f32 %v3389_v34, %v3301_v6 }
 0x42c   :  { %v3306_v41 = vadd.f32 %v3305_v45, %v3217_v27  ;;  %v3223_v21 = vpop.f32.mrf.mxu1  ;;  %v7784_v27 = vld [vmem:[#allocation2 + $0x1c0] sm:$0xff]  ;;  %v1388_v63 = vsel %vm1132_vm0, %v969_v15, %v1260_v20  ;;  %v7796_v20 = vld [vmem:[#allocation2 + $0x230] sm:$0xff] }
 0x42f   :  { %v970_v6 = vpop.f32.mrf.mxu0 }
 0x430   :  { %v971_v24 = vadd.f32 %v9406_v7, %v970_v6 }
 0x432   :  { %v3391_v55 = vpop.f32.mrf.mxu3  ;;  %vm1133_vm2 = vcmp.ge.f32.partialorder %v971_v24, 0.0  ;;  %v1261_v40 = vmul.f32 0.2, %v971_v24 }
 0x433   :  { %v3307_v22 = vpop.f32.mrf.mxu2  ;;  %v9462_v47 = vadd.f32 %v3391_v55, %v3303_v35 }
 0x434   :  { %v3308_v36 = vadd.f32 %v3307_v22, %v3219_v11  ;;  %v3226_v18 = vpop.f32.mrf.mxu1  ;;  %v1389_v35 = vsel %vm1133_vm2, %v971_v24, %v1261_v40  ;;  %v7863_v40 = vld [vmem:[%s10426_s2 + $0x188] sm:$0xff] }
 0x435   :  { %v3227_v17 = vadd.f32 %v3226_v18, %v8990_v4  ;;  %v8335_v34 = vpack.c.bf16 %v1389_v35, %v1388_v63  ;;  %v3046_v4 = vadd.f32 %v8970_v37, %v2957_v2  ;;  %v2962_v63 = vadd.f32 %v9245_v32, %v8993_v14  ;;  %3475 = vmatpush.bf16.msra.mxu1 %v7863_v40 }
 0x437   :  { %3265 = vmatmul.bf16.gmra.mxu1 %v7784_v27  ;;  %3433 = vmatmul.bf16.gmra.mxu3 %v7782_v28  ;;  %8543 = vst [vmem:[#allocation2 + $0x258] sm:$0xff] %v8335_v34   ;;  %v973_v9 = vpop.f32.mrf.mxu0  ;;  %v3135_v15 = vadd.f32 %v8983_v61, %v3046_v4  ;;  %v7785_v61 = vld [vmem:[#allocation2 + $0x1c8] sm:$0xff]  ;;  %v3051_v14 = vadd.f32 %v8998_v19, %v2962_v63 }
 0x438   :  { %3349 = vmatmul.bf16.gmra.mxu2 %v7783_v51  ;;  %v974_v28 = vadd.f32 %v9406_v7, %v973_v9  ;;  %v7871_v51 = vld [vmem:[%s10426_s2 + $0x1c8] sm:$0xff] }
 0x439   :  { %v3224_v11 = vadd.f32 %v3223_v21, %v3135_v15  ;;  %3564 = vmatpush.bf16.msra.mxu2 %v7871_v51  ;;  %v3140_v15 = vadd.f32 %v9007_v38, %v3051_v14 }
 0x43a   :  { %v3394_v3 = vpop.f32.mrf.mxu3  ;;  %v1262_v18 = vmul.f32 0.2, %v974_v28  ;;  %vm1134_vm3 = vcmp.ge.f32.partialorder %v974_v28, 0.0 }
 0x43b   :  { %v3310_v30 = vpop.f32.mrf.mxu2  ;;  %v9468_v45 = vadd.f32 %v3394_v3, %v3306_v41 }
 0x43c   :  { %v3311_v10 = vadd.f32 %v3310_v30, %v3222_v60  ;;  %v3228_v44 = vpop.f32.mrf.mxu1  ;;  %v1390_v21 = vsel %vm1134_vm3, %v974_v28, %v1262_v18 }
 0x43f   :  { %v975_v24 = vpop.f32.mrf.mxu0 }
 0x440   :  { %v976_v60 = vadd.f32 %v9406_v7, %v975_v24 }
 0x442   :  { %v3396_v55 = vpop.f32.mrf.mxu3  ;;  %vm1135_vm4 = vcmp.ge.f32.partialorder %v976_v60, 0.0 }
 0x443   :  { %v3312_v31 = vpop.f32.mrf.mxu2  ;;  %v9473_v22 = vadd.f32 %v3396_v55, %v3308_v36  ;;  %v1263_v36 = vmul.f32 0.2, %v976_v60 }
 0x444   :  { %v3313_v6 = vadd.f32 %v3312_v31, %v3224_v11  ;;  %v3231_v41 = vpop.f32.mrf.mxu1  ;;  %v3229_v11 = vadd.f32 %v3228_v44, %v3140_v15 }
 0x445   :  { %v3232_v37 = vadd.f32 %v3231_v41, %v9012_v49  ;;  %v7879_v49 = vld [vmem:[%s10426_s2 + $0x208] sm:$0xff]  ;;  %v1391_v2 = vsel %vm1135_vm4, %v976_v60, %v1263_v36  ;;  %v7786_v60 = vld [vmem:[#allocation2 + $0x1d0] sm:$0xff]  ;;  %v2967_v36 = vadd.f32 %v9245_v32, %v9014_v50 }
 0x446   :  { %v8340_v3 = vpack.c.bf16 %v1391_v2, %v1390_v21  ;;  %3653 = vmatpush.bf16.msra.mxu3 %v7879_v49 }
 0x447   :  { %3270 = vmatmul.bf16.gmra.mxu1 %v7796_v20  ;;  %3438 = vmatmul.bf16.gmra.mxu3 %v7784_v27  ;;  %v978_v9 = vpop.f32.mrf.mxu0 }
 0x448   :  { %3354 = vmatmul.bf16.gmra.mxu2 %v7785_v61  ;;  %8544 = vst [vmem:[#allocation2 + $0x260] sm:$0xff] %v8340_v3   ;;  %v979_v28 = vadd.f32 %v9406_v7, %v978_v9  ;;  %v7797_v61 = vld [vmem:[#allocation2 + $0x238] sm:$0xff] }
 0x44a   :  { %v3399_v35 = vpop.f32.mrf.mxu3  ;;  %v1264_v18 = vmul.f32 0.2, %v979_v28  ;;  %vm1136_vm5 = vcmp.ge.f32.partialorder %v979_v28, 0.0 }
 0x44b   :  { %v3315_v27 = vpop.f32.mrf.mxu2  ;;  %v9488_v34 = vadd.f32 %v3399_v35, %v3311_v10 }
 0x44c   :  { %v3316_v30 = vadd.f32 %v3315_v27, %v3227_v17  ;;  %v3233_v4 = vpop.f32.mrf.mxu1  ;;  %v7798_v17 = vld [vmem:[#allocation2 + $0x240] sm:$0xff]  ;;  %v1392_v38 = vsel %vm1136_vm5, %v979_v28, %v1264_v18  ;;  %v3056_v27 = vadd.f32 %v9020_v56, %v2967_v36 }
 0x44d   :  { %v7862_v56 = vld [vmem:[%s10426_s2 + $0x180] sm:$0xff] }
 0x44e   :  { %v3145_v9 = vadd.f32 %v9029_v12, %v3056_v27  ;;  %v7870_v12 = vld [vmem:[%s10426_s2 + $0x1c0] sm:$0xff]  ;;  %3476 = vmatpush.bf16.msra.mxu1 %v7862_v56 }
 0x44f   :  { %v980_v10 = vpop.f32.mrf.mxu0  ;;  %3565 = vmatpush.bf16.msra.mxu2 %v7870_v12 }
 0x450   :  { %v981_v51 = vadd.f32 %v9406_v7, %v980_v10  ;;  %v3234_v28 = vadd.f32 %v3233_v4, %v3145_v9  ;;  %v7723_v4 = vld [vmem:[%s10425_s0 + $0x1c0] sm:$0xff] }
 0x451   :  { %6298 = vmatmul.msk.bf16.gmra.mxu0 %vm502_vm1, %v7723_v4 }
 0x452   :  { %v3401_v55 = vpop.f32.mrf.mxu3  ;;  %vm1137_vm6 = vcmp.ge.f32.partialorder %v981_v51, 0.0  ;;  %v1265_v44 = vmul.f32 0.2, %v981_v51 }
 0x453   :  { %v3317_v31 = vpop.f32.mrf.mxu2  ;;  %v9493_v20 = vadd.f32 %v3401_v55, %v3313_v6  ;;  %v8044_v6 = vld [vmem:[%s10427_s4 + $0x1a0] sm:$0xff] }
 0x454   :  { %v3318_v41 = vadd.f32 %v3317_v31, %v3229_v11  ;;  %v3236_v24 = vpop.f32.mrf.mxu1  ;;  %v1393_v21 = vsel %vm1137_vm6, %v981_v51, %v1265_v44  ;;  %5804 = vmatpush.bf16.msrb.mxu0 %v8044_v6 }
 0x455   :  { %v3237_v19 = vadd.f32 %v3236_v24, %v9033_v26  ;;  %v8345_v63 = vpack.c.bf16 %v1393_v21, %v1392_v38 }
 0x457   :  { %3275 = vmatmul.bf16.gmra.mxu1 %v7798_v17  ;;  %3443 = vmatmul.bf16.gmra.mxu3 %v7786_v60  ;;  %8545 = vst [vmem:[#allocation2 + $0x268] sm:$0xff] %v8345_v63   ;;  %v983_v3 = vpop.f32.mrf.mxu0  ;;  %v7878_v60 = vld [vmem:[%s10426_s2 + $0x200] sm:$0xff] }
 0x458   :  { %3359 = vmatmul.bf16.gmra.mxu2 %v7797_v61  ;;  %v984_v14 = vadd.f32 %v9406_v7, %v983_v3  ;;  %3654 = vmatpush.bf16.msra.mxu3 %v7878_v60 }
 0x45a   :  { %v3404_v26 = vpop.f32.mrf.mxu3  ;;  %v1266_v32 = vmul.f32 0.2, %v984_v14  ;;  %vm1138_vm7 = vcmp.ge.f32.partialorder %v984_v14, 0.0 }
 0x45b   :  { %v3320_v49 = vpop.f32.mrf.mxu2  ;;  %v9502_v40 = vadd.f32 %v3404_v26, %v3316_v30  ;;  %v7800_v30 = vld [vmem:[#allocation2 + $0x250] sm:$0xff] }
 0x45c   :  { %v3321_v2 = vadd.f32 %v3320_v49, %v3232_v37  ;;  %v3238_v35 = vpop.f32.mrf.mxu1  ;;  %v1394_v10 = vsel %vm1138_vm7, %v984_v14, %v1266_v32 }
 0x45f   :  { %v985_v37 = vpop.f32.mrf.mxu0 }
 0x460   :  { %v986_v24 = vadd.f32 %v9406_v7, %v985_v37 }
 0x462   :  { %v3406_v15 = vpop.f32.mrf.mxu3  ;;  %vm1139_vm8 = vcmp.ge.f32.partialorder %v986_v24, 0.0 }
 0x463   :  { %v3322_v11 = vpop.f32.mrf.mxu2  ;;  %v9507_v50 = vadd.f32 %v3406_v15, %v3318_v41  ;;  %v7799_v41 = vld [vmem:[#allocation2 + $0x248] sm:$0xff] }
 0x464   :  { %v3323_v55 = vadd.f32 %v3322_v11, %v3234_v28  ;;  %v3241_v31 = vpop.f32.mrf.mxu1  ;;  %v7802_v11 = vld [vmem:[#allocation2 + $0x260] sm:$0xff] }
 0x465   :  { %v3242_v18 = vadd.f32 %v3241_v31, %v9059_v0  ;;  %v1267_v0 = vmul.f32 0.2, %v986_v24 }
 0x467   :  { %3280 = vmatmul.bf16.gmra.mxu1 %v7800_v30  ;;  %3448 = vmatmul.bf16.gmra.mxu3 %v7798_v17  ;;  %v1395_v51 = vsel %vm1139_vm8, %v986_v24, %v1267_v0  ;;  %v9529_v17 = vld [vmem:[%s10424_s5 + $0x2] ss:$0 sm:$0xff]  ;;  %v7926_v0 = vld [vmem:[%s10428_s3 + $0x78] sm:$0xff] }
 0x468   :  { %3364 = vmatmul.bf16.gmra.mxu2 %v7799_v41  ;;  %v8350_v38 = vpack.c.bf16 %v1395_v51, %v1394_v10  ;;  %v2972_v21 = vadd.f32 %v9529_v17, %v9038_v29  ;;  %v7724_v29 = vld [vmem:[%s10425_s0 + $0x1c8] sm:$0xff]  ;;  %v2977_v32 = vadd.f32 %v9529_v17, %v9064_v8  ;;  %v7725_v8 = vld [vmem:[%s10425_s0 + $0x1d0] sm:$0xff] }
 0x469   :  { %6299 = vmatmul.msk.bf16.gmra.mxu0 %vm502_vm1, %v7724_v29  ;;  %4765 = vmatpush.bf16.msrb.mxu2 %v7926_v0 }
 0x46a   :  { %v3409_v61 = vpop.f32.mrf.mxu3  ;;  %8546 = vst [vmem:[#allocation2 + $0x270] sm:$0xff] %v8350_v38   ;;  %v3061_v63 = vadd.f32 %v9041_v33, %v2972_v21  ;;  %v3066_v31 = vadd.f32 %v9067_v13, %v2977_v32  ;;  %v7803_v13 = vld [vmem:[#allocation2 + $0x268] sm:$0xff]  ;;  %v2982_v38 = vadd.f32 %v9529_v17, %v9142_v46  ;;  %v7726_v46 = vld [vmem:[%s10425_s0 + $0x1d8] sm:$0xff] }
 0x46b   :  { %v3325_v44 = vpop.f32.mrf.mxu2  ;;  %v9524_v6 = vadd.f32 %v3409_v61, %v3321_v2 }
 0x46c   :  { %v3326_v36 = vadd.f32 %v3325_v44, %v3237_v19  ;;  %v3243_v26 = vpop.f32.mrf.mxu1  ;;  %v3150_v49 = vadd.f32 %v9055_v57, %v3061_v63  ;;  %v7801_v19 = vld [vmem:[#allocation2 + $0x258] sm:$0xff]  ;;  %v3155_v37 = vadd.f32 %v9076_v43, %v3066_v31  ;;  %v8601_v43 = vld [vmem:[#allocation2 + $0xa0] sm:$0xff] }
 0x46e   :  { %v3239_v3 = vadd.f32 %v3238_v35, %v3150_v49  ;;  %v3244_v24 = vadd.f32 %v3243_v26, %v3155_v37 }
 0x472   :  { %v3411_v27 = vpop.f32.mrf.mxu3 }
 0x473   :  { %v3327_v14 = vpop.f32.mrf.mxu2  ;;  %v9535_v2 = vadd.f32 %v3411_v27, %v3323_v55 }
 0x474   :  { %v3328_v9 = vadd.f32 %v3327_v14, %v3239_v3  ;;  %v3246_v28 = vpop.f32.mrf.mxu1 }
 0x475   :  { %v3247_v15 = vadd.f32 %v3246_v28, %v9080_v58 }
 0x477   :  { %3285 = vmatmul.bf16.gmra.mxu1 %v7802_v11  ;;  %3453 = vmatmul.bf16.gmra.mxu3 %v7800_v30 }
 0x478   :  { %3369 = vmatmul.bf16.gmra.mxu2 %v7801_v19 }
 0x479   :  { %6300 = vmatmul.msk.bf16.gmra.mxu0 %vm502_vm1, %v7725_v8 }
 0x47a   :  { %v3414_v33 = vpop.f32.mrf.mxu3 }
 0x47b   :  { %v3330_v57 = vpop.f32.mrf.mxu2  ;;  %v9542_v35 = vadd.f32 %v3414_v33, %v3326_v36  ;;  %v3071_v36 = vadd.f32 %v9145_v52, %v2982_v38  ;;  %v8603_v52 = vld [vmem:[#allocation2 + $0xa8] sm:$0xff] }
 0x47c   :  { %v3331_v55 = vadd.f32 %v3330_v57, %v3242_v18  ;;  %v3248_v58 = vpop.f32.mrf.mxu1  ;;  %v7934_v18 = vld [vmem:[%s10428_s3 + $0xb8] sm:$0xff] }
 0x47d   :  { %4794 = vmatpush.bf16.msrb.mxu3 %v7934_v18  ;;  %v3160_v26 = vadd.f32 %v9163_v23, %v3071_v36  ;;  %v2987_v23 = vadd.f32 %v9529_v17, %v9169_v42  ;;  %v7925_v42 = vld [vmem:[%s10428_s3 + $0x70] sm:$0xff] }
 0x47e   :  { %4766 = vmatpush.bf16.msrb.mxu2 %v7925_v42  ;;  %v10457_v42 = vld [vmem:[#allocation13_spill] sm:$0xff] }
 0x47f   :  { %v3249_v63 = vadd.f32 %v3248_v58, %v3160_v26  ;;  %v3076_v32 = vadd.f32 %v9175_v16, %v2987_v23  ;;  %v8604_v16 = vld [vmem:[#allocation2 + $0xc0] sm:$0xff] }
 0x482   :  { %v3416_v56 = vpop.f32.mrf.mxu3 }
 0x483   :  { %v3332_v12 = vpop.f32.mrf.mxu2  ;;  %v9548_v30 = vadd.f32 %v3416_v56, %v3328_v9 }
 0x484   :  { %v3333_v4 = vadd.f32 %v3332_v12, %v3244_v24  ;;  %v3251_v41 = vpop.f32.mrf.mxu1 }
 0x485   :  { %v3252_v10 = vadd.f32 %v3251_v41, %v9167_v39  ;;  %v7918_v39 = vld [vmem:[%s10428_s3 + $0x38] sm:$0xff]  ;;  %v7727_v41 = vld [vmem:[%s10425_s0 + $0x1e0] sm:$0xff] }
 0x486   :  { %4736 = vmatpush.bf16.msrb.mxu1 %v7918_v39 }
 0x487   :  { %3458 = vmatmul.bf16.gmra.mxu3 %v7802_v11  ;;  %3477 = vmatmul.bf16.vlgmr.msra.gmra.mxu1 %v8601_v43  ;;  %v7804_v11 = vld [vmem:[#allocation2 + $0x270] sm:$0xff]  ;;  %v2992_v43 = vadd.f32 %v9529_v17, %v9202_v59 }
 0x488   :  { %3374 = vmatmul.bf16.gmra.mxu2 %v7803_v13  ;;  %v8606_v59 = vld [vmem:[#allocation2 + $0xd0] sm:$0xff] }
 0x489   :  { %6301 = vmatmul.msk.bf16.gmra.mxu0 %vm502_vm1, %v7726_v46 }
 0x48a   :  { %v3419_v60 = vpop.f32.mrf.mxu3 }
 0x48b   :  { %v3335_v51 = vpop.f32.mrf.mxu2  ;;  %v9564_v61 = vadd.f32 %v3419_v60, %v3331_v55  ;;  %v3165_v55 = vadd.f32 %v9193_v25, %v3076_v32  ;;  %v8605_v25 = vld [vmem:[#allocation2 + $0xb8] sm:$0xff]  ;;  %v3081_v60 = vadd.f32 %v9208_v1, %v2992_v43 }
 0x48c   :  { %v3336_v44 = vadd.f32 %v3335_v51, %v3247_v15  ;;  %v3253_v21 = vpop.f32.mrf.mxu1  ;;  %v8602_v15 = vld [vmem:[#allocation2 + $0xb0] sm:$0xff]  ;;  %v10452_v51 = vld [vmem:[#allocation5_spill] sm:$0xff] }
 0x48d   :  { %v3254_v58 = vadd.f32 %v3253_v21, %v3165_v55  ;;  %v3170_v38 = vadd.f32 %v10452_v51, %v3081_v60 }
 0x492   :  { %v3421_v49 = vpop.f32.mrf.mxu3 }
 0x493   :  { %v3337_v3 = vpop.f32.mrf.mxu2  ;;  %v9570_v27 = vadd.f32 %v3421_v49, %v3333_v4 }
 0x494   :  { %v3338_v14 = vadd.f32 %v3337_v3, %v3249_v63  ;;  %v3256_v9 = vpop.f32.mrf.mxu1  ;;  %v10453_v3 = vld [vmem:[#allocation9_spill] sm:$0xff] }
 0x495   :  { %v3257_v28 = vadd.f32 %v3256_v9, %v9197_v48  ;;  %v7728_v9 = vld [vmem:[%s10425_s0 + $0x1e8] sm:$0xff] }
 0x497   :  { %3463 = vmatmul.bf16.gmra.mxu3 %v7804_v11  ;;  %3482 = vmatmul.bf16.gmra.mxu1 %v8602_v15 }
 0x498   :  { %3566 = vmatmul.bf16.vlgmr.msra.gmra.mxu2 %v8603_v52 }
 0x499   :  { %6302 = vmatmul.msk.bf16.gmra.mxu0 %vm502_vm1, %v7727_v41 }
 0x49a   :  { %v3424_v29 = vpop.f32.mrf.mxu3 }
 0x49b   :  { %v3340_v19 = vpop.f32.mrf.mxu2  ;;  %v9579_v33 = vadd.f32 %v3424_v29, %v3336_v44 }
 0x49c   :  { %v3341_v48 = vadd.f32 %v3340_v19, %v3252_v10  ;;  %v3258_v57 = vpop.f32.mrf.mxu1  ;;  %v7933_v10 = vld [vmem:[%s10428_s3 + $0xb0] sm:$0xff] }
 0x49d   :  { %4795 = vmatpush.bf16.msrb.mxu3 %v7933_v10  ;;  %v3259_v44 = vadd.f32 %v3258_v57, %v3170_v38  ;;  %v10455_v19 = vld [vmem:[#allocation7_spill] sm:$0xff]  ;;  %v10456_v57 = vld [vmem:[#allocation8_spill] sm:$0xff] }
 0x49e   :  { %v8609_v10 = vld [vmem:[#allocation2 + $0xd8] sm:$0xff] }
 0x4a2   :  { %v3426_v31 = vpop.f32.mrf.mxu3 }
 0x4a3   :  { %v3342_v37 = vpop.f32.mrf.mxu2  ;;  %v9583_v24 = vadd.f32 %v3426_v31, %v3338_v14 }
 0x4a4   :  { %v3343_v56 = vadd.f32 %v3342_v37, %v3254_v58  ;;  %v3261_v12 = vpop.f32.mrf.mxu1 }
 0x4a5   :  { %v3262_v4 = vadd.f32 %v3261_v12, %v9230_v5  ;;  %v7917_v5 = vld [vmem:[%s10428_s3 + $0x30] sm:$0xff] }
 0x4a6   :  { %4737 = vmatpush.bf16.msrb.mxu1 %v7917_v5  ;;  %v7932_v5 = vld [vmem:[%s10428_s3 + $0xa8] sm:$0xff] }
 0x4a7   :  { %3487 = vmatmul.bf16.gmra.mxu1 %v8604_v16  ;;  %3655 = vmatmul.bf16.vlgmr.msra.gmra.mxu3 %v8602_v15  ;;  %v10454_v15 = vld [vmem:[#allocation6_spill] sm:$0xff] }
 0x4a8   :  { %3571 = vmatmul.bf16.gmra.mxu2 %v8605_v25  ;;  %v2997_v52 = vadd.f32 %v9529_v17, %v10454_v15  ;;  %v8608_v25 = vld [vmem:[#allocation2 + $0x140] sm:$0xff]  ;;  %4796 = vmatpush.bf16.msrb.mxu3 %v7932_v5 }
 0x4a9   :  { %6303 = vmatmul.msk.bf16.gmra.mxu0 %vm502_vm1, %v7728_v9 }
 0x4aa   :  { %v3429_v0 = vpop.f32.mrf.mxu3 }
 0x4ab   :  { %v3345_v8 = vpop.f32.mrf.mxu2  ;;  %v9599_v13 = vadd.f32 %v3429_v0, %v3341_v48  ;;  %v3086_v48 = vadd.f32 %v10455_v19, %v2997_v52  ;;  %v7916_v0 = vld [vmem:[%s10428_s3 + $0x28] sm:$0xff]  ;;  %v7730_v52 = vld [vmem:[%s10425_s0 + $0x1f8] sm:$0xff] }
 0x4ac   :  { %v3346_v18 = vadd.f32 %v3345_v8, %v3257_v28  ;;  %v3263_v39 = vpop.f32.mrf.mxu1  ;;  %v8607_v28 = vld [vmem:[#allocation2 + $0xc8] sm:$0xff]  ;;  %4738 = vmatpush.bf16.msrb.mxu1 %v7916_v0 }
 0x4ad   :  { %v3175_v32 = vadd.f32 %v10456_v57, %v3086_v48  ;;  %v8612_v19 = vld [vmem:[#allocation2 + $0x148] sm:$0xff] }
 0x4ae   :  { %v10462_v48 = vld [vmem:[#allocation14_spill] sm:$0xff] }
 0x4af   :  { %v3264_v55 = vadd.f32 %v3263_v39, %v3175_v32  ;;  %v10458_v39 = vld [vmem:[#allocation10_spill] sm:$0xff]  ;;  %v3007_v57 = vadd.f32 %v9529_v17, %v10462_v48 }
 0x4b0   :  { %v3002_v60 = vadd.f32 %v9529_v17, %v10458_v39  ;;  %v10465_v39 = vld [vmem:[#allocation22_spill] sm:$0xff] }
 0x4b2   :  { %v3431_v21 = vpop.f32.mrf.mxu3 }
 0x4b3   :  { %v3347_v36 = vpop.f32.mrf.mxu2  ;;  %v9605_v26 = vadd.f32 %v3431_v21, %v3343_v56 }
 0x4b4   :  { %v3348_v63 = vadd.f32 %v3347_v36, %v3259_v44  ;;  %v3266_v49 = vpop.f32.mrf.mxu1  ;;  %v10459_v44 = vld [vmem:[#allocation11_spill] sm:$0xff]  ;;  %v10460_v36 = vld [vmem:[#allocation12_spill] sm:$0xff] }
 0x4b5   :  { %v3267_v14 = vadd.f32 %v3266_v49, %v10453_v3  ;;  %v3091_v21 = vadd.f32 %v10459_v44, %v3002_v60 }
 0x4b7   :  { %3492 = vmatmul.bf16.gmra.mxu1 %v8606_v59  ;;  %3660 = vmatmul.bf16.gmra.mxu3 %v8604_v16  ;;  %v7924_v16 = vld [vmem:[%s10428_s3 + $0x68] sm:$0xff] }
 0x4b8   :  { %3576 = vmatmul.bf16.gmra.mxu2 %v8607_v28 }
 0x4b9   :  { %4767 = vmatpush.bf16.msrb.mxu2 %v7924_v16  ;;  %v10464_v16 = vld [vmem:[#allocation16_spill] sm:$0xff] }
 0x4ba   :  { %v3434_v1 = vpop.f32.mrf.mxu3 }
 0x4bb   :  { %v3350_v11 = vpop.f32.mrf.mxu2  ;;  %v9612_v46 = vadd.f32 %v3434_v1, %v3346_v18 }
 0x4bc   :  { %v3351_v23 = vadd.f32 %v3350_v11, %v3262_v4  ;;  %v3268_v29 = vpop.f32.mrf.mxu1  ;;  %v7729_v4 = vld [vmem:[%s10425_s0 + $0x1f0] sm:$0xff]  ;;  %v10461_v11 = vld [vmem:[#allocation18_spill] sm:$0xff] }
 0x4bd   :  { %6304 = vmatmul.msk.bf16.gmra.mxu0 %vm502_vm1, %v7729_v4 }
 0x4c2   :  { %v3436_v58 = vpop.f32.mrf.mxu3 }
 0x4c3   :  { %v3352_v31 = vpop.f32.mrf.mxu2  ;;  %v9618_v37 = vadd.f32 %v3436_v58, %v3348_v63  ;;  %v3180_v63 = vadd.f32 %v10460_v36, %v3091_v21  ;;  %v8614_v21 = vld [vmem:[#allocation2 + $0x158] sm:$0xff]  ;;  %v7915_v36 = vld [vmem:[%s10428_s3 + $0x20] sm:$0xff] }
 0x4c4   :  { %v3353_v56 = vadd.f32 %v3352_v31, %v3264_v55  ;;  %v3271_v12 = vpop.f32.mrf.mxu1  ;;  %4739 = vmatpush.bf16.msrb.mxu1 %v7915_v36 }
 0x4c5   :  { %v3272_v41 = vadd.f32 %v3271_v12, %v10457_v42  ;;  %v3269_v49 = vadd.f32 %v3268_v29, %v3180_v63  ;;  %v8043_v29 = vld [vmem:[%s10427_s4 + $0x198] sm:$0xff]  ;;  %v10463_v12 = vld [vmem:[#allocation15_spill] sm:$0xff] }
 0x4c6   :  { %5805 = vmatpush.bf16.msrb.mxu0 %v8043_v29  ;;  %v3096_v42 = vadd.f32 %v10463_v12, %v3007_v57  ;;  %v10468_v57 = vld [vmem:[#allocation21_spill] sm:$0xff] }
 0x4c7   :  { %3497 = vmatmul.bf16.gmra.mxu1 %v8608_v25  ;;  %3665 = vmatmul.bf16.gmra.mxu3 %v8606_v59 }
 0x4c8   :  { %3581 = vmatmul.bf16.gmra.mxu2 %v8609_v10  ;;  %v3185_v4 = vadd.f32 %v10464_v16, %v3096_v42 }
 0x4ca   :  { %v3439_v8 = vpop.f32.mrf.mxu3 }
 0x4cb   :  { %v3355_v43 = vpop.f32.mrf.mxu2  ;;  %v9634_v18 = vadd.f32 %v3439_v8, %v3351_v23  ;;  %v8610_v23 = vld [vmem:[#allocation2 + $0x150] sm:$0xff] }
 0x4cc   :  { %v3356_v51 = vadd.f32 %v3355_v43, %v3267_v14  ;;  %v3273_v38 = vpop.f32.mrf.mxu1  ;;  %v8611_v14 = vld [vmem:[#allocation2 + $0xe0] sm:$0xff] }
 0x4cd   :  { %6305 = vmatmul.msk.bf16.gmra.mxu0 %vm502_vm1, %v7730_v52  ;;  %v3274_v25 = vadd.f32 %v3273_v38, %v3185_v4  ;;  %v7931_v38 = vld [vmem:[%s10428_s3 + $0xa0] sm:$0xff] }
 0x4ce   :  { %v988_v44 = vpop.f32.mrf.mxu0  ;;  %4797 = vmatpush.bf16.msrb.mxu3 %v7931_v38 }
 0x4cf   :  { %v989_v63 = vadd.f32 %v9406_v7, %v988_v44  ;;  %v8616_v44 = vld [vmem:[#allocation2 + $0x168] sm:$0xff] }
 0x4d1   :  { %vm1140_vm1 = vcmp.ge.f32.partialorder %v989_v63, 0.0 }
 0x4d2   :  { %v3441_v3 = vpop.f32.mrf.mxu3 }
 0x4d3   :  { %v3357_v9 = vpop.f32.mrf.mxu2  ;;  %v9640_v59 = vadd.f32 %v3441_v3, %v3353_v56 }
 0x4d4   :  { %v3358_v28 = vadd.f32 %v3357_v9, %v3269_v49  ;;  %v3276_v1 = vpop.f32.mrf.mxu1 }
 0x4d5   :  { %v3277_v15 = vadd.f32 %v3276_v1, %v10461_v11 }
 0x4d6   :  { %v990_v29 = vpop.f32.mrf.mxu0 }
 0x4d7   :  { %3502 = vmatmul.bf16.gmra.mxu1 %v8610_v23  ;;  %3670 = vmatmul.bf16.gmra.mxu3 %v8611_v14  ;;  %v10467_v14 = vld [vmem:[#allocation19_spill] sm:$0xff]  ;;  %v991_v48 = vadd.f32 %v9406_v7, %v990_v29 }
 0x4d8   :  { %3586 = vmatmul.bf16.gmra.mxu2 %v8612_v19 }
 0x4d9   :  { %vm1141_vm9 = vcmp.ge.f32.partialorder %v991_v48, 0.0  ;;  %v1269_v12 = vmul.f32 0.2, %v991_v48 }
 0x4da   :  { %v3444_v32 = vpop.f32.mrf.mxu3 }
 0x4db   :  { %v3360_v55 = vpop.f32.mrf.mxu2  ;;  %v9652_v58 = vadd.f32 %v3444_v32, %v3356_v51  ;;  %v7923_v51 = vld [vmem:[%s10428_s3 + $0x60] sm:$0xff] }
 0x4dc   :  { %v3361_v31 = vadd.f32 %v3360_v55, %v3272_v41  ;;  %v3278_v56 = vpop.f32.mrf.mxu1  ;;  %v8613_v41 = vld [vmem:[#allocation2 + $0x160] sm:$0xff]  ;;  %4768 = vmatpush.bf16.msrb.mxu2 %v7923_v51  ;;  %v8615_v51 = vld [vmem:[#allocation2 + $0x170] sm:$0xff] }
 0x4e2   :  { %v3446_v10 = vpop.f32.mrf.mxu3 }
 0x4e3   :  { %v3362_v5 = vpop.f32.mrf.mxu2  ;;  %v9656_v0 = vadd.f32 %v3446_v10, %v3358_v28  ;;  %v10466_v28 = vld [vmem:[#allocation17_spill] sm:$0xff] }
 0x4e4   :  { %v3363_v8 = vadd.f32 %v3362_v5, %v3274_v25  ;;  %v3281_v43 = vpop.f32.mrf.mxu1  ;;  %v3012_v1 = vadd.f32 %v9529_v17, %v10466_v28  ;;  %v1397_v25 = vsel %vm1141_vm9, %v991_v48, %v1269_v12 }
 0x4e5   :  { %v3282_v60 = vadd.f32 %v3281_v43, %v10465_v39 }
 0x4e6   :  { %v3101_v19 = vadd.f32 %v10467_v14, %v3012_v1  ;;  %v993_v39 = vpop.f32.mrf.mxu0  ;;  %v10470_v1 = vld [vmem:[#allocation23_spill] sm:$0xff] }
 0x4e7   :  { %3507 = vmatmul.bf16.gmra.mxu1 %v8613_v41  ;;  %3675 = vmatmul.bf16.gmra.mxu3 %v8610_v23  ;;  %v1268_v23 = vmul.f32 0.2, %v989_v63 }
 0x4e8   :  { %3591 = vmatmul.bf16.gmra.mxu2 %v8614_v21  ;;  %v3190_v32 = vadd.f32 %v10468_v57, %v3101_v19  ;;  %v994_v21 = vadd.f32 %v9406_v7, %v993_v39  ;;  %v10471_v19 = vld [vmem:[#allocation24_spill] sm:$0xff] }
 0x4e9   :  { %v1396_v55 = vsel %vm1140_vm1, %v989_v63, %v1268_v23 }
 0x4ea   :  { %v3449_v49 = vpop.f32.mrf.mxu3  ;;  %v3279_v42 = vadd.f32 %v3278_v56, %v3190_v32  ;;  %v8355_v5 = vpack.c.bf16 %v1397_v25, %v1396_v55  ;;  %v1270_v28 = vmul.f32 0.2, %v994_v21  ;;  %vm1142_vm10 = vcmp.ge.f32.partialorder %v994_v21, 0.0  ;;  %v8618_v25 = vld [vmem:[#allocation2 + $0x178] sm:$0xff] }
 0x4eb   :  { %v3365_v3 = vpop.f32.mrf.mxu2  ;;  %v9669_v9 = vadd.f32 %v3449_v49, %v3361_v31 }
 0x4ec   :  { %v3366_v11 = vadd.f32 %v3365_v3, %v3277_v15  ;;  %v3283_v52 = vpop.f32.mrf.mxu1  ;;  %8547 = vst [vmem:[#allocation2 + $0x288] sm:$0xff] %v8355_v5   ;;  %v1398_v48 = vsel %vm1142_vm10, %v994_v21, %v1270_v28 }
 0x4f2   :  { %v3451_v31 = vpop.f32.mrf.mxu3 }
 0x4f3   :  { %v3367_v16 = vpop.f32.mrf.mxu2  ;;  %v9676_v4 = vadd.f32 %v3451_v31, %v3363_v8  ;;  %v10469_v8 = vld [vmem:[#allocation20_spill] sm:$0xff] }
 0x4f4   :  { %v3368_v15 = vadd.f32 %v3367_v16, %v3279_v42  ;;  %v3286_v10 = vpop.f32.mrf.mxu1  ;;  %v3017_v63 = vadd.f32 %v9529_v17, %v10469_v8  ;;  %v7922_v31 = vld [vmem:[%s10428_s3 + $0x58] sm:$0xff]  ;;  %v8617_v16 = vld [vmem:[#allocation2 + $0x1e0] sm:$0xff] }
 0x4f5   :  { %v3287_v43 = vadd.f32 %v3286_v10, %v9437_v53  ;;  %4769 = vmatpush.bf16.msrb.mxu2 %v7922_v31 }
 0x4f6   :  { %v3106_v23 = vadd.f32 %v10470_v1, %v3017_v63 }
 0x4f7   :  { %3512 = vmatmul.bf16.gmra.mxu1 %v8615_v51  ;;  %3680 = vmatmul.bf16.gmra.mxu3 %v8613_v41  ;;  %v995_v41 = vpop.f32.mrf.mxu0 }
 0x4f8   :  { %3596 = vmatmul.bf16.gmra.mxu2 %v8616_v44  ;;  %v996_v14 = vadd.f32 %v9406_v7, %v995_v41  ;;  %v3195_v29 = vadd.f32 %v10471_v19, %v3106_v23 }
 0x4fa   :  { %v3454_v56 = vpop.f32.mrf.mxu3  ;;  %vm1143_vm11 = vcmp.ge.f32.partialorder %v996_v14, 0.0  ;;  %v3284_v57 = vadd.f32 %v3283_v52, %v3195_v29  ;;  %v7930_v52 = vld [vmem:[%s10428_s3 + $0x98] sm:$0xff] }
 0x4fb   :  { %v3370_v38 = vpop.f32.mrf.mxu2  ;;  %v9680_v36 = vadd.f32 %v3454_v56, %v3366_v11  ;;  %v1271_v11 = vmul.f32 0.2, %v996_v14  ;;  %4798 = vmatpush.bf16.msrb.mxu3 %v7930_v52 }
 0x4fc   :  { %v3371_v49 = vadd.f32 %v3370_v38, %v3282_v60  ;;  %v3288_v3 = vpop.f32.mrf.mxu1 }
 0x4fd   :  { %v3289_v53 = vadd.f32 %v3288_v3, %v9442_v54  ;;  %v1399_v60 = vsel %vm1143_vm11, %v996_v14, %v1271_v11  ;;  %v8622_v11 = vld [vmem:[#allocation2 + $0x1e8] sm:$0xff] }
 0x4fe   :  { %v8360_v42 = vpack.c.bf16 %v1399_v60, %v1398_v48  ;;  %v8620_v48 = vld [vmem:[#allocation2 + $0x1f0] sm:$0xff] }
 0x4ff   :  { %v998_v7 = vpop.f32.mrf.mxu0 }
 0x500   :  { %8548 = vst [vmem:[#allocation2 + $0x290] sm:$0xff] %v8360_v42  }
 0x502   :  { %v3456_v32 = vpop.f32.mrf.mxu3 }
 0x503   :  { %v3372_v55 = vpop.f32.mrf.mxu2  ;;  %v9688_v17 = vadd.f32 %v3456_v32, %v3368_v15  ;;  %v7914_v15 = vld [vmem:[%s10428_s3 + $0x18] sm:$0xff] }
 0x504   :  { %v3373_v12 = vadd.f32 %v3372_v55, %v3284_v57  ;;  %v9690_v54 = vpop.f32.mrf.mxu1  ;;  %4740 = vmatpush.bf16.msrb.mxu1 %v7914_v15 }
 0x507   :  { %3517 = vmatmul.bf16.gmra.mxu1 %v8617_v16  ;;  %3685 = vmatmul.bf16.gmra.mxu3 %v8615_v51  ;;  %v9706_v51 = vld [vmem:[%s10424_s5] ss:$0 sm:$0xff]  ;;  %v1000_v8 = vpop.f32.mrf.mxu0 }
 0x508   :  { %3601 = vmatmul.bf16.gmra.mxu2 %v8618_v25  ;;  %v999_v44 = vadd.f32 %v9706_v51, %v998_v7  ;;  %v1001_v63 = vadd.f32 %v9706_v51, %v1000_v8 }
 0x50a   :  { %v3459_v10 = vpop.f32.mrf.mxu3  ;;  %v1272_v38 = vmul.f32 0.2, %v999_v44  ;;  %vm1144_vm12 = vcmp.ge.f32.partialorder %v999_v44, 0.0  ;;  %vm1145_vm13 = vcmp.ge.f32.partialorder %v1001_v63, 0.0  ;;  %v1273_v23 = vmul.f32 0.2, %v1001_v63 }
 0x50b   :  { %v3375_v5 = vpop.f32.mrf.mxu2  ;;  %v9701_v39 = vadd.f32 %v3459_v10, %v3371_v49  ;;  %v8623_v10 = vld [vmem:[#allocation2 + $0x200] sm:$0xff] }
 0x50c   :  { %v3376_v21 = vadd.f32 %v3375_v5, %v3287_v43  ;;  %v3480_v56 = vpop.f32.mrf.mxu1  ;;  %v1400_v49 = vsel %vm1144_vm12, %v999_v44, %v1272_v38  ;;  %v1401_v19 = vsel %vm1145_vm13, %v1001_v63, %v1273_v23  ;;  %v8621_v43 = vld [vmem:[#allocation2 + $0x180] sm:$0xff]  ;;  %v3479_v38 = vadd.f32 %v9690_v54, %v9457_v62  ;;  %v7913_v62 = vld [vmem:[%s10428_s3 + $0x10] sm:$0xff] }
 0x50d   :  { %v8365_v29 = vpack.c.bf16 %v1401_v19, %v1400_v49  ;;  %v7921_v19 = vld [vmem:[%s10428_s3 + $0x50] sm:$0xff]  ;;  %v3481_v54 = vadd.f32 %v3480_v56, %v9462_v47  ;;  %4741 = vmatpush.bf16.msrb.mxu1 %v7913_v62 }
 0x50e   :  { %4770 = vmatpush.bf16.msrb.mxu2 %v7921_v19 }
 0x50f   :  { %8549 = vst [vmem:[#allocation2 + $0x298] sm:$0xff] %v8365_v29   ;;  %v7929_v29 = vld [vmem:[%s10428_s3 + $0x90] sm:$0xff] }
 0x510   :  { %4799 = vmatpush.bf16.msrb.mxu3 %v7929_v29 }
 0x512   :  { %v3461_v3 = vpop.f32.mrf.mxu3 }
 0x513   :  { %v3377_v28 = vpop.f32.mrf.mxu2  ;;  %v9710_v1 = vadd.f32 %v3461_v3, %v3373_v12  ;;  %v1003_v12 = vpop.f32.mrf.mxu0 }
 0x514   :  { %v3378_v41 = vadd.f32 %v3377_v28, %v3289_v53  ;;  %v9712_v14 = vpop.f32.mrf.mxu1  ;;  %v1004_v53 = vadd.f32 %v9706_v51, %v1003_v12 }
 0x516   :  { %v1274_v16 = vmul.f32 0.2, %v1004_v53  ;;  %vm1146_vm14 = vcmp.ge.f32.partialorder %v1004_v53, 0.0 }
 0x517   :  { %3522 = vmatmul.bf16.gmra.mxu1 %v8620_v48  ;;  %3690 = vmatmul.bf16.gmra.mxu3 %v8621_v43 }
 0x518   :  { %3606 = vmatmul.bf16.gmra.mxu2 %v8622_v11  ;;  %v1402_v5 = vsel %vm1146_vm14, %v1004_v53, %v1274_v16  ;;  %v9742_v16 = vld [vmem:[%s10424_s5 + $0x3] ss:$0 sm:$0xff] }
 0x51a   :  { %v3464_v57 = vpop.f32.mrf.mxu3 }
 0x51b   :  { %v9714_v32 = vadd.f32 %v3464_v57, %v3376_v21  ;;  %v3567_v55 = vpop.f32.mrf.mxu2  ;;  %v1005_v52 = vpop.f32.mrf.mxu0  ;;  %v8624_v21 = vld [vmem:[#allocation2 + $0x1f8] sm:$0xff] }
 0x51c   :  { %v9716_v60 = vpop.f32.mrf.mxu1  ;;  %v1006_v15 = vadd.f32 %v9706_v51, %v1005_v52  ;;  %v3568_v28 = vadd.f32 %v3567_v55, %v3479_v38 }
 0x51e   :  { %vm1147_vm15 = vcmp.ge.f32.partialorder %v1006_v15, 0.0  ;;  %v1275_v44 = vmul.f32 0.2, %v1006_v15 }
 0x520   :  { %v1403_v8 = vsel %vm1147_vm15, %v1006_v15, %v1275_v44  ;;  %v8625_v44 = vld [vmem:[#allocation2 + $0x210] sm:$0xff] }
 0x521   :  { %v8370_v3 = vpack.c.bf16 %v1403_v8, %v1402_v5 }
 0x522   :  { %v3466_v42 = vpop.f32.mrf.mxu3 }
 0x523   :  { %v9719_v31 = vadd.f32 %v3466_v42, %v3378_v41  ;;  %v3569_v7 = vpop.f32.mrf.mxu2  ;;  %8550 = vst [vmem:[#allocation2 + $0x2a0] sm:$0xff] %v8370_v3   ;;  %v1008_v41 = vpop.f32.mrf.mxu0  ;;  %v8626_v3 = vld [vmem:[#allocation2 + $0x208] sm:$0xff] }
 0x524   :  { %v9721_v25 = vpop.f32.mrf.mxu1  ;;  %v1009_v43 = vadd.f32 %v9706_v51, %v1008_v41  ;;  %v3570_v11 = vadd.f32 %v3569_v7, %v3481_v54 }
 0x526   :  { %v1276_v42 = vmul.f32 0.2, %v1009_v43  ;;  %vm1148_vm2 = vcmp.ge.f32.partialorder %v1009_v43, 0.0 }
 0x527   :  { %3527 = vmatmul.bf16.gmra.mxu1 %v8623_v10  ;;  %3695 = vmatmul.bf16.gmra.mxu3 %v8620_v48 }
 0x528   :  { %3611 = vmatmul.bf16.gmra.mxu2 %v8624_v21  ;;  %v1404_v21 = vsel %vm1148_vm2, %v1009_v43, %v1276_v42 }
 0x52a   :  { %v3656_v63 = vpop.f32.mrf.mxu3 }
 0x52b   :  { %v3572_v49 = vpop.f32.mrf.mxu2  ;;  %v3657_v48 = vadd.f32 %v3656_v63, %v3568_v28  ;;  %v1010_v15 = vpop.f32.mrf.mxu0  ;;  %v3484_v28 = vadd.f32 %v9712_v14, %v9468_v45 }
 0x52c   :  { %v9726_v23 = vpop.f32.mrf.mxu1  ;;  %v1011_v7 = vadd.f32 %v9706_v51, %v1010_v15 }
 0x52d   :  { %v3768_v57 = vmul.f32 0.2, %v3657_v48  ;;  %vm3736_vm0 = vcmp.ge.f32.partialorder %v3657_v48, 0.0  ;;  %v3573_v62 = vadd.f32 %v3572_v49, %v3484_v28  ;;  %v3489_v28 = vadd.f32 %v9721_v25, %v9488_v34  ;;  %v7912_v34 = vld [vmem:[%s10428_s3 + $0x8] sm:$0xff] }
 0x52e   :  { %vm1149_vm4 = vcmp.ge.f32.partialorder %v1011_v7, 0.0  ;;  %v1277_v38 = vmul.f32 0.2, %v1011_v7  ;;  %4742 = vmatpush.bf16.msrb.mxu1 %v7912_v34 }
 0x52f   :  { %v3800_v47 = vsel %vm3736_vm0, %v3657_v48, %v3768_v57  ;;  %v3486_v57 = vadd.f32 %v9716_v60, %v9473_v22 }
 0x530   :  { %v3837_v8 = vadd.f32 %v9742_v16, %v3800_v47  ;;  %v1405_v41 = vsel %vm1149_vm4, %v1011_v7, %v1277_v38  ;;  %v7805_v47 = vld [vmem:[#allocation2 + $0x280] sm:$0xff] }
 0x531   :  { %v8375_v48 = vpack.c.bf16 %v1405_v41, %v1404_v21 }
 0x532   :  { %v3658_v55 = vpop.f32.mrf.mxu3 }
 0x533   :  { %v3574_v12 = vpop.f32.mrf.mxu2  ;;  %v3659_v53 = vadd.f32 %v3658_v55, %v3570_v11  ;;  %v1013_v43 = vpop.f32.mrf.mxu0  ;;  %8551 = vst [vmem:[#allocation2 + $0x2a8] sm:$0xff] %v8375_v48  }
 0x534   :  { %v9744_v52 = vpop.f32.mrf.mxu1  ;;  %v1014_v55 = vadd.f32 %v9706_v51, %v1013_v43 }
 0x535   :  { %vm3737_vm3 = vcmp.ge.f32.partialorder %v3659_v53, 0.0  ;;  %v3769_v56 = vmul.f32 0.2, %v3659_v53 }
 0x536   :  { %v1278_v49 = vmul.f32 0.2, %v1014_v55  ;;  %vm1150_vm6 = vcmp.ge.f32.partialorder %v1014_v55, 0.0 }
 0x537   :  { %v3801_v5 = vsel %vm3737_vm3, %v3659_v53, %v3769_v56  ;;  %3532 = vmatmul.bf16.gmra.mxu1 %v8625_v44  ;;  %3700 = vmatmul.bf16.gmra.mxu3 %v8623_v10  ;;  %v3575_v53 = vadd.f32 %v3574_v12, %v3486_v57  ;;  %v7920_v57 = vld [vmem:[%s10428_s3 + $0x48] sm:$0xff] }
 0x538   :  { %v3838_v63 = vadd.f32 %v9742_v16, %v3801_v5  ;;  %3616 = vmatmul.bf16.gmra.mxu2 %v8626_v3  ;;  %v1406_v60 = vsel %vm1150_vm6, %v1014_v55, %v1278_v49  ;;  %v8627_v3 = vld [vmem:[#allocation2 + $0x218] sm:$0xff]  ;;  %v7928_v55 = vld [vmem:[%s10428_s3 + $0x88] sm:$0xff] }
 0x539   :  { %4771 = vmatpush.bf16.msrb.mxu2 %v7920_v57  ;;  %4800 = vmatpush.bf16.msrb.mxu3 %v7928_v55 }
 0x53a   :  { %v8395_v19 = vpack.c.bf16 %v3838_v63, %v3837_v8  ;;  %v3661_v29 = vpop.f32.mrf.mxu3 }
 0x53b   :  { %v3577_v54 = vpop.f32.mrf.mxu2  ;;  %v3662_v11 = vadd.f32 %v3661_v29, %v3573_v62  ;;  %v1015_v7 = vpop.f32.mrf.mxu0 }
 0x53c   :  { %8396 = vst [vmem:[#allocation3 + $0x38] sm:$0xff] %v8395_v19   ;;  %v9751_v10 = vpop.f32.mrf.mxu1  ;;  %v1016_v38 = vadd.f32 %v9706_v51, %v1015_v7  ;;  %v3578_v62 = vadd.f32 %v3577_v54, %v3489_v28  ;;  %v3491_v54 = vadd.f32 %v9726_v23, %v9493_v20  ;;  %v7806_v23 = vld [vmem:[#allocation2 + $0x288] sm:$0xff] }
 0x53d   :  { %v3770_v42 = vmul.f32 0.2, %v3662_v11  ;;  %vm3738_vm5 = vcmp.ge.f32.partialorder %v3662_v11, 0.0 }
 0x53e   :  { %vm1151_vm8 = vcmp.ge.f32.partialorder %v1016_v38, 0.0  ;;  %v1279_v12 = vmul.f32 0.2, %v1016_v38 }
 0x53f   :  { %v3802_v5 = vsel %vm3738_vm5, %v3662_v11, %v3770_v42 }
 0x540   :  { %v3839_v8 = vadd.f32 %v9742_v16, %v3802_v5  ;;  %v1407_v41 = vsel %vm1151_vm8, %v1016_v38, %v1279_v12 }
 0x541   :  { %v8380_v48 = vpack.c.bf16 %v1407_v41, %v1406_v60  ;;  %v7807_v60 = vld [vmem:[#allocation2 + $0x290] sm:$0xff]  ;;  %v3494_v41 = vadd.f32 %v9744_v52, %v9502_v40  ;;  %v3496_v40 = vadd.f32 %v9751_v10, %v9507_v50  ;;  %v7808_v50 = vld [vmem:[#allocation2 + $0x298] sm:$0xff] }
 0x542   :  { %v3663_v45 = vpop.f32.mrf.mxu3 }
 0x543   :  { %v3579_v14 = vpop.f32.mrf.mxu2  ;;  %v3664_v15 = vadd.f32 %v3663_v45, %v3575_v53  ;;  %v1018_v11 = vpop.f32.mrf.mxu0  ;;  %8552 = vst [vmem:[#allocation2 + $0x2b0] sm:$0xff] %v8380_v48  }
 0x544   :  { %v9756_v56 = vpop.f32.mrf.mxu1  ;;  %v1019_v53 = vadd.f32 %v9706_v51, %v1018_v11  ;;  %v3580_v42 = vadd.f32 %v3579_v14, %v3491_v54  ;;  %v8628_v14 = vld [vmem:[#allocation2 + $0x220] sm:$0xff] }
 0x545   :  { %vm3739_vm7 = vcmp.ge.f32.partialorder %v3664_v15, 0.0  ;;  %v3771_v21 = vmul.f32 0.2, %v3664_v15 }
 0x546   :  { %v1280_v7 = vmul.f32 0.2, %v1019_v53  ;;  %vm1152_vm9 = vcmp.ge.f32.partialorder %v1019_v53, 0.0 }
 0x547   :  { %v3803_v22 = vsel %vm3739_vm7, %v3664_v15, %v3771_v21  ;;  %3537 = vmatmul.bf16.gmra.mxu1 %v7805_v47  ;;  %3705 = vmatmul.bf16.gmra.mxu3 %v8625_v44 }
 0x548   :  { %v3840_v63 = vadd.f32 %v9742_v16, %v3803_v22  ;;  %3621 = vmatmul.bf16.gmra.mxu2 %v8627_v3 }
 0x54a   :  { %v8400_v19 = vpack.c.bf16 %v3840_v63, %v3839_v8  ;;  %v3666_v29 = vpop.f32.mrf.mxu3  ;;  %v1408_v8 = vsel %vm1152_vm9, %v1019_v53, %v1280_v7 }
 0x54b   :  { %v3582_v43 = vpop.f32.mrf.mxu2  ;;  %v3667_v25 = vadd.f32 %v3666_v29, %v3578_v62  ;;  %v1020_v21 = vpop.f32.mrf.mxu0 }
 0x54c   :  { %8555 = vst [vmem:[#allocation3 + $0x40] sm:$0xff] %v8400_v19   ;;  %v9763_v44 = vpop.f32.mrf.mxu1  ;;  %v1021_v20 = vadd.f32 %v9706_v51, %v1020_v21  ;;  %v3583_v11 = vadd.f32 %v3582_v43, %v3494_v41 }
 0x54d   :  { %v3772_v45 = vmul.f32 0.2, %v3667_v25  ;;  %vm3740_vm1 = vcmp.ge.f32.partialorder %v3667_v25, 0.0 }
 0x54e   :  { %vm1153_vm11 = vcmp.ge.f32.partialorder %v1021_v20, 0.0  ;;  %v1281_v63 = vmul.f32 0.2, %v1021_v20 }
 0x54f   :  { %v3804_v38 = vsel %vm3740_vm1, %v3667_v25, %v3772_v45  ;;  %v8042_v25 = vld [vmem:[%s10427_s4 + $0x190] sm:$0xff] }
 0x550   :  { %v3841_v3 = vadd.f32 %v9742_v16, %v3804_v38  ;;  %v1409_v19 = vsel %vm1153_vm11, %v1021_v20, %v1281_v63  ;;  %5806 = vmatpush.bf16.msrb.mxu0 %v8042_v25  ;;  %v7809_v20 = vld [vmem:[#allocation2 + $0x2a0] sm:$0xff]  ;;  %v3499_v63 = vadd.f32 %v9756_v56, %v9524_v6 }
 0x551   :  { %v8385_v62 = vpack.c.bf16 %v1409_v19, %v1408_v8  ;;  %v7927_v6 = vld [vmem:[%s10428_s3 + $0x80] sm:$0xff] }
 0x552   :  { %v3668_v15 = vpop.f32.mrf.mxu3  ;;  %4801 = vmatpush.bf16.msrb.mxu3 %v7927_v6 }
 0x553   :  { %v3584_v47 = vpop.f32.mrf.mxu2  ;;  %v3669_v49 = vadd.f32 %v3668_v15, %v3580_v42  ;;  %v1023_v34 = vpop.f32.mrf.mxu0  ;;  %8553 = vst [vmem:[#allocation2 + $0x2b8] sm:$0xff] %v8385_v62   ;;  %v7919_v62 = vld [vmem:[%s10428_s3 + $0x40] sm:$0xff] }
 0x554   :  { %v9777_v5 = vpop.f32.mrf.mxu1  ;;  %v1024_v52 = vadd.f32 %v9706_v51, %v1023_v34  ;;  %v3585_v53 = vadd.f32 %v3584_v47, %v3496_v40  ;;  %4772 = vmatpush.bf16.msrb.mxu2 %v7919_v62 }
 0x555   :  { %vm3741_vm10 = vcmp.ge.f32.partialorder %v3669_v49, 0.0  ;;  %v3773_v22 = vmul.f32 0.2, %v3669_v49 }
 0x556   :  { %vm1154_vm13 = vcmp.ge.f32.partialorder %v1024_v52, 0.0 }
 0x557   :  { %v3805_v12 = vsel %vm3741_vm10, %v3669_v49, %v3773_v22  ;;  %3542 = vmatmul.bf16.gmra.mxu1 %v7807_v60  ;;  %3710 = vmatmul.bf16.gmra.mxu3 %v8628_v14  ;;  %v1282_v49 = vmul.f32 0.2, %v1024_v52 }
 0x558   :  { %v3842_v28 = vadd.f32 %v9742_v16, %v3805_v12  ;;  %3626 = vmatmul.bf16.gmra.mxu2 %v7806_v23 }
 0x559   :  { %v1410_v47 = vsel %vm1154_vm13, %v1024_v52, %v1282_v49 }
 0x55a   :  { %v8405_v29 = vpack.c.bf16 %v3842_v28, %v3841_v3  ;;  %v3671_v48 = vpop.f32.mrf.mxu3 }
 0x55b   :  { %v3587_v57 = vpop.f32.mrf.mxu2  ;;  %v3672_v54 = vadd.f32 %v3671_v48, %v3583_v11  ;;  %v1025_v21 = vpop.f32.mrf.mxu0  ;;  %v3501_v11 = vadd.f32 %v9763_v44, %v9535_v2  ;;  %v3504_v44 = vadd.f32 %v9777_v5, %v9542_v35 }
 0x55c   :  { %8556 = vst [vmem:[#allocation3 + $0x48] sm:$0xff] %v8405_v29   ;;  %v9784_v55 = vpop.f32.mrf.mxu1  ;;  %v1026_v23 = vadd.f32 %v9706_v51, %v1025_v21  ;;  %v7911_v51 = vld [vmem:[%s10428_s3] sm:$0xff] }
 0x55d   :  { %v3774_v42 = vmul.f32 0.2, %v3672_v54  ;;  %vm3742_vm12 = vcmp.ge.f32.partialorder %v3672_v54, 0.0  ;;  %4743 = vmatpush.bf16.msrb.mxu1 %v7911_v51 }
 0x55e   :  { %vm1155_vm15 = vcmp.ge.f32.partialorder %v1026_v23, 0.0  ;;  %v1283_v12 = vmul.f32 0.2, %v1026_v23 }
 0x55f   :  { %v3806_v38 = vsel %vm3742_vm12, %v3672_v54, %v3774_v42 }
 0x560   :  { %v3843_v14 = vadd.f32 %v9742_v16, %v3806_v38  ;;  %v1411_v3 = vsel %vm1155_vm15, %v1026_v23, %v1283_v12 }
 0x561   :  { %v8390_v19 = vpack.c.bf16 %v1411_v3, %v1410_v47  ;;  %v3506_v47 = vadd.f32 %v9784_v55, %v9548_v30  ;;  %v7886_v3 = vld [vmem:[#allocation3] sm:$0xff] }
 0x562   :  { %v3673_v43 = vpop.f32.mrf.mxu3 }
 0x563   :  { %v3589_v45 = vpop.f32.mrf.mxu2  ;;  %v3674_v15 = vadd.f32 %v3673_v43, %v3585_v53  ;;  %8554 = vst [vmem:[#allocation2 + $0x2c0] sm:$0xff] %v8390_v19   ;;  %v7811_v43 = vld [vmem:[#allocation2 + $0x2b0] sm:$0xff] }
 0x564   :  { %v9792_v7 = vpop.f32.mrf.mxu1 }
 0x565   :  { %vm3743_vm14 = vcmp.ge.f32.partialorder %v3674_v15, 0.0  ;;  %v3775_v22 = vmul.f32 0.2, %v3674_v15  ;;  %v3509_v55 = vadd.f32 %v9792_v7, %v9564_v61  ;;  %v7942_v61 = vld [vmem:[%s10428_s3 + $0xf8] sm:$0xff] }
 0x566   :  { %4823 = vmatpush.bf16.msra.mxu1 %v7942_v61 }
 0x567   :  { %v3807_v10 = vsel %vm3743_vm14, %v3674_v15, %v3775_v22  ;;  %3547 = vmatmul.bf16.gmra.mxu1 %v7809_v20  ;;  %3715 = vmatmul.bf16.gmra.mxu3 %v7807_v60  ;;  %v3588_v60 = vadd.f32 %v3587_v57, %v3499_v63  ;;  %v3590_v57 = vadd.f32 %v3589_v45, %v3501_v11  ;;  %v7810_v15 = vld [vmem:[#allocation2 + $0x2a8] sm:$0xff]  ;;  %v7950_v11 = vld [vmem:[%s10428_s3 + $0x138] sm:$0xff] }
 0x568   :  { %v3844_v8 = vadd.f32 %v9742_v16, %v3807_v10  ;;  %3631 = vmatmul.bf16.gmra.mxu2 %v7808_v50 }
 0x569   :  { %4852 = vmatpush.bf16.msra.mxu2 %v7950_v11  ;;  %v7889_v11 = vld [vmem:[#allocation3 + $0x18] sm:$0xff] }
 0x56a   :  { %v8410_v28 = vpack.c.bf16 %v3844_v8, %v3843_v14  ;;  %v3676_v41 = vpop.f32.mrf.mxu3 }
 0x56b   :  { %v3592_v29 = vpop.f32.mrf.mxu2  ;;  %v3677_v56 = vadd.f32 %v3676_v41, %v3588_v60  ;;  %v7812_v41 = vld [vmem:[#allocation2 + $0x2b8] sm:$0xff] }
 0x56c   :  { %8557 = vst [vmem:[#allocation3 + $0x50] sm:$0xff] %v8410_v28   ;;  %v9802_v48 = vpop.f32.mrf.mxu1  ;;  %v3593_v22 = vadd.f32 %v3592_v29, %v3504_v44 }
 0x56d   :  { %v3776_v34 = vmul.f32 0.2, %v3677_v56  ;;  %vm3744_vm0 = vcmp.ge.f32.partialorder %v3677_v56, 0.0  ;;  %v3511_v7 = vadd.f32 %v9802_v48, %v9570_v27 }
 0x56f   :  { %v3808_v53 = vsel %vm3744_vm0, %v3677_v56, %v3776_v34  ;;  %v7958_v34 = vld [vmem:[%s10428_s3 + $0x178] sm:$0xff] }
 0x570   :  { %v3845_v21 = vadd.f32 %v9742_v16, %v3808_v53  ;;  %4881 = vmatpush.bf16.msra.mxu3 %v7958_v34 }
 0x572   :  { %v3678_v25 = vpop.f32.mrf.mxu3 }
 0x573   :  { %v3594_v54 = vpop.f32.mrf.mxu2  ;;  %v3679_v40 = vadd.f32 %v3678_v25, %v3590_v57  ;;  %v7941_v25 = vld [vmem:[%s10428_s3 + $0xf0] sm:$0xff] }
 0x574   :  { %v9812_v52 = vpop.f32.mrf.mxu1  ;;  %4824 = vmatpush.bf16.msra.mxu1 %v7941_v25 }
 0x575   :  { %vm3745_vm2 = vcmp.ge.f32.partialorder %v3679_v40, 0.0  ;;  %v3777_v42 = vmul.f32 0.2, %v3679_v40 }
 0x577   :  { %v3809_v49 = vsel %vm3745_vm2, %v3679_v40, %v3777_v42  ;;  %3552 = vmatmul.bf16.gmra.mxu1 %v7811_v43  ;;  %3720 = vmatmul.bf16.gmra.mxu3 %v7809_v20  ;;  %v3595_v20 = vadd.f32 %v3594_v54, %v3506_v47  ;;  %v7949_v54 = vld [vmem:[%s10428_s3 + $0x130] sm:$0xff]  ;;  %v3514_v47 = vadd.f32 %v9812_v52, %v9579_v33  ;;  %v7956_v33 = vld [vmem:[%s10428_s3 + $0x168] sm:$0xff] }
 0x578   :  { %v3846_v2 = vadd.f32 %v9742_v16, %v3809_v49  ;;  %3636 = vmatmul.bf16.gmra.mxu2 %v7810_v15  ;;  %v7957_v40 = vld [vmem:[%s10428_s3 + $0x170] sm:$0xff] }
 0x579   :  { %4853 = vmatpush.bf16.msra.mxu2 %v7949_v54  ;;  %v7888_v15 = vld [vmem:[#allocation3 + $0x10] sm:$0xff]  ;;  %4882 = vmatpush.bf16.msra.mxu3 %v7957_v40 }
 0x57a   :  { %v8415_v45 = vpack.c.bf16 %v3846_v2, %v3845_v21  ;;  %v3681_v38 = vpop.f32.mrf.mxu3  ;;  %v7887_v21 = vld [vmem:[#allocation3 + $0x8] sm:$0xff] }
 0x57b   :  { %v3597_v23 = vpop.f32.mrf.mxu2  ;;  %v3682_v10 = vadd.f32 %v3681_v38, %v3593_v22  ;;  %v7940_v2 = vld [vmem:[%s10428_s3 + $0xe8] sm:$0xff]  ;;  %v7813_v38 = vld [vmem:[#allocation2 + $0x2c0] sm:$0xff] }
 0x57c   :  { %8558 = vst [vmem:[#allocation3 + $0x68] sm:$0xff] %v8415_v45   ;;  %v9818_v50 = vpop.f32.mrf.mxu1  ;;  %v3598_v62 = vadd.f32 %v3597_v23, %v3509_v55  ;;  %4825 = vmatpush.bf16.msra.mxu1 %v7940_v2 }
 0x57d   :  { %v3778_v12 = vmul.f32 0.2, %v3682_v10  ;;  %vm3746_vm3 = vcmp.ge.f32.partialorder %v3682_v10, 0.0  ;;  %4883 = vmatpush.bf16.msra.mxu3 %v7956_v33 }
 0x57f   :  { %v3810_v35 = vsel %vm3746_vm3, %v3682_v10, %v3778_v12 }
 0x580   :  { %v3847_v51 = vadd.f32 %v9742_v16, %v3810_v35  ;;  %v7948_v35 = vld [vmem:[%s10428_s3 + $0x128] sm:$0xff] }
 0x581   :  { %4854 = vmatpush.bf16.msra.mxu2 %v7948_v35 }
 0x582   :  { %v3683_v14 = vpop.f32.mrf.mxu3 }
 0x583   :  { %v3599_v8 = vpop.f32.mrf.mxu2  ;;  %v3684_v63 = vadd.f32 %v3683_v14, %v3595_v20  ;;  %v7939_v14 = vld [vmem:[%s10428_s3 + $0xe0] sm:$0xff] }
 0x584   :  { %v9822_v28 = vpop.f32.mrf.mxu1  ;;  %v3600_v53 = vadd.f32 %v3599_v8, %v3511_v7  ;;  %4826 = vmatpush.bf16.msra.mxu1 %v7939_v14 }
 0x585   :  { %vm3747_vm4 = vcmp.ge.f32.partialorder %v3684_v63, 0.0  ;;  %v3779_v5 = vmul.f32 0.2, %v3684_v63  ;;  %v3519_v40 = vadd.f32 %v9822_v28, %v9599_v13  ;;  %v7954_v13 = vld [vmem:[%s10428_s3 + $0x158] sm:$0xff] }
 0x587   :  { %v3811_v19 = vsel %vm3747_vm4, %v3684_v63, %v3779_v5  ;;  %3725 = vmatmul.bf16.gmra.mxu3 %v7811_v43  ;;  %4744 = vmatmul.bf16.vlgmr.msrb.gmra.mxu1 %v7886_v3  ;;  %v7938_v5 = vld [vmem:[%s10428_s3 + $0xd8] sm:$0xff] }
 0x588   :  { %v3848_v30 = vadd.f32 %v9742_v16, %v3811_v19  ;;  %3641 = vmatmul.bf16.gmra.mxu2 %v7812_v41  ;;  %v3516_v41 = vadd.f32 %v9818_v50, %v9583_v24  ;;  %4827 = vmatpush.bf16.msra.mxu1 %v7938_v5  ;;  %v7937_v19 = vld [vmem:[%s10428_s3 + $0xd0] sm:$0xff] }
 0x58a   :  { %v8420_v60 = vpack.c.bf16 %v3848_v30, %v3847_v51  ;;  %v3686_v29 = vpop.f32.mrf.mxu3  ;;  %v7947_v51 = vld [vmem:[%s10428_s3 + $0x120] sm:$0xff] }
 0x58b   :  { %v3602_v6 = vpop.f32.mrf.mxu2  ;;  %v3687_v57 = vadd.f32 %v3686_v29, %v3598_v62  ;;  %v7955_v30 = vld [vmem:[%s10428_s3 + $0x160] sm:$0xff]  ;;  %4855 = vmatpush.bf16.msra.mxu2 %v7947_v51 }
 0x58c   :  { %8559 = vst [vmem:[#allocation3 + $0x70] sm:$0xff] %v8420_v60   ;;  %v9828_v56 = vpop.f32.mrf.mxu1  ;;  %v3603_v8 = vadd.f32 %v3602_v6, %v3514_v47  ;;  %4884 = vmatpush.bf16.msra.mxu3 %v7955_v30  ;;  %v9884_v62 = vld [vmem:[#allocation3 + $0x60] sm:$0xff]  ;;  %4828 = vmatpush.bf16.msra.mxu1 %v7937_v19 }
 0x58d   :  { %v3780_v42 = vmul.f32 0.2, %v3687_v57  ;;  %vm3748_vm5 = vcmp.ge.f32.partialorder %v3687_v57, 0.0  ;;  %v3521_v2 = vadd.f32 %v9828_v56, %v9605_v26  ;;  %v7890_v56 = vld [vmem:[#allocation3 + $0x20] sm:$0xff] }
 0x58e   :  { %v7943_v51 = vld [vmem:[%s10428_s3 + $0x100] sm:$0xff] }
 0x58f   :  { %v3812_v44 = vsel %vm3748_vm5, %v3687_v57, %v3780_v42  ;;  %v7936_v57 = vld [vmem:[%s10428_s3 + $0xc8] sm:$0xff] }
 0x590   :  { %v3849_v23 = vadd.f32 %v9742_v16, %v3812_v44  ;;  %4829 = vmatpush.bf16.msra.mxu1 %v7936_v57  ;;  %4885 = vmatpush.bf16.msra.mxu3 %v7954_v13  ;;  %v7945_v44 = vld [vmem:[%s10428_s3 + $0x110] sm:$0xff] }
 0x592   :  { %v3688_v43 = vpop.f32.mrf.mxu3 }
 0x593   :  { %v3604_v27 = vpop.f32.mrf.mxu2  ;;  %v3689_v48 = vadd.f32 %v3688_v43, %v3600_v53  ;;  %v7935_v43 = vld [vmem:[%s10428_s3 + $0xc0] sm:$0xff] }
 0x594   :  { %v9850_v49 = vpop.f32.mrf.mxu1  ;;  %v3605_v55 = vadd.f32 %v3604_v27, %v3516_v41  ;;  %4830 = vmatpush.bf16.msra.mxu1 %v7935_v43 }
 0x595   :  { %vm3749_vm6 = vcmp.ge.f32.partialorder %v3689_v48, 0.0  ;;  %v3781_v45 = vmul.f32 0.2, %v3689_v48  ;;  %v3524_v5 = vadd.f32 %v9850_v49, %v9612_v46  ;;  %v7951_v49 = vld [vmem:[%s10428_s3 + $0x140] sm:$0xff] }
 0x597   :  { %v3813_v22 = vsel %vm3749_vm6, %v3689_v48, %v3781_v45  ;;  %3730 = vmatmul.bf16.gmra.mxu3 %v7813_v38  ;;  %4749 = vmatmul.bf16.gmra.mxu1 %v7888_v15  ;;  %v7953_v45 = vld [vmem:[%s10428_s3 + $0x150] sm:$0xff] }
 0x598   :  { %v3850_v10 = vadd.f32 %v9742_v16, %v3813_v22  ;;  %4773 = vmatmul.bf16.vlgmr.msrb.gmra.mxu2 %v7887_v21  ;;  %4886 = vmatpush.bf16.msra.mxu3 %v7953_v45 }
 0x59a   :  { %v8425_v20 = vpack.c.bf16 %v3850_v10, %v3849_v23  ;;  %v3691_v12 = vpop.f32.mrf.mxu3  ;;  %v7944_v10 = vld [vmem:[%s10428_s3 + $0x108] sm:$0xff] }
 0x59b   :  { %v3607_v63 = vpop.f32.mrf.mxu2  ;;  %v3692_v52 = vadd.f32 %v3691_v12, %v3603_v8  ;;  %v9920_v8 = vld [vmem:[#allocation3 + $0x70] sm:$0xff] }
 0x59c   :  { %8560 = vst [vmem:[#allocation3 + $0x78] sm:$0xff] %v8425_v20   ;;  %v9862_v3 = vpop.f32.mrf.mxu1  ;;  %v3608_v27 = vadd.f32 %v3607_v63, %v3519_v40  ;;  %v9922_v63 = vld [vmem:[#allocation3 + $0x68] sm:$0xff] }
 0x59d   :  { %v3782_v60 = vmul.f32 0.2, %v3692_v52  ;;  %vm3750_vm7 = vcmp.ge.f32.partialorder %v3692_v52, 0.0  ;;  %v3526_v46 = vadd.f32 %v9862_v3, %v9618_v37 }
 0x59f   :  { %v3814_v34 = vsel %vm3750_vm7, %v3692_v52, %v3782_v60 }
 0x5a0   :  { %v3851_v25 = vadd.f32 %v9742_v16, %v3814_v34 }
 0x5a2   :  { %v3693_v29 = vpop.f32.mrf.mxu3 }
 0x5a3   :  { %v3609_v24 = vpop.f32.mrf.mxu2  ;;  %v3694_v50 = vadd.f32 %v3693_v29, %v3605_v55  ;;  %v7952_v29 = vld [vmem:[%s10428_s3 + $0x148] sm:$0xff] }
 0x5a4   :  { %v9886_v6 = vpop.f32.mrf.mxu1  ;;  %v3610_v38 = vadd.f32 %v3609_v24, %v3521_v2  ;;  %4887 = vmatpush.bf16.msra.mxu3 %v7952_v29  ;;  %v7974_v2 = vld [vmem:[%s10428_s3 + $0x1f8] sm:$0xff] }
 0x5a5   :  { %vm3751_vm8 = vcmp.ge.f32.partialorder %v3694_v50, 0.0  ;;  %v3783_v61 = vmul.f32 0.2, %v3694_v50  ;;  %v3529_v43 = vadd.f32 %v9886_v6, %v9634_v18  ;;  %v7966_v18 = vld [vmem:[%s10428_s3 + $0x1b8] sm:$0xff] }
 0x5a6   :  { %4910 = vmatpush.bf16.msrb.mxu1 %v7966_v18 }
 0x5a7   :  { %v3815_v7 = vsel %vm3751_vm8, %v3694_v50, %v3783_v61  ;;  %4754 = vmatmul.bf16.gmra.mxu1 %v9884_v62  ;;  %4802 = vmatmul.bf16.vlgmr.msrb.gmra.mxu3 %v7888_v15  ;;  %v7946_v15 = vld [vmem:[%s10428_s3 + $0x118] sm:$0xff] }
 0x5a8   :  { %v3852_v54 = vadd.f32 %v9742_v16, %v3815_v7  ;;  %4778 = vmatmul.bf16.gmra.mxu2 %v7889_v11  ;;  %4888 = vmatpush.bf16.msra.mxu3 %v7951_v49  ;;  %v7891_v7 = vld [vmem:[#allocation3 + $0x30] sm:$0xff] }
 0x5a9   :  { %4856 = vmatpush.bf16.msra.mxu2 %v7946_v15 }
 0x5aa   :  { %v8430_v53 = vpack.c.bf16 %v3852_v54, %v3851_v25  ;;  %v3696_v42 = vpop.f32.mrf.mxu3 }
 0x5ab   :  { %v3612_v48 = vpop.f32.mrf.mxu2  ;;  %v3697_v28 = vadd.f32 %v3696_v42, %v3608_v27 }
 0x5ac   :  { %8561 = vst [vmem:[#allocation3 + $0x80] sm:$0xff] %v8430_v53   ;;  %v9899_v21 = vpop.f32.mrf.mxu1  ;;  %v3613_v30 = vadd.f32 %v3612_v48, %v3524_v5  ;;  %v9945_v53 = vld [vmem:[#allocation3 + $0x78] sm:$0xff] }
 0x5ad   :  { %v3784_v22 = vmul.f32 0.2, %v3697_v28  ;;  %vm3752_vm1 = vcmp.ge.f32.partialorder %v3697_v28, 0.0  ;;  %4857 = vmatpush.bf16.msra.mxu2 %v7945_v44  ;;  %v7982_v44 = vld [vmem:[%s10428_s3 + $0x238] sm:$0xff]  ;;  %v3531_v6 = vadd.f32 %v9899_v21, %v9640_v59 }
 0x5ae   :  { %4968 = vmatpush.bf16.msrb.mxu3 %v7982_v44  ;;  %v7892_v5 = vld [vmem:[#allocation3 + $0x38] sm:$0xff] }
 0x5af   :  { %v3816_v12 = vsel %vm3752_vm1, %v3697_v28, %v3784_v22  ;;  %v7973_v22 = vld [vmem:[%s10428_s3 + $0x1f0] sm:$0xff] }
 0x5b0   :  { %v3853_v33 = vadd.f32 %v9742_v16, %v3816_v12  ;;  %v7964_v12 = vld [vmem:[%s10428_s3 + $0x1a8] sm:$0xff] }
 0x5b1   :  { %4858 = vmatpush.bf16.msra.mxu2 %v7944_v10 }
 0x5b2   :  { %v3698_v23 = vpop.f32.mrf.mxu3 }
 0x5b3   :  { %v3614_v47 = vpop.f32.mrf.mxu2  ;;  %v3699_v26 = vadd.f32 %v3698_v23, %v3610_v38  ;;  %v7965_v38 = vld [vmem:[%s10428_s3 + $0x1b0] sm:$0xff] }
 0x5b4   :  { %v9918_v20 = vpop.f32.mrf.mxu1  ;;  %v3615_v50 = vadd.f32 %v3614_v47, %v3526_v46  ;;  %v7981_v23 = vld [vmem:[%s10428_s3 + $0x230] sm:$0xff]  ;;  %4911 = vmatpush.bf16.msrb.mxu1 %v7965_v38 }
 0x5b5   :  { %vm3753_vm9 = vcmp.ge.f32.partialorder %v3699_v26, 0.0  ;;  %v3785_v14 = vmul.f32 0.2, %v3699_v26  ;;  %4859 = vmatpush.bf16.msra.mxu2 %v7943_v51  ;;  %4969 = vmatpush.bf16.msrb.mxu3 %v7981_v23  ;;  %v7959_v23 = vld [vmem:[%s10428_s3 + $0x180] sm:$0xff] }
 0x5b7   :  { %v3817_v35 = vsel %vm3753_vm9, %v3699_v26, %v3785_v14  ;;  %4759 = vmatmul.bf16.gmra.mxu1 %v9920_v8  ;;  %4807 = vmatmul.bf16.gmra.mxu3 %v7890_v56 }
 0x5b8   :  { %v3854_v52 = vadd.f32 %v9742_v16, %v3817_v35  ;;  %4783 = vmatmul.bf16.gmra.mxu2 %v9922_v63  ;;  %4912 = vmatpush.bf16.msrb.mxu1 %v7964_v12  ;;  %v7969_v12 = vld [vmem:[%s10428_s3 + $0x1d0] sm:$0xff] }
 0x5b9   :  { %4939 = vmatpush.bf16.msrb.mxu2 %v7974_v2  ;;  %v7894_v2 = vld [vmem:[#allocation3 + $0x48] sm:$0xff] }
 0x5ba   :  { %v8435_v41 = vpack.c.bf16 %v3854_v52, %v3853_v33  ;;  %v3701_v19 = vpop.f32.mrf.mxu3  ;;  %v9980_v33 = vld [vmem:[#allocation3 + $0x80] sm:$0xff] }
 0x5bb   :  { %v3617_v55 = vpop.f32.mrf.mxu2  ;;  %v3702_v24 = vadd.f32 %v3701_v19, %v3613_v30  ;;  %v7893_v52 = vld [vmem:[#allocation3 + $0x40] sm:$0xff]  ;;  %v3534_v30 = vadd.f32 %v9918_v20, %v9652_v58  ;;  %v7980_v58 = vld [vmem:[%s10428_s3 + $0x228] sm:$0xff]  ;;  %v7962_v20 = vld [vmem:[%s10428_s3 + $0x198] sm:$0xff] }
 0x5bc   :  { %8562 = vst [vmem:[#allocation3 + $0x98] sm:$0xff] %v8435_v41   ;;  %v9933_v60 = vpop.f32.mrf.mxu1  ;;  %v3618_v15 = vadd.f32 %v3617_v55, %v3529_v43  ;;  %4970 = vmatpush.bf16.msrb.mxu3 %v7980_v58  ;;  %v7901_v43 = vld [vmem:[#allocation3 + $0x90] sm:$0xff] }
 0x5bd   :  { %v3786_v11 = vmul.f32 0.2, %v3702_v24  ;;  %vm3754_vm10 = vcmp.ge.f32.partialorder %v3702_v24, 0.0  ;;  %4940 = vmatpush.bf16.msrb.mxu2 %v7973_v22 }
 0x5bf   :  { %v3818_v54 = vsel %vm3754_vm10, %v3702_v24, %v3786_v11  ;;  %v7963_v24 = vld [vmem:[%s10428_s3 + $0x1a0] sm:$0xff]  ;;  %v7972_v11 = vld [vmem:[%s10428_s3 + $0x1e8] sm:$0xff] }
 0x5c0   :  { %v3855_v3 = vadd.f32 %v9742_v16, %v3818_v54  ;;  %4913 = vmatpush.bf16.msrb.mxu1 %v7963_v24  ;;  %v7971_v54 = vld [vmem:[%s10428_s3 + $0x1e0] sm:$0xff] }
 0x5c1   :  { %4941 = vmatpush.bf16.msrb.mxu2 %v7972_v11 }
 0x5c2   :  { %v3703_v57 = vpop.f32.mrf.mxu3 }
 0x5c3   :  { %v3619_v34 = vpop.f32.mrf.mxu2  ;;  %v3704_v61 = vadd.f32 %v3703_v57, %v3615_v50  ;;  %v7902_v24 = vld [vmem:[#allocation3 + $0x98] sm:$0xff] }
 0x5c4   :  { %v9943_v25 = vpop.f32.mrf.mxu1  ;;  %v3620_v10 = vadd.f32 %v3619_v34, %v3531_v6  ;;  %v8041_v34 = vld [vmem:[%s10427_s4 + $0x188] sm:$0xff]  ;;  %4914 = vmatpush.bf16.msrb.mxu1 %v7962_v20 }
 0x5c5   :  { %vm3755_vm11 = vcmp.ge.f32.partialorder %v3704_v61, 0.0  ;;  %v3787_v40 = vmul.f32 0.2, %v3704_v61  ;;  %5807 = vmatpush.bf16.msrb.mxu0 %v8041_v34  ;;  %4942 = vmatpush.bf16.msrb.mxu2 %v7971_v54  ;;  %v3539_v6 = vadd.f32 %v9943_v25, %v9669_v9  ;;  %v7978_v9 = vld [vmem:[%s10428_s3 + $0x218] sm:$0xff]  ;;  %v7967_v34 = vld [vmem:[%s10428_s3 + $0x1c0] sm:$0xff] }
 0x5c7   :  { %v3819_v37 = vsel %vm3755_vm11, %v3704_v61, %v3787_v40  ;;  %4812 = vmatmul.bf16.gmra.mxu3 %v9920_v8  ;;  %4831 = vmatmul.bf16.vlgmr.msra.gmra.mxu1 %v7891_v7  ;;  %v3536_v61 = vadd.f32 %v9933_v60, %v9656_v0  ;;  %v7961_v7 = vld [vmem:[%s10428_s3 + $0x190] sm:$0xff]  ;;  %v7979_v40 = vld [vmem:[%s10428_s3 + $0x220] sm:$0xff] }
 0x5c8   :  { %v3856_v42 = vadd.f32 %v9742_v16, %v3819_v37  ;;  %4788 = vmatmul.bf16.gmra.mxu2 %v9945_v53  ;;  %4971 = vmatpush.bf16.msrb.mxu3 %v7979_v40 }
 0x5c9   :  { %4915 = vmatpush.bf16.msrb.mxu1 %v7961_v7 }
 0x5ca   :  { %v8440_v27 = vpack.c.bf16 %v3856_v42, %v3855_v3  ;;  %v3706_v48 = vpop.f32.mrf.mxu3 }
 0x5cb   :  { %v3622_v13 = vpop.f32.mrf.mxu2  ;;  %v3707_v45 = vadd.f32 %v3706_v48, %v3618_v15  ;;  %v7960_v48 = vld [vmem:[%s10428_s3 + $0x188] sm:$0xff] }
 0x5cc   :  { %8563 = vst [vmem:[#allocation3 + $0xa0] sm:$0xff] %v8440_v27   ;;  %v9953_v28 = vpop.f32.mrf.mxu1  ;;  %v3623_v46 = vadd.f32 %v3622_v13, %v3534_v30  ;;  %4972 = vmatpush.bf16.msrb.mxu3 %v7978_v9 }
 0x5cd   :  { %v3788_v47 = vmul.f32 0.2, %v3707_v45  ;;  %vm3756_vm12 = vcmp.ge.f32.partialorder %v3707_v45, 0.0  ;;  %4916 = vmatpush.bf16.msrb.mxu1 %v7960_v48 }
 0x5cf   :  { %v3820_v14 = vsel %vm3756_vm12, %v3707_v45, %v3788_v47 }
 0x5d0   :  { %v3857_v19 = vadd.f32 %v9742_v16, %v3820_v14  ;;  %v7977_v14 = vld [vmem:[%s10428_s3 + $0x210] sm:$0xff] }
 0x5d1   :  { %4917 = vmatpush.bf16.msrb.mxu1 %v7959_v23  ;;  %4973 = vmatpush.bf16.msrb.mxu3 %v7977_v14 }
 0x5d2   :  { %v3708_v26 = vpop.f32.mrf.mxu3 }
 0x5d3   :  { %v3624_v59 = vpop.f32.mrf.mxu2  ;;  %v3709_v21 = vadd.f32 %v3708_v26, %v3620_v10 }
 0x5d4   :  { %v9975_v56 = vpop.f32.mrf.mxu1  ;;  %v3625_v37 = vadd.f32 %v3624_v59, %v3536_v61  ;;  %v7970_v59 = vld [vmem:[%s10428_s3 + $0x1d8] sm:$0xff] }
 0x5d5   :  { %vm3757_vm13 = vcmp.ge.f32.partialorder %v3709_v21, 0.0  ;;  %v3789_v35 = vmul.f32 0.2, %v3709_v21  ;;  %4943 = vmatpush.bf16.msrb.mxu2 %v7970_v59  ;;  %v3544_v58 = vadd.f32 %v9975_v56, %v9680_v36  ;;  %v7975_v56 = vld [vmem:[%s10428_s3 + $0x200] sm:$0xff] }
 0x5d7   :  { %v3821_v41 = vsel %vm3757_vm13, %v3709_v21, %v3789_v35  ;;  %4817 = vmatmul.bf16.gmra.mxu3 %v9980_v33  ;;  %4836 = vmatmul.bf16.gmra.mxu1 %v7893_v52  ;;  %v3541_v21 = vadd.f32 %v9953_v28, %v9676_v4 }
 0x5d8   :  { %v3858_v51 = vadd.f32 %v9742_v16, %v3821_v41  ;;  %4860 = vmatmul.bf16.vlgmr.msra.gmra.mxu2 %v7892_v5  ;;  %v7968_v41 = vld [vmem:[%s10428_s3 + $0x1c8] sm:$0xff] }
 0x5d9   :  { %4944 = vmatpush.bf16.msrb.mxu2 %v7969_v12 }
 0x5da   :  { %v8445_v55 = vpack.c.bf16 %v3858_v51, %v3857_v19  ;;  %v3711_v29 = vpop.f32.mrf.mxu3 }
 0x5db   :  { %v3627_v49 = vpop.f32.mrf.mxu2  ;;  %v3712_v57 = vadd.f32 %v3711_v29, %v3623_v46  ;;  %v7895_v29 = vld [vmem:[#allocation3 + $0x50] sm:$0xff] }
 0x5dc   :  { %8564 = vst [vmem:[#allocation3 + $0xa8] sm:$0xff] %v8445_v55   ;;  %v9990_v50 = vpop.f32.mrf.mxu1  ;;  %v3628_v10 = vadd.f32 %v3627_v49, %v3539_v6  ;;  %v7903_v55 = vld [vmem:[#allocation3 + $0xa0] sm:$0xff] }
 0x5dd   :  { %v3790_v3 = vmul.f32 0.2, %v3712_v57  ;;  %vm3758_vm14 = vcmp.ge.f32.partialorder %v3712_v57, 0.0  ;;  %4945 = vmatpush.bf16.msrb.mxu2 %v7968_v41  ;;  %v3546_v36 = vadd.f32 %v9990_v50, %v9688_v17  ;;  %v8629_v17 = vld [vmem:[%s10424_s5 + $0x3] ss:$0 sm:$0xff] }
 0x5df   :  { %v3822_v15 = vsel %vm3758_vm14, %v3712_v57, %v3790_v3 }
 0x5e0   :  { %v3859_v45 = vadd.f32 %v9742_v16, %v3822_v15 }
 0x5e1   :  { %4946 = vmatpush.bf16.msrb.mxu2 %v7967_v34 }
 0x5e2   :  { %v3713_v42 = vpop.f32.mrf.mxu3 }
 0x5e3   :  { %v3629_v0 = vpop.f32.mrf.mxu2  ;;  %v3714_v60 = vadd.f32 %v3713_v42, %v3625_v37 }
 0x5e4   :  { %v10015_v27 = vpop.f32.mrf.mxu1  ;;  %v3630_v35 = vadd.f32 %v3629_v0, %v3541_v21 }
 0x5e5   :  { %vm3759_vm15 = vcmp.ge.f32.partialorder %v3714_v60, 0.0  ;;  %v3791_v13 = vmul.f32 0.2, %v3714_v60 }
 0x5e7   :  { %v3823_v44 = vsel %vm3759_vm15, %v3714_v60, %v3791_v13  ;;  %4841 = vmatmul.bf16.gmra.mxu1 %v7901_v43  ;;  %4889 = vmatmul.bf16.vlgmr.msra.gmra.mxu3 %v7893_v52  ;;  %v7904_v13 = vld [vmem:[#allocation3 + $0xa8] sm:$0xff] }
 0x5e8   :  { %v3860_v18 = vadd.f32 %v9742_v16, %v3823_v44  ;;  %4865 = vmatmul.bf16.gmra.mxu2 %v7894_v2 }
 0x5ea   :  { %v8450_v38 = vpack.c.bf16 %v3860_v18, %v3859_v45  ;;  %v3716_v22 = vpop.f32.mrf.mxu3  ;;  %v3549_v45 = vadd.f32 %v10015_v27, %v9701_v39  ;;  %v10078_v39 = vld [vmem:[%s10424_s5 + $0x4] ss:$0 sm:$0xff] }
 0x5eb   :  { %v3632_v47 = vpop.f32.mrf.mxu2  ;;  %v3717_v25 = vadd.f32 %v3716_v22, %v3628_v10 }
 0x5ec   :  { %8565 = vst [vmem:[#allocation3 + $0xb0] sm:$0xff] %v8450_v38   ;;  %v10027_v26 = vpop.f32.mrf.mxu1  ;;  %v3633_v61 = vadd.f32 %v3632_v47, %v3544_v58 }
 0x5ed   :  { %v3792_v52 = vmul.f32 0.2, %v3717_v25  ;;  %vm3760_vm0 = vcmp.ge.f32.partialorder %v3717_v25, 0.0 }
 0x5ef   :  { %v3824_v51 = vsel %vm3760_vm0, %v3717_v25, %v3792_v52 }
 0x5f0   :  { %v3861_v49 = vadd.f32 %v9742_v16, %v3824_v51 }
 0x5f2   :  { %v3718_v5 = vpop.f32.mrf.mxu3 }
 0x5f3   :  { %v3634_v19 = vpop.f32.mrf.mxu2  ;;  %v3719_v4 = vadd.f32 %v3718_v5, %v3630_v35  ;;  %v7905_v35 = vld [vmem:[#allocation3 + $0xb0] sm:$0xff] }
 0x5f4   :  { %v10046_v28 = vpop.f32.mrf.mxu1  ;;  %v3635_v37 = vadd.f32 %v3634_v19, %v3546_v36 }
 0x5f5   :  { %vm3761_vm2 = vcmp.ge.f32.partialorder %v3719_v4, 0.0  ;;  %v3793_v30 = vmul.f32 0.2, %v3719_v4  ;;  %v3554_v41 = vadd.f32 %v10046_v28, %v9714_v32  ;;  %v7906_v32 = vld [vmem:[#allocation3 + $0xc0] sm:$0xff] }
 0x5f7   :  { %v3825_v46 = vsel %vm3761_vm2, %v3719_v4, %v3793_v30  ;;  %4846 = vmatmul.bf16.gmra.mxu1 %v7903_v55  ;;  %4894 = vmatmul.bf16.gmra.mxu3 %v7895_v29 }
 0x5f8   :  { %v3862_v11 = vadd.f32 %v9742_v16, %v3825_v46  ;;  %4870 = vmatmul.bf16.gmra.mxu2 %v7902_v24  ;;  %v7976_v16 = vld [vmem:[%s10428_s3 + $0x208] sm:$0xff] }
 0x5f9   :  { %4974 = vmatpush.bf16.msrb.mxu3 %v7976_v16 }
 0x5fa   :  { %v8455_v20 = vpack.c.bf16 %v3862_v11, %v3861_v49  ;;  %v3721_v57 = vpop.f32.mrf.mxu3 }
 0x5fb   :  { %v3637_v7 = vpop.f32.mrf.mxu2  ;;  %v3722_v40 = vadd.f32 %v3721_v57, %v3633_v61 }
 0x5fc   :  { %8566 = vst [vmem:[#allocation3 + $0xc8] sm:$0xff] %v8455_v20   ;;  %v10055_v54 = vpop.f32.mrf.mxu1  ;;  %v3638_v38 = vadd.f32 %v3637_v7, %v3549_v45 }
 0x5fd   :  { %v3794_v3 = vmul.f32 0.2, %v3722_v40  ;;  %vm3762_vm3 = vcmp.ge.f32.partialorder %v3722_v40, 0.0  ;;  %4975 = vmatpush.bf16.msrb.mxu3 %v7975_v56  ;;  %v3556_v46 = vadd.f32 %v10055_v54, %v9719_v31 }
 0x5ff   :  { %v3826_v48 = vsel %vm3762_vm3, %v3722_v40, %v3794_v3 }
 0x600   :  { %v3863_v50 = vadd.f32 %v8629_v17, %v3826_v48 }
 0x602   :  { %v3723_v42 = vpop.f32.mrf.mxu3 }
 0x603   :  { %v3639_v0 = vpop.f32.mrf.mxu2  ;;  %v3724_v60 = vadd.f32 %v3723_v42, %v3635_v37 }
 0x604   :  { %v4745_v43 = vpop.f32.mrf.mxu1 }
 0x605   :  { %vm3763_vm4 = vcmp.ge.f32.partialorder %v3724_v60, 0.0  ;;  %v3795_v15 = vmul.f32 0.2, %v3724_v60 }
 0x607   :  { %v3827_v2 = vsel %vm3763_vm4, %v3724_v60, %v3795_v15  ;;  %4899 = vmatmul.bf16.gmra.mxu3 %v7903_v55  ;;  %4918 = vmatmul.bf16.vlgmr.msrb.gmra.mxu1 %v9884_v62  ;;  %v3551_v62 = vadd.f32 %v10027_v26, %v9710_v1  ;;  %v4746_v1 = vadd.f32 %v10078_v39, %v4745_v43  ;;  %v7907_v43 = vld [vmem:[#allocation3 + $0xc8] sm:$0xff] }
 0x608   :  { %v3864_v44 = vadd.f32 %v8629_v17, %v3827_v2  ;;  %4875 = vmatmul.bf16.gmra.mxu2 %v7904_v13 }
 0x609   :  { %v3640_v47 = vadd.f32 %v3639_v0, %v3551_v62 }
 0x60a   :  { %v8460_v18 = vpack.c.bf16 %v3864_v44, %v3863_v50  ;;  %v3726_v6 = vpop.f32.mrf.mxu3 }
 0x60b   :  { %v3642_v22 = vpop.f32.mrf.mxu2  ;;  %v3727_v10 = vadd.f32 %v3726_v6, %v3638_v38 }
 0x60c   :  { %8567 = vst [vmem:[#allocation3 + $0xd0] sm:$0xff] %v8460_v18   ;;  %v10071_v23 = vpop.f32.mrf.mxu1  ;;  %v3643_v51 = vadd.f32 %v3642_v22, %v3554_v41 }
 0x60d   :  { %v3796_v59 = vmul.f32 0.2, %v3727_v10  ;;  %vm3764_vm5 = vcmp.ge.f32.partialorder %v3727_v10, 0.0 }
 0x60f   :  { %v3828_v12 = vsel %vm3764_vm5, %v3727_v10, %v3796_v59 }
 0x610   :  { %v3865_v26 = vadd.f32 %v8629_v17, %v3828_v12 }
 0x612   :  { %v3728_v9 = vpop.f32.mrf.mxu3 }
 0x613   :  { %v3644_v25 = vpop.f32.mrf.mxu2  ;;  %v3729_v21 = vadd.f32 %v3728_v9, %v3640_v47 }
 0x614   :  { %v4750_v27 = vpop.f32.mrf.mxu1  ;;  %v3645_v49 = vadd.f32 %v3644_v25, %v3556_v46 }
 0x615   :  { %vm3765_vm6 = vcmp.ge.f32.partialorder %v3729_v21, 0.0  ;;  %v3797_v14 = vmul.f32 0.2, %v3729_v21  ;;  %v4751_v7 = vadd.f32 %v10078_v39, %v4750_v27 }
 0x617   :  { %v3829_v52 = vsel %vm3765_vm6, %v3729_v21, %v3797_v14  ;;  %4904 = vmatmul.bf16.gmra.mxu3 %v7905_v35  ;;  %4923 = vmatmul.bf16.gmra.mxu1 %v9920_v8  ;;  %v8040_v35 = vld [vmem:[%s10427_s4 + $0x180] sm:$0xff] }
 0x618   :  { %v3866_v5 = vadd.f32 %v8629_v17, %v3829_v52  ;;  %4947 = vmatmul.bf16.vlgmr.msrb.gmra.mxu2 %v9922_v63  ;;  %5808 = vmatpush.bf16.msrb.mxu0 %v8040_v35  ;;  %v8023_v35 = vld [vmem:[%s10427_s4 + $0xf8] sm:$0xff] }
 0x61a   :  { %v8465_v19 = vpack.c.bf16 %v3866_v5, %v3865_v26  ;;  %v3731_v4 = vpop.f32.mrf.mxu3 }
 0x61b   :  { %v4774_v30 = vpop.f32.mrf.mxu2  ;;  %v3732_v24 = vadd.f32 %v3731_v4, %v3643_v51 }
 0x61c   :  { %8568 = vst [vmem:[#allocation3 + $0xd8] sm:$0xff] %v8465_v19   ;;  %v4775_v55 = vadd.f32 %v4774_v30, %v4746_v1  ;;  %v10085_v29 = vpop.f32.mrf.mxu1 }
 0x61d   :  { %v3798_v11 = vmul.f32 0.2, %v3732_v24  ;;  %vm3766_vm7 = vcmp.ge.f32.partialorder %v3732_v24, 0.0 }
 0x61f   :  { %v3830_v57 = vsel %vm3766_vm7, %v3732_v24, %v3798_v11 }
 0x620   :  { %v3867_v16 = vadd.f32 %v8629_v17, %v3830_v57  ;;  %v7998_v57 = vld [vmem:[%s10427_s4 + $0x30] sm:$0xff] }
 0x622   :  { %v3733_v58 = vpop.f32.mrf.mxu3 }
 0x623   :  { %v3734_v63 = vadd.f32 %v3733_v58, %v3645_v49  ;;  %v10089_v20 = vpop.f32.mrf.mxu2  ;;  %v7909_v6 = vld [vmem:[#allocation3 + $0xd8] sm:$0xff] }
 0x624   :  { %v4755_v28 = vpop.f32.mrf.mxu1 }
 0x625   :  { %vm3767_vm8 = vcmp.ge.f32.partialorder %v3734_v63, 0.0  ;;  %v3799_v34 = vmul.f32 0.2, %v3734_v63 }
 0x627   :  { %v3831_v61 = vsel %vm3767_vm8, %v3734_v63, %v3799_v34  ;;  %4928 = vmatmul.bf16.gmra.mxu1 %v7906_v32  ;;  %4976 = vmatmul.bf16.vlgmr.msrb.gmra.mxu3 %v9920_v8  ;;  %v7908_v8 = vld [vmem:[#allocation3 + $0xd0] sm:$0xff]  ;;  %v8007_v63 = vld [vmem:[%s10427_s4 + $0x78] sm:$0xff] }
 0x628   :  { %v3868_v31 = vadd.f32 %v8629_v17, %v3831_v61  ;;  %4952 = vmatmul.bf16.gmra.mxu2 %v9945_v53  ;;  %v4756_v53 = vadd.f32 %v10078_v39, %v4755_v28  ;;  %v7999_v32 = vld [vmem:[%s10427_s4 + $0x38] sm:$0xff]  ;;  %v8006_v28 = vld [vmem:[%s10427_s4 + $0x70] sm:$0xff] }
 0x629   :  { %5731 = vmatpush.bf16.msra.mxu2 %v8007_v63  ;;  %5717 = vmatpush.bf16.msra.mxu1 %v7999_v32 }
 0x62a   :  { %v8470_v54 = vpack.c.bf16 %v3868_v31, %v3867_v16  ;;  %v4803_v40 = vpop.f32.mrf.mxu3  ;;  %v8005_v16 = vld [vmem:[%s10427_s4 + $0x68] sm:$0xff] }
 0x62b   :  { %v4779_v36 = vpop.f32.mrf.mxu2  ;;  %v4804_v56 = vadd.f32 %v4803_v40, %v4775_v55  ;;  %v8004_v40 = vld [vmem:[%s10427_s4 + $0x60] sm:$0xff] }
 0x62c   :  { %8569 = vst [vmem:[#allocation3 + $0xe0] sm:$0xff] %v8470_v54   ;;  %v4780_v37 = vadd.f32 %v4779_v36, %v4751_v7  ;;  %v10094_v3 = vpop.f32.mrf.mxu1  ;;  %v7997_v54 = vld [vmem:[%s10427_s4 + $0x28] sm:$0xff]  ;;  %v7996_v36 = vld [vmem:[%s10427_s4 + $0x20] sm:$0xff] }
 0x62d   :  { %5732 = vmatpush.bf16.msra.mxu2 %v8006_v28  ;;  %5718 = vmatpush.bf16.msra.mxu1 %v7998_v57  ;;  %v7984_v57 = vld [vmem:[#allocation4 + $0x8] sm:$0xff] }
 0x631   :  { %5733 = vmatpush.bf16.msra.mxu2 %v8005_v16  ;;  %5719 = vmatpush.bf16.msra.mxu1 %v7997_v54  ;;  %v8020_v16 = vld [vmem:[%s10427_s4 + $0xe0] sm:$0xff]  ;;  %v8039_v54 = vld [vmem:[%s10427_s4 + $0x178] sm:$0xff] }
 0x632   :  { %v10096_v42 = vpop.f32.mrf.mxu3 }
 0x633   :  { %v10098_v0 = vpop.f32.mrf.mxu2  ;;  %v7910_v14 = vld [vmem:[#allocation3 + $0xe0] sm:$0xff] }
 0x634   :  { %v4760_v60 = vpop.f32.mrf.mxu1 }
 0x635   :  { %v4761_v38 = vadd.f32 %v10078_v39, %v4760_v60  ;;  %5734 = vmatpush.bf16.msra.mxu2 %v8004_v40  ;;  %5720 = vmatpush.bf16.msra.mxu1 %v7996_v36  ;;  %v7983_v40 = vld [vmem:[#allocation4] sm:$0xff]  ;;  %v8019_v36 = vld [vmem:[%s10427_s4 + $0xd8] sm:$0xff] }
 0x637   :  { %4933 = vmatmul.bf16.gmra.mxu1 %v7908_v8  ;;  %4981 = vmatmul.bf16.gmra.mxu3 %v9980_v33 }
 0x638   :  { %4957 = vmatmul.bf16.gmra.mxu2 %v7907_v43  ;;  %v8003_v43 = vld [vmem:[%s10427_s4 + $0x58] sm:$0xff] }
 0x639   :  { %5735 = vmatpush.bf16.msra.mxu2 %v8003_v43  ;;  %v4748_v43 = vadd.f32 %v10078_v39, %v10071_v23 }
 0x63a   :  { %v4808_v48 = vpop.f32.mrf.mxu3 }
 0x63b   :  { %v4784_v15 = vpop.f32.mrf.mxu2  ;;  %v4809_v13 = vadd.f32 %v4808_v48, %v4780_v37  ;;  %v7995_v48 = vld [vmem:[%s10427_s4 + $0x18] sm:$0xff]  ;;  %v4777_v23 = vadd.f32 %v10089_v20, %v4748_v43 }
 0x63c   :  { %v4785_v2 = vadd.f32 %v4784_v15, %v4756_v53  ;;  %v4762_v17 = vpop.f32.mrf.mxu1  ;;  %v8015_v53 = vld [vmem:[%s10427_s4 + $0xb8] sm:$0xff]  ;;  %v8002_v15 = vld [vmem:[%s10427_s4 + $0x50] sm:$0xff]  ;;  %5721 = vmatpush.bf16.msra.mxu1 %v7995_v48 }
 0x63d   :  { %v4763_v59 = vadd.f32 %v10078_v39, %v4762_v17  ;;  %5745 = vmatpush.bf16.msra.mxu3 %v8015_v53  ;;  %5736 = vmatpush.bf16.msra.mxu2 %v8002_v15  ;;  %v8018_v48 = vld [vmem:[%s10427_s4 + $0xd0] sm:$0xff]  ;;  %v8025_v15 = vld [vmem:[%s10427_s4 + $0x108] sm:$0xff] }
 0x642   :  { %v10102_v50 = vpop.f32.mrf.mxu3 }
 0x643   :  { %v10104_v44 = vpop.f32.mrf.mxu2 }
 0x644   :  { %v4832_v45 = vpop.f32.mrf.mxu1 }
 0x645   :  { %v4833_v18 = vadd.f32 %v4832_v45, %v4804_v56 }
 0x647   :  { %4986 = vmatmul.bf16.gmra.mxu3 %v7908_v8 }
 0x648   :  { %4962 = vmatmul.bf16.gmra.mxu2 %v7909_v6  ;;  %v8013_v6 = vld [vmem:[%s10427_s4 + $0xa8] sm:$0xff] }
 0x64a   :  { %v4813_v33 = vpop.f32.mrf.mxu3 }
 0x64b   :  { %v4789_v22 = vpop.f32.mrf.mxu2  ;;  %v4814_v10 = vadd.f32 %v4813_v33, %v4785_v2  ;;  %v7994_v2 = vld [vmem:[%s10427_s4 + $0x10] sm:$0xff]  ;;  %v8000_v33 = vld [vmem:[%s10427_s4 + $0x40] sm:$0xff] }
 0x64c   :  { %v4790_v62 = vadd.f32 %v4789_v22, %v4761_v38  ;;  %v10107_v47 = vpop.f32.mrf.mxu1  ;;  %5722 = vmatpush.bf16.msra.mxu1 %v7994_v2  ;;  %v7993_v38 = vld [vmem:[%s10427_s4 + $0x8] sm:$0xff]  ;;  %v8012_v22 = vld [vmem:[%s10427_s4 + $0xa0] sm:$0xff] }
 0x64d   :  { %v8037_v2 = vld [vmem:[%s10427_s4 + $0x168] sm:$0xff] }
 0x650   :  { %5723 = vmatpush.bf16.msra.mxu1 %v7993_v38  ;;  %v8017_v38 = vld [vmem:[%s10427_s4 + $0xc8] sm:$0xff] }
 0x652   :  { %v10110_v9 = vpop.f32.mrf.mxu3 }
 0x653   :  { %v4791_v25 = vpop.f32.mrf.mxu2 }
 0x654   :  { %v4792_v21 = vadd.f32 %v4791_v25, %v4763_v59  ;;  %v4837_v27 = vpop.f32.mrf.mxu1 }
 0x655   :  { %v4838_v12 = vadd.f32 %v4837_v27, %v4809_v13  ;;  %v8014_v13 = vld [vmem:[%s10427_s4 + $0xb0] sm:$0xff] }
 0x656   :  { %5746 = vmatpush.bf16.msra.mxu3 %v8014_v13 }
 0x657   :  { %4991 = vmatmul.bf16.gmra.mxu3 %v7910_v14  ;;  %v8011_v14 = vld [vmem:[%s10427_s4 + $0x98] sm:$0xff] }
 0x65a   :  { %v4818_v52 = vpop.f32.mrf.mxu3  ;;  %5747 = vmatpush.bf16.msra.mxu3 %v8013_v6  ;;  %v7985_v6 = vld [vmem:[#allocation4 + $0x10] sm:$0xff] }
 0x65b   :  { %v4819_v1 = vadd.f32 %v4818_v52, %v4790_v62  ;;  %v4861_v26 = vpop.f32.mrf.mxu2  ;;  %v7992_v62 = vld [vmem:[%s10427_s4] sm:$0xff]  ;;  %v8030_v52 = vld [vmem:[%s10427_s4 + $0x130] sm:$0xff] }
 0x65c   :  { %v4862_v5 = vadd.f32 %v4861_v26, %v4833_v18  ;;  %v10115_v41 = vpop.f32.mrf.mxu1  ;;  %v8001_v18 = vld [vmem:[%s10427_s4 + $0x48] sm:$0xff]  ;;  %5724 = vmatpush.bf16.msra.mxu1 %v7992_v62  ;;  %v8022_v26 = vld [vmem:[%s10427_s4 + $0xf0] sm:$0xff] }
 0x65d   :  { %5737 = vmatpush.bf16.msra.mxu2 %v8001_v18  ;;  %v4806_v18 = vadd.f32 %v10096_v42, %v4777_v23  ;;  %v8051_v23 = vld [vmem:[%s10427_s4 + $0x1d8] sm:$0xff] }
 0x65e   :  { %5748 = vmatpush.bf16.msra.mxu3 %v8012_v22  ;;  %v8036_v22 = vld [vmem:[%s10427_s4 + $0x160] sm:$0xff] }
 0x65f   :  { %5725 = vmatmul.bf16.vlgmr.msra.gmra.mxu1 %v7983_v40  ;;  %v4835_v20 = vadd.f32 %v10107_v47, %v4806_v18  ;;  %v8035_v47 = vld [vmem:[%s10427_s4 + $0x158] sm:$0xff] }
 0x660   :  { %5759 = vmatpush.bf16.msrb.mxu1 %v8023_v35  ;;  %v8063_v18 = vld [vmem:[%s10427_s4 + $0x238] sm:$0xff] }
 0x661   :  { %5738 = vmatpush.bf16.msra.mxu2 %v8000_v33  ;;  %v8024_v33 = vld [vmem:[%s10427_s4 + $0x100] sm:$0xff] }
 0x662   :  { %v4820_v19 = vpop.f32.mrf.mxu3  ;;  %5749 = vmatpush.bf16.msra.mxu3 %v8011_v14 }
 0x663   :  { %v10117_v4 = vadd.f32 %v4820_v19, %v4792_v21  ;;  %v10119_v51 = vpop.f32.mrf.mxu2  ;;  %v8029_v19 = vld [vmem:[%s10427_s4 + $0x128] sm:$0xff] }
 0x664   :  { %v4842_v30 = vpop.f32.mrf.mxu1  ;;  %5760 = vmatpush.bf16.msrb.mxu1 %v8022_v26  ;;  %5739 = vmatmul.bf16.vlgmr.msra.gmra.mxu2 %v7984_v57  ;;  %v8034_v26 = vld [vmem:[%s10427_s4 + $0x150] sm:$0xff] }
 0x665   :  { %v4843_v55 = vadd.f32 %v4842_v30, %v4814_v10  ;;  %v8031_v10 = vld [vmem:[%s10427_s4 + $0x138] sm:$0xff] }
 0x666   :  { %5773 = vmatpush.bf16.msrb.mxu2 %v8031_v10 }
 0x66a   :  { %v4890_v24 = vpop.f32.mrf.mxu3  ;;  %5774 = vmatpush.bf16.msrb.mxu2 %v8030_v52 }
 0x66b   :  { %v4866_v46 = vpop.f32.mrf.mxu2  ;;  %v10121_v49 = vadd.f32 %v4890_v24, %v4862_v5  ;;  %v8009_v24 = vld [vmem:[%s10427_s4 + $0x88] sm:$0xff] }
 0x66c   :  { %v4867_v11 = vadd.f32 %v4866_v46, %v4838_v12  ;;  %v10123_v58 = vpop.f32.mrf.mxu1  ;;  %v8021_v46 = vld [vmem:[%s10427_s4 + $0xe8] sm:$0xff] }
 0x66d   :  { %5761 = vmatpush.bf16.msrb.mxu1 %v8021_v46 }
 0x66e   :  { %5775 = vmatpush.bf16.msrb.mxu2 %v8029_v19  ;;  %v8054_v19 = vld [vmem:[%s10427_s4 + $0x1f0] sm:$0xff] }
 0x671   :  { %5762 = vmatpush.bf16.msrb.mxu1 %v8020_v16 }
 0x672   :  { %v10137_v34 = vpop.f32.mrf.mxu3 }
 0x673   :  { %v10139_v61 = vpop.f32.mrf.mxu2 }
 0x674   :  { %v4847_v7 = vpop.f32.mrf.mxu1 }
 0x675   :  { %v4848_v31 = vadd.f32 %v4847_v7, %v4819_v1  ;;  %v8010_v1 = vld [vmem:[%s10427_s4 + $0x90] sm:$0xff]  ;;  %v8008_v7 = vld [vmem:[%s10427_s4 + $0x80] sm:$0xff]  ;;  %5763 = vmatpush.bf16.msrb.mxu1 %v8019_v36 }
 0x676   :  { %5750 = vmatpush.bf16.msra.mxu3 %v8010_v1  ;;  %v7986_v1 = vld [vmem:[#allocation4 + $0x20] sm:$0xff] }
 0x679   :  { %5764 = vmatpush.bf16.msrb.mxu1 %v8018_v48 }
 0x67a   :  { %v4895_v56 = vpop.f32.mrf.mxu3  ;;  %5751 = vmatpush.bf16.msra.mxu3 %v8009_v24 }
 0x67b   :  { %v4871_v37 = vpop.f32.mrf.mxu2  ;;  %v10153_v60 = vadd.f32 %v4895_v56, %v4867_v11  ;;  %v8028_v11 = vld [vmem:[%s10427_s4 + $0x120] sm:$0xff] }
 0x67c   :  { %v4872_v8 = vadd.f32 %v4871_v37, %v4843_v55  ;;  %v10200_v27 = vpop.f32.mrf.mxu1  ;;  %5776 = vmatpush.bf16.msrb.mxu2 %v8028_v11  ;;  %v8026_v37 = vld [vmem:[%s10427_s4 + $0x110] sm:$0xff] }
 0x67d   :  { %5765 = vmatpush.bf16.msrb.mxu1 %v8017_v38 }
 0x67e   :  { %5752 = vmatpush.bf16.msra.mxu3 %v8008_v7 }
 0x681   :  { %5753 = vmatmul.bf16.vlgmr.msra.gmra.mxu3 %v7985_v6 }
 0x682   :  { %v10173_v17 = vpop.f32.mrf.mxu3  ;;  %5787 = vmatpush.bf16.msrb.mxu3 %v8039_v54 }
 0x683   :  { %v10175_v45 = vpop.f32.mrf.mxu2 }
 0x684   :  { %v4919_v55 = vpop.f32.mrf.mxu1 }
 0x685   :  { %v4920_v10 = vadd.f32 %v4919_v55, %v10121_v49  ;;  %v8055_v49 = vld [vmem:[%s10427_s4 + $0x1f8] sm:$0xff]  ;;  %v4753_v55 = vadd.f32 %v10078_v39, %v10085_v29  ;;  %v10310_v29 = vld [vmem:[%s10424_s5 + $0x5] ss:$0 sm:$0xff] }
 0x687   :  { %v4782_v7 = vadd.f32 %v10098_v0, %v4753_v55  ;;  %v8052_v0 = vld [vmem:[%s10427_s4 + $0x1e0] sm:$0xff] }
 0x689   :  { %v4811_v40 = vadd.f32 %v10102_v50, %v4782_v7 }
 0x68a   :  { %v4900_v59 = vpop.f32.mrf.mxu3 }
 0x68b   :  { %v4876_v25 = vpop.f32.mrf.mxu2  ;;  %v10198_v21 = vadd.f32 %v4900_v59, %v4872_v8  ;;  %v8038_v8 = vld [vmem:[%s10427_s4 + $0x170] sm:$0xff]  ;;  %v4864_v59 = vadd.f32 %v10119_v51, %v4835_v20  ;;  %v4840_v43 = vadd.f32 %v10115_v41, %v4811_v40  ;;  %v7989_v20 = vld [vmem:[#allocation4 + $0x40] sm:$0xff] }
 0x68c   :  { %v4877_v12 = vadd.f32 %v4876_v25, %v4848_v31  ;;  %v8027_v31 = vld [vmem:[%s10427_s4 + $0x118] sm:$0xff]  ;;  %v4921_v56 = vpop.f32.mrf.mxu1  ;;  %5788 = vmatpush.bf16.msrb.mxu3 %v8038_v8  ;;  %v8032_v8 = vld [vmem:[%s10427_s4 + $0x140] sm:$0xff]  ;;  %5809 = vmatmul.bf16.vlgmr.msrb.gmra.mxu0 %v7989_v20 }
 0x68d   :  { %5777 = vmatpush.bf16.msrb.mxu2 %v8027_v31  ;;  %v4893_v35 = vadd.f32 %v10137_v34, %v4864_v59  ;;  %v8061_v59 = vld [vmem:[%s10427_s4 + $0x228] sm:$0xff] }
 0x68f   :  { %v4922_v51 = vadd.f32 %v4921_v56, %v4893_v35 }
 0x690   :  { %5789 = vmatpush.bf16.msrb.mxu3 %v8037_v2 }
 0x691   :  { %5778 = vmatpush.bf16.msrb.mxu2 %v8026_v37 }
 0x692   :  { %v10217_v5 = vpop.f32.mrf.mxu3 }
 0x693   :  { %v10222_v30 = vpop.f32.mrf.mxu2 }
 0x694   :  { %v4924_v42 = vpop.f32.mrf.mxu1  ;;  %5790 = vmatpush.bf16.msrb.mxu3 %v8036_v22  ;;  %v8062_v22 = vld [vmem:[%s10427_s4 + $0x230] sm:$0xff] }
 0x695   :  { %5779 = vmatpush.bf16.msrb.mxu2 %v8025_v15  ;;  %v4925_v48 = vadd.f32 %v4924_v42, %v10153_v60 }
 0x698   :  { %5791 = vmatpush.bf16.msrb.mxu3 %v8035_v47 }
 0x699   :  { %5780 = vmatpush.bf16.msrb.mxu2 %v8024_v33  ;;  %v8050_v33 = vld [vmem:[%s10427_s4 + $0x1d0] sm:$0xff] }
 0x69a   :  { %v4905_v63 = vpop.f32.mrf.mxu3 }
 0x69b   :  { %v10233_v32 = vadd.f32 %v4905_v63, %v4877_v12  ;;  %v4948_v28 = vpop.f32.mrf.mxu2  ;;  %v8016_v12 = vld [vmem:[%s10427_s4 + $0xc0] sm:$0xff]  ;;  %v8033_v63 = vld [vmem:[%s10427_s4 + $0x148] sm:$0xff] }
 0x69c   :  { %v4949_v25 = vadd.f32 %v4948_v28, %v4920_v10  ;;  %5766 = vmatpush.bf16.msrb.mxu1 %v8016_v12  ;;  %5792 = vmatpush.bf16.msrb.mxu3 %v8034_v26  ;;  %v8053_v28 = vld [vmem:[%s10427_s4 + $0x1e8] sm:$0xff]  ;;  %v4926_v57 = vpop.f32.mrf.mxu1  ;;  %v4758_v10 = vadd.f32 %v10078_v39, %v10094_v3  ;;  %v8048_v26 = vld [vmem:[%s10427_s4 + $0x1c0] sm:$0xff] }
 0x69d   :  { %5829 = vmatpush.bf16.msra.mxu2 %v8063_v18 }
 0x69e   :  { %v4787_v47 = vadd.f32 %v10104_v44, %v4758_v10  ;;  %v8060_v44 = vld [vmem:[%s10427_s4 + $0x220] sm:$0xff] }
 0x69f   :  { %5767 = vmatmul.bf16.vlgmr.msrb.gmra.mxu1 %v7986_v1 }
 0x6a0   :  { %5815 = vmatpush.bf16.msra.mxu1 %v8055_v49  ;;  %5793 = vmatpush.bf16.msrb.mxu3 %v8033_v63  ;;  %v4816_v49 = vadd.f32 %v10110_v9, %v4787_v47  ;;  %v8059_v63 = vld [vmem:[%s10427_s4 + $0x218] sm:$0xff] }
 0x6a1   :  { %5830 = vmatpush.bf16.msra.mxu2 %v8062_v22 }
 0x6a2   :  { %v10258_v53 = vpop.f32.mrf.mxu3 }
 0x6a3   :  { %v4950_v13 = vpop.f32.mrf.mxu2 }
 0x6a4   :  { %v4951_v24 = vadd.f32 %v4950_v13, %v4922_v51  ;;  %5816 = vmatpush.bf16.msra.mxu1 %v8054_v19  ;;  %v4869_v13 = vadd.f32 %v10139_v61, %v4840_v43  ;;  %5794 = vmatpush.bf16.msrb.mxu3 %v8032_v8  ;;  %v4929_v60 = vpop.f32.mrf.mxu1  ;;  %v4845_v19 = vadd.f32 %v10123_v58, %v4816_v49  ;;  %v8058_v58 = vld [vmem:[%s10427_s4 + $0x210] sm:$0xff]  ;;  %v8056_v8 = vld [vmem:[%s10427_s4 + $0x200] sm:$0xff] }
 0x6a5   :  { %5831 = vmatpush.bf16.msra.mxu2 %v8061_v59  ;;  %v4930_v55 = vadd.f32 %v4929_v60, %v10198_v21  ;;  %v8071_v59 = vld [vmem:[%s10430_s6 + $0x38] sm:$0xff] }
 0x6a6   :  { %v4898_v41 = vadd.f32 %v10173_v17, %v4869_v13 }
 0x6a8   :  { %5817 = vmatpush.bf16.msra.mxu1 %v8053_v28  ;;  %v4927_v38 = vadd.f32 %v4926_v57, %v4898_v41  ;;  %5918 = vmatpush.bf16.msra.mxu3 %v8071_v59 }
 0x6a9   :  { %5832 = vmatpush.bf16.msra.mxu2 %v8060_v44 }
 0x6aa   :  { %v4977_v62 = vpop.f32.mrf.mxu3 }
 0x6ab   :  { %v4953_v14 = vpop.f32.mrf.mxu2  ;;  %v4978_v52 = vadd.f32 %v4977_v62, %v4949_v25 }
 0x6ac   :  { %v4954_v2 = vadd.f32 %v4953_v14, %v4925_v48  ;;  %5818 = vmatpush.bf16.msra.mxu1 %v8052_v0  ;;  %v8049_v14 = vld [vmem:[%s10427_s4 + $0x1c8] sm:$0xff] }
 0x6ad   :  { %v5005_v46 = vmul.f32 0.2, %v4978_v52  ;;  %vm4997_vm1 = vcmp.ge.f32.partialorder %v4978_v52, 0.0  ;;  %5833 = vmatpush.bf16.msra.mxu2 %v8059_v63 }
 0x6af   :  { %v5013_v16 = vsel %vm4997_vm1, %v4978_v52, %v5005_v46  ;;  %v4931_v52 = vpop.f32.mrf.mxu1 }
 0x6b0   :  { %v5026_v56 = vadd.f32 %v10310_v29, %v5013_v16  ;;  %5819 = vmatpush.bf16.msra.mxu1 %v8051_v23 }
 0x6b1   :  { %5834 = vmatpush.bf16.msra.mxu2 %v8058_v58 }
 0x6b2   :  { %v4979_v34 = vpop.f32.mrf.mxu3 }
 0x6b3   :  { %v4980_v11 = vadd.f32 %v4979_v34, %v4951_v24  ;;  %v4955_v54 = vpop.f32.mrf.mxu2  ;;  %v4874_v34 = vadd.f32 %v10175_v45, %v4845_v19 }
 0x6b4   :  { %v4956_v42 = vadd.f32 %v4955_v54, %v4927_v38  ;;  %5820 = vmatpush.bf16.msra.mxu1 %v8050_v33  ;;  %v8057_v54 = vld [vmem:[%s10427_s4 + $0x208] sm:$0xff] }
 0x6b5   :  { %vm4998_vm9 = vcmp.ge.f32.partialorder %v4980_v11, 0.0  ;;  %v5006_v31 = vmul.f32 0.2, %v4980_v11  ;;  %v4903_v28 = vadd.f32 %v10217_v5, %v4874_v34  ;;  %5835 = vmatpush.bf16.msra.mxu2 %v8057_v54 }
 0x6b7   :  { %v5014_v36 = vsel %vm4998_vm9, %v4980_v11, %v5006_v31  ;;  %v4932_v21 = vadd.f32 %v4931_v52, %v4903_v28  ;;  %v4934_v31 = vpop.f32.mrf.mxu1  ;;  %v8579_v52 = vld [vmem:[%s10424_s5 + $0x6] ss:$0 sm:$0xff] }
 0x6b8   :  { %v5027_v37 = vadd.f32 %v10310_v29, %v5014_v36  ;;  %5821 = vmatpush.bf16.msra.mxu1 %v8049_v14  ;;  %v8069_v14 = vld [vmem:[%s10430_s6 + $0x28] sm:$0xff] }
 0x6b9   :  { %5836 = vmatpush.bf16.msra.mxu2 %v8056_v8 }
 0x6ba   :  { %v8475_v50 = vpack.c.bf16 %v5027_v37, %v5026_v56  ;;  %v4982_v15 = vpop.f32.mrf.mxu3 }
 0x6bb   :  { %v4983_v6 = vadd.f32 %v4982_v15, %v4954_v2  ;;  %v4958_v61 = vpop.f32.mrf.mxu2  ;;  %v4935_v15 = vadd.f32 %v4934_v31, %v10233_v32 }
 0x6bc   :  { %8476 = vst [vmem:[#allocation4 + $0x28] sm:$0xff] %v8475_v50   ;;  %v4959_v11 = vadd.f32 %v4958_v61, %v4930_v55  ;;  %5822 = vmatpush.bf16.msra.mxu1 %v8048_v26  ;;  %v4850_v50 = vadd.f32 %v10200_v27, %v10117_v4  ;;  %v8065_v55 = vld [vmem:[%s10430_s6 + $0x8] sm:$0xff] }
 0x6bd   :  { %v5007_v17 = vmul.f32 0.2, %v4983_v6  ;;  %vm4999_vm10 = vcmp.ge.f32.partialorder %v4983_v6, 0.0 }
 0x6be   :  { %v4879_v23 = vadd.f32 %v10222_v30, %v4850_v50 }
 0x6bf   :  { %v5015_v39 = vsel %vm4999_vm10, %v4983_v6, %v5007_v17  ;;  %v4936_v41 = vpop.f32.mrf.mxu1 }
 0x6c0   :  { %v5028_v51 = vadd.f32 %v10310_v29, %v5015_v39  ;;  %v4908_v6 = vadd.f32 %v10258_v53, %v4879_v23 }
 0x6c2   :  { %v4984_v62 = vpop.f32.mrf.mxu3  ;;  %v4937_v61 = vadd.f32 %v4936_v41, %v4908_v6 }
 0x6c3   :  { %v4985_v25 = vadd.f32 %v4984_v62, %v4956_v42  ;;  %v7987_v12 = vld [vmem:[#allocation4 + $0x28] sm:$0xff]  ;;  %v4960_v9 = vpop.f32.mrf.mxu2 }
 0x6c4   :  { %5781 = vmatmul.bf16.vlgmr.msrb.gmra.mxu2 %v7987_v12  ;;  %v4961_v7 = vadd.f32 %v4960_v9, %v4932_v21 }
 0x6c5   :  { %vm5000_vm11 = vcmp.ge.f32.partialorder %v4985_v25, 0.0  ;;  %v5008_v3 = vmul.f32 0.2, %v4985_v25 }
 0x6c7   :  { %v5016_v35 = vsel %vm5000_vm11, %v4985_v25, %v5008_v3  ;;  %v8070_v25 = vld [vmem:[%s10430_s6 + $0x30] sm:$0xff] }
 0x6c8   :  { %v5029_v1 = vadd.f32 %v10310_v29, %v5016_v35  ;;  %5919 = vmatpush.bf16.msra.mxu3 %v8070_v25  ;;  %v8067_v35 = vld [vmem:[%s10430_s6 + $0x18] sm:$0xff] }
 0x6ca   :  { %v8480_v24 = vpack.c.bf16 %v5029_v1, %v5028_v51  ;;  %v4987_v46 = vpop.f32.mrf.mxu3  ;;  %v8066_v51 = vld [vmem:[%s10430_s6 + $0x10] sm:$0xff] }
 0x6cb   :  { %v4988_v57 = vadd.f32 %v4987_v46, %v4959_v11  ;;  %v4963_v5 = vpop.f32.mrf.mxu2  ;;  %v8064_v46 = vld [vmem:[%s10430_s6] sm:$0xff] }
 0x6cc   :  { %8570 = vst [vmem:[#allocation4 + $0x30] sm:$0xff] %v8480_v24   ;;  %v4964_v18 = vadd.f32 %v4963_v5, %v4935_v15  ;;  %5920 = vmatpush.bf16.msra.mxu3 %v8069_v14 }
 0x6cd   :  { %v5009_v16 = vmul.f32 0.2, %v4988_v57  ;;  %vm5001_vm12 = vcmp.ge.f32.partialorder %v4988_v57, 0.0 }
 0x6cf   :  { %v5017_v56 = vsel %vm5001_vm12, %v4988_v57, %v5009_v16 }
 0x6d0   :  { %v5030_v43 = vadd.f32 %v10310_v29, %v5017_v56 }
 0x6d2   :  { %v4989_v45 = vpop.f32.mrf.mxu3 }
 0x6d3   :  { %v4990_v40 = vadd.f32 %v4989_v45, %v4961_v7  ;;  %v7988_v36 = vld [vmem:[#allocation4 + $0x30] sm:$0xff]  ;;  %v4965_v38 = vpop.f32.mrf.mxu2 }
 0x6d4   :  { %5795 = vmatmul.bf16.vlgmr.msrb.gmra.mxu3 %v7988_v36  ;;  %v4966_v33 = vadd.f32 %v4965_v38, %v4937_v61  ;;  %v5932_v38 = vlaneseq }
 0x6d5   :  { %vm5002_vm13 = vcmp.ge.f32.partialorder %v4990_v40, 0.0  ;;  %v5010_v37 = vmul.f32 0.2, %v4990_v40 }
 0x6d6   :  { %v5933_v61 = vand.u32 127, %v5932_v38 }
 0x6d7   :  { %v5018_v0 = vsel %vm5002_vm13, %v4990_v40, %v5010_v37 }
 0x6d8   :  { %v5031_v48 = vadd.f32 %v10310_v29, %v5018_v0  ;;  %vm5934_vm3 = vcmp.lt.s32.totalorder %v5933_v61, 10  ;;  %vm5967_vm4 = vcmp.eq.s32.totalorder %v5933_v61, 10 }
 0x6da   :  { %v8485_v13 = vpack.c.bf16 %v5031_v48, %v5030_v43  ;;  %v4992_v2 = vpop.f32.mrf.mxu3 }
 0x6db   :  { %v4993_v60 = vadd.f32 %v4992_v2, %v4964_v18 }
 0x6dc   :  { %8571 = vst [vmem:[#allocation4 + $0x48] sm:$0xff] %v8485_v13   ;;  %v5726_v12 = vpop.f32.mrf.mxu1 }
 0x6dd   :  { %v5011_v22 = vmul.f32 0.2, %v4993_v60  ;;  %vm5003_vm14 = vcmp.ge.f32.partialorder %v4993_v60, 0.0  ;;  %v5727_v26 = vadd.f32 %v8579_v52, %v5726_v12 }
 0x6df   :  { %v5019_v32 = vsel %vm5003_vm14, %v4993_v60, %v5011_v22 }
 0x6e0   :  { %v5032_v30 = vadd.f32 %v10310_v29, %v5019_v32 }
 0x6e2   :  { %v4994_v20 = vpop.f32.mrf.mxu3 }
 0x6e3   :  { %v4995_v4 = vadd.f32 %v4994_v20, %v4966_v33  ;;  %v7990_v27 = vld [vmem:[#allocation4 + $0x48] sm:$0xff]  ;;  %v8580_v33 = vld [vmem:[%s10429_s7] ss:$0 sm:$0xff] }
 0x6e4   :  { %5823 = vmatmul.bf16.vlgmr.msra.gmra.mxu1 %v7990_v27  ;;  %v5728_v39 = vpop.f32.mrf.mxu1 }
 0x6e5   :  { %vm5004_vm15 = vcmp.ge.f32.partialorder %v4995_v4, 0.0  ;;  %v5012_v10 = vmul.f32 0.2, %v4995_v4  ;;  %v5729_v24 = vadd.f32 %v8579_v52, %v5728_v39 }
 0x6e7   :  { %v5020_v42 = vsel %vm5004_vm15, %v4995_v4, %v5012_v10  ;;  %v5740_v47 = vpop.f32.mrf.mxu2 }
 0x6e8   :  { %v5033_v17 = vadd.f32 %v10310_v29, %v5020_v42  ;;  %v8068_v29 = vld [vmem:[%s10430_s6 + $0x20] sm:$0xff]  ;;  %v5741_v9 = vadd.f32 %v5740_v47, %v5727_v26 }
 0x6e9   :  { %5921 = vmatpush.bf16.msra.mxu3 %v8068_v29 }
 0x6ea   :  { %v8490_v62 = vpack.c.bf16 %v5033_v17, %v5032_v30 }
 0x6ec   :  { %8572 = vst [vmem:[#allocation4 + $0x50] sm:$0xff] %v8490_v62  }
 0x6ed   :  { %5922 = vmatpush.bf16.msra.mxu3 %v8067_v35 }
 0x6ef   :  { %v5742_v49 = vpop.f32.mrf.mxu2 }
 0x6f0   :  { %v5743_v11 = vadd.f32 %v5742_v49, %v5729_v24 }
 0x6f1   :  { %5923 = vmatpush.bf16.msra.mxu3 %v8066_v51 }
 0x6f3   :  { %v7991_v53 = vld [vmem:[#allocation4 + $0x50] sm:$0xff] }
 0x6f4   :  { %5837 = vmatmul.bf16.vlgmr.msra.gmra.mxu2 %v7991_v53 }
 0x6f5   :  { %5924 = vmatpush.bf16.msra.mxu3 %v8065_v55 }
 0x6f9   :  { %5925 = vmatpush.bf16.msra.mxu3 %v8064_v46 }
 0x704   :  { %v5754_v3 = vpop.f32.mrf.mxu3 }
 0x705   :  { %v5755_v63 = vadd.f32 %v5754_v3, %v5741_v9 }
 0x709   :  { %v5810_v7 = vpop.f32.mrf.mxu0 }
 0x70c   :  { %v5756_v44 = vpop.f32.mrf.mxu3 }
 0x70d   :  { %v5757_v58 = vadd.f32 %v5756_v44, %v5743_v11 }
 0x711   :  { %v5812_v8 = vpop.f32.mrf.mxu0 }
 0x71c   :  { %v5768_v1 = vpop.f32.mrf.mxu1 }
 0x71d   :  { %v5769_v57 = vadd.f32 %v5768_v1, %v5755_v63 }
 0x724   :  { %v5770_v34 = vpop.f32.mrf.mxu1 }
 0x725   :  { %v5771_v45 = vadd.f32 %v5770_v34, %v5757_v58 }
 0x747   :  { %v5782_v19 = vpop.f32.mrf.mxu2 }
 0x748   :  { %v5783_v31 = vadd.f32 %v5782_v19, %v5769_v57 }
 0x74f   :  { %v5784_v21 = vpop.f32.mrf.mxu2 }
 0x750   :  { %v5785_v36 = vadd.f32 %v5784_v21, %v5771_v45 }
 0x757   :  { %v5796_v28 = vpop.f32.mrf.mxu3 }
 0x758   :  { %v5797_v54 = vadd.f32 %v5796_v28, %v5783_v31 }
 0x75a   :  { %v5811_v56 = vadd.f32 %v5810_v7, %v5797_v54 }
 0x75f   :  { %v5798_v40 = vpop.f32.mrf.mxu3 }
 0x760   :  { %v5799_v37 = vadd.f32 %v5798_v40, %v5785_v36 }
 0x761   :  { %v5824_v16 = vpop.f32.mrf.mxu1 }
 0x762   :  { %v5825_v0 = vadd.f32 %v5824_v16, %v5811_v56  ;;  %v5813_v48 = vadd.f32 %v5812_v8, %v5799_v37 }
 0x769   :  { %v5826_v43 = vpop.f32.mrf.mxu1 }
 0x76a   :  { %v5827_v15 = vadd.f32 %v5826_v43, %v5813_v48 }
 0x777   :  { %v5838_v5 = vpop.f32.mrf.mxu2 }
 0x778   :  { %v5839_v50 = vadd.f32 %v5838_v5, %v5825_v0 }
 0x77a   :  { %v5845_v2 = vmul.f32 0.2, %v5839_v50  ;;  %vm5843_vm0 = vcmp.ge.f32.partialorder %v5839_v50, 0.0 }
 0x77c   :  { %v5847_v41 = vsel %vm5843_vm0, %v5839_v50, %v5845_v2 }
 0x77f   :  { %v5840_v13 = vpop.f32.mrf.mxu2 }
 0x780   :  { %v5841_v23 = vadd.f32 %v5840_v13, %v5827_v15 }
 0x782   :  { %vm5844_vm2 = vcmp.ge.f32.partialorder %v5841_v23, 0.0  ;;  %v5846_v18 = vmul.f32 0.2, %v5841_v23 }
 0x784   :  { %v5848_v6 = vsel %vm5844_vm2, %v5841_v23, %v5846_v18 }
 0x785   :  { %v5849_v60 = vpack.c.bf16 %v5848_v6, %v5847_v41 }
 0x787   :  { %5926 = vmatmul.bf16.vlgmr.msra.gmra.mxu3 %v5849_v60 }
 0x80a   :  { %v5927_v22 = vpop.f32.mrf.mxu3 }
 0x80b   :  { %v5928_v20 = vadd.f32 %v8580_v33, %v5927_v22 }
 0x80d   :  { %v5957_v4 = vsub.f32 0.0, %v5928_v20  ;;  %v5935_v27 = vsel %vm5934_vm3, %v5928_v20, -1e+30 }
 0x80e   :  { %5937 = vmax.xlane.f32.xlu0 %v5935_v27 }
 0x80f   :  { %v5959_v32 = vmul.f32 1.442695, %v5957_v4 }
 0x811   :  { %8581 = vpow2.f32 %v5959_v32 }
 0x812   :  { %v5929_v10 = vpop.f32.mrf.mxu3 }
 0x813   :  { %v5930_v42 = vadd.f32 %v8580_v33, %v5929_v10 }
 0x815   :  { %v5958_v30 = vsub.f32 0.0, %v5930_v42  ;;  %v5936_v17 = vsel %vm5934_vm3, %v5930_v42, -1e+30 }
 0x816   :  { %5939 = vmax.xlane.f32.xlu0 %v5936_v17 }
 0x817   :  { %v8582_v62 = vpop.eup %8581  ;;  %v5961_v53 = vmul.f32 1.442695, %v5958_v30 }
 0x818   :  { %v5963_v59 = vadd.f32 1.0, %v8582_v62 }
 0x819   :  { %8583 = vpow2.f32 %v5961_v53 }
 0x81a   :  { %8585 = vrcp.f32 %v5963_v59 }
 0x81f   :  { %v8584_v25 = vpop.eup %8583 }
 0x820   :  { %v8586_v12 = vpop.eup %8585  ;;  %v5964_v14 = vadd.f32 1.0, %v8584_v25 }
 0x821   :  { %v5968_v29 = vsel %vm5967_vm4, %v8586_v12, 0.0 }
 0x822   :  { %8587 = vrcp.f32 %v5964_v14 }
 0x828   :  { %v8588_v47 = vpop.eup %8587 }
 0x829   :  { %v5969_v39 = vsel %vm5967_vm4, %v8588_v47, 0.0 }
 0x881   :  { %v5938_v3 = vpop.xlane.xlu0 %5937 }
 0x882   :  { %v5941_v49 = vsub.f32 %v5935_v27, %v5938_v3 }
 0x884   :  { %v5943_v35 = vmul.f32 1.442695, %v5941_v49 }
 0x886   :  { %8589 = vpow2.f32 %v5943_v35 }
 0x889   :  { %v5940_v52 = vpop.xlane.xlu0 %5939 }
 0x88a   :  { %v5942_v51 = vsub.f32 %v5936_v17, %v5940_v52 }
 0x88c   :  { %v8590_v1 = vpop.eup %8589  ;;  %v5945_v26 = vmul.f32 1.442695, %v5942_v51 }
 0x88d   :  { %v5947_v44 = vsel %vm5934_vm3, %v8590_v1, 0.0 }
 0x88e   :  { %8591 = vpow2.f32 %v5945_v26  ;;  %5949 = vadd.xlane.f32.xlu1 %v5947_v44 }
 0x894   :  { %v8592_v19 = vpop.eup %8591 }
 0x895   :  { %v5948_v55 = vsel %vm5934_vm3, %v8592_v19, 0.0 }
 0x896   :  { %5951 = vadd.xlane.f32.xlu1 %v5948_v55 }
 0x901   :  { %v5950_v9 = vpop.xlane.xlu1 %5949 }
 0x902   :  { %8593 = vrcp.f32 %v5950_v9 }
 0x908   :  { %v8594_v24 = vpop.eup %8593 }
 0x909   :  { %v5955_v46 = vmul.f32 %v8594_v24, %v5947_v44  ;;  %v5952_v34 = vpop.xlane.xlu1 %5951 }
 0x90a   :  { %8595 = vrcp.f32 %v5952_v34 }
 0x90b   :  { %v5970_v11 = vsel %vm5934_vm3, %v5955_v46, %v5968_v29 }
 0x90c   :  { %5972 = vst [vmem:[%s10431_s8] sm:$0xff] %v5970_v11 }
 0x910   :  { %v8596_v63 = vpop.eup %8595 }
 0x911   :  { %v5956_v28 = vmul.f32 %v8596_v63, %v5948_v55 }
 0x913   :  { %v5971_v57 = vsel %vm5934_vm3, %v5956_v28, %v5969_v39 }
 0x914   :  { %5973 = vst [vmem:[%s10431_s8 + $0x8] sm:$0xff] %v5971_v57 }

</bundles_post_ra>
